<compile_context>
chip_gen: v7x
topology: tpu7x:2x2x1
jax: 0.10.0
libtpu: 0.0.40
codegen_flags: <defaults>
</compile_context>

<pallas_src>
import numpy as np
import jax
import jax.numpy as jnp
from jax import lax
from jax.experimental import pallas as pl
from jax.experimental.pallas import tpu as pltpu

NEG_SLOPE = 0.01  # nn.LeakyReLU default negative_slope


def _leaky(v):
    return jnp.where(v > 0, v, NEG_SLOPE * v)


def hfl_kernel(x_ref, xflat_ref,
               wfc_ref, bfc_ref,            # fused [fc1.Linear1 | cnn1-mean-fold]
               w2t_ref, b2_ref,             # fc1.Linear2
               wd1p_ref, bd1_ref,           # cnn2 conv1 (tap dim zero-padded to 8)
               w2m_ref, bd2_ref,            # cnn2 conv2 (tap-merged)
               w3m_ref, bd3_ref,            # cnn2 conv3 (tap-merged)
               pool3t_ref,                  # (N, B) masked mean-pool matrix
               x1_ref, x2_ref, x3_ref,
               u1_scr, u2_scr, u3_scr):
    N = xflat_ref.shape[1]                  # B * L  (lane axis of the conv branch)
    C1, K1p = wd1p_ref.shape                # 128, 8 (7 real taps + 1 zero column)
    K1 = K1p - 1
    C2 = w2m_ref.shape[0]                   # 256
    K2 = w2m_ref.shape[1] // C1             # 5
    C3 = w3m_ref.shape[0]                   # 128
    K3 = w3m_ref.shape[1] // C2             # 3
    H1 = w2t_ref.shape[0]                   # 256 (fc hidden width)

    # ---------------- FC branch + cnn1 (mean-folded): one fused x-matmul ------
    x = x_ref[...]                          # (B, L)
    h0 = jnp.dot(x, wfc_ref[...], preferred_element_type=jnp.float32) + bfc_ref[...]
    x2_ref[...] = h0[:, H1:]                                 # (B, 128) lane-dense
    hfc = _leaky(h0[:, :H1])
    # TODO(synk): nn.Dropout(0.3) has no deterministic forward-pass equivalent;
    # treated as identity (eval mode).
    x1_ref[...] = _leaky(
        jnp.dot(hfc, w2t_ref[...], preferred_element_type=jnp.float32) + b2_ref[...])

    # ---------------- cnn2 branch, batched over the lane axis -----------------
    xf = xflat_ref[...]                     # (1, N); column b*L + t holds x[b, t]

    def shl(v, k):
        # column n of result = column (n + k) mod N of v.  Wrapped / cross-batch
        # garbage only ever reaches columns that pool3t zeroes out.
        return v if k == 0 else pltpu.roll(v, shift=N - k, axis=1)

    # conv1 (1 -> C1, K1=7) on the MXU: (C1, 8) @ (8, N), tap dim zero-padded.
    for k in range(K1):
        u1_scr[pl.ds(k, 1), :] = shl(xf, k)
    u1_scr[pl.ds(K1, 1), :] = xf            # finite filler; weight column K1 is zero
    h1 = jnp.maximum(
        jnp.dot(wd1p_ref[...], u1_scr[...], preferred_element_type=jnp.float32)
        + bd1_ref[...], 0.0)                                  # (C1, N)

    # conv2 (C1 -> C2, K2=5): rolled copies written straight into VMEM scratch,
    # then one wide-K (K = K2*C1 = 640) MXU contraction.
    for k in range(K2):
        u2_scr[pl.ds(k * C1, C1), :] = shl(h1, k)
    h2 = jnp.maximum(
        jnp.dot(w2m_ref[...], u2_scr[...], preferred_element_type=jnp.float32)
        + bd2_ref[...], 0.0)                                  # (C2, N)

    # conv3 (C2 -> C3, K3=3): same scheme, K = K3*C2 = 768.
    for k in range(K3):
        u3_scr[pl.ds(k * C2, C2), :] = shl(h2, k)
    h3 = jnp.maximum(
        jnp.dot(w3m_ref[...], u3_scr[...], preferred_element_type=jnp.float32)
        + bd3_ref[...], 0.0)                                  # (C3, N)

    # Masked mean pooling contracting on N; only the tiny (C3, B) result is
    # transposed (instead of the full (C3, N) activation).
    x3_ref[...] = jnp.transpose(
        jnp.dot(h3, pool3t_ref[...], preferred_element_type=jnp.float32))  # (B, C3)


def prepare_params(params, batch_size):
    """One-time parameter folding / re-layout (amortized across calls)."""
    K1 = params['cnn1_w'].shape[2]                       # 7
    L = params['fc_w1'].shape[1]                         # input_size
    L1 = L - (K1 - 1)
    K2 = params['cnn2_w2'].shape[2]                      # 5
    K3 = params['cnn2_w3'].shape[2]                      # 3
    L3 = L1 - (K2 - 1) - (K3 - 1)
    B = batch_size
    N = B * L

    # fc1.Linear1 and the mean-folded cnn1 share x -> fuse into one (L, 384) weight.
    w1t = params['fc_w1'].T                              # (L, 256)
    wc1 = params['cnn1_w'][:, 0, :]                      # (128, 7)
    j = jnp.arange(L)[:, None]
    k = jnp.arange(K1)[None, :]
    valid = ((j - k >= 0) & (j - k <= L1 - 1)).astype(jnp.float32)   # (L, 7)
    wc1e = (valid @ wc1.T) * (1.0 / L1)                  # (L, 128) mean-folded conv1d
    wfc = jnp.concatenate([w1t, wc1e], axis=1)           # (L, 384)
    bfc = jnp.concatenate([params['fc_b1'], params['cnn1_b']])[None, :]  # (1, 384)

    w2t = params['fc_w2'].T                              # (256, 128)
    b2 = params['fc_b2'][None, :]                        # (1, 128)

    wd1 = params['cnn2_w1'][:, 0, :]                     # (128, 7)
    wd1p = jnp.concatenate(
        [wd1, jnp.zeros((wd1.shape[0], 1), wd1.dtype)], axis=1)          # (128, 8)
    bd1 = params['cnn2_b1'][:, None]                     # (128, 1)

    w2 = params['cnn2_w2']                               # (256, 128, 5) OIW
    w2m = jnp.transpose(w2, (0, 2, 1)).reshape(w2.shape[0], -1)          # (256, 640)
    bd2 = params['cnn2_b2'][:, None]                     # (256, 1)
    w3 = params['cnn2_w3']                               # (128, 256, 3) OIW
    w3m = jnp.transpose(w3, (0, 2, 1)).reshape(w3.shape[0], -1)          # (128, 768)
    bd3 = params['cnn2_b3'][:, None]                     # (128, 1)

    # Masked mean-pool matrix over the L3 valid columns of each batch element,
    # pre-transposed as (N, B) so the kernel contracts on N without moving h3.
    n_idx = jnp.arange(N)[:, None]
    b_idx = jnp.arange(B)[None, :]
    t = n_idx - b_idx * L
    pool3t = jnp.where((t >= 0) & (t < L3),
                       jnp.float32(1.0 / L3), jnp.float32(0.0))          # (N, B)

    return dict(wfc=wfc, bfc=bfc, w2t=w2t, b2=b2, wd1p=wd1p, bd1=bd1,
                w2m=w2m, bd2=bd2, w3m=w3m, bd3=bd3, pool3t=pool3t)


def heterogeneous_feature_learner(x, prepped):
    """x: (B, input_size) f32; prepped from prepare_params. Returns (x1, x2, x3)."""
    B, L = x.shape
    N = B * L
    C = prepped['w2t'].shape[1]                          # 128
    K2C1 = prepped['w2m'].shape[1]                       # 640
    K3C2 = prepped['w3m'].shape[1]                       # 768

    x_flat = x.reshape(1, N)                             # conv-branch lane layout

    ins = (x, x_flat,
           prepped['wfc'], prepped['bfc'], prepped['w2t'], prepped['b2'],
           prepped['wd1p'], prepped['bd1'], prepped['w2m'], prepped['bd2'],
           prepped['w3m'], prepped['bd3'], prepped['pool3t'])

    grid_spec = pltpu.PrefetchScalarGridSpec(
        num_scalar_prefetch=0,
        grid=(1,),
        in_specs=[pl.BlockSpec(a.shape, lambda i, nd=a.ndim: (0,) * nd) for a in ins],
        out_specs=[pl.BlockSpec((B, C), lambda i: (0, 0)) for _ in range(3)],
        scratch_shapes=[pltpu.VMEM((8, N), jnp.float32),       # conv1 im2col
                        pltpu.VMEM((K2C1, N), jnp.float32),    # conv2 im2col
                        pltpu.VMEM((K3C2, N), jnp.float32)],   # conv3 im2col
    )
    out_shape = tuple(jax.ShapeDtypeStruct((B, C), jnp.float32) for _ in range(3))

    return pl.pallas_call(
        hfl_kernel,
        grid_spec=grid_spec,
        out_shape=out_shape,
        compiler_params=pltpu.CompilerParams(
            dimension_semantics=("arbitrary",)),
    )(*ins)


def init_params(key, input_size):
    ks = jax.random.split(key, 12)

    def w(k, shape, scale=0.05):
        return scale * jax.random.normal(k, shape, jnp.float32)

    return dict(
        fc_w1=w(ks[0], (256, input_size)),     # nn.Linear(input_size, 256).weight
        fc_b1=w(ks[1], (256,)),
        fc_w2=w(ks[2], (128, 256)),            # nn.Linear(256, 128).weight
        fc_b2=w(ks[3], (128,)),
        cnn1_w=w(ks[4], (128, 1, 7)),          # Conv1d(1, 128, 7).weight (OIW)
        cnn1_b=w(ks[5], (128,)),
        cnn2_w1=w(ks[6], (128, 1, 7)),         # Conv1d(1, 128, 7).weight
        cnn2_b1=w(ks[7], (128,)),
        cnn2_w2=w(ks[8], (256, 128, 5)),       # Conv1d(128, 256, 5).weight
        cnn2_b2=w(ks[9], (256,)),
        cnn2_w3=w(ks[10], (128, 256, 3)),      # Conv1d(256, 128, 3).weight
        cnn2_b3=w(ks[11], (128,)),
    )


def reference(x, p):
    """Pure-JAX reference mirroring the PyTorch forward (eval mode)."""
    hp = lax.Precision.HIGHEST
    h = jnp.dot(x, p['fc_w1'].T, precision=hp) + p['fc_b1']
    h = _leaky(h)
    h = jnp.dot(h, p['fc_w2'].T, precision=hp) + p['fc_b2']
    x1 = _leaky(h)

    xc = x[:, None, :]                                    # (B, 1, L) NCW
    dn = ('NCH', 'OIH', 'NCH')

    def conv(inp, wgt, b):
        y = lax.conv_general_dilated(inp, wgt, (1,), 'VALID',
                                     dimension_numbers=dn, precision=hp)
        return y + b[None, :, None]

    x2 = jnp.mean(conv(xc, p['cnn1_w'], p['cnn1_b']), axis=2)
    h = jax.nn.relu(conv(xc, p['cnn2_w1'], p['cnn2_b1']))
    h = jax.nn.relu(conv(h, p['cnn2_w2'], p['cnn2_b2']))
    h = jax.nn.relu(conv(h, p['cnn2_w3'], p['cnn2_b3']))
    x3 = jnp.mean(h, axis=2)
    return x1, x2, x3


if __name__ == "__main__":
    key = jax.random.PRNGKey(0)
    kp, kx = jax.random.split(key)
    B, INPUT_SIZE = 4, 64
    params = init_params(kp, INPUT_SIZE)
    x = jax.random.normal(kx, (B, INPUT_SIZE), jnp.float32)

    prepped = prepare_params(params, batch_size=B)        # amortized, one-time
    x1, x2, x3 = heterogeneous_feature_learner(x, prepped)
    jax.block_until_ready((x1, x2, x3))

    r1, r2, r3 = reference(x, params)
    np.testing.assert_allclose(np.asarray(x1), np.asarray(r1), rtol=1e-3, atol=1e-3)
    np.testing.assert_allclose(np.asarray(x2), np.asarray(r2), rtol=1e-3, atol=1e-3)
    np.testing.assert_allclose(np.asarray(x3), np.asarray(r3), rtol=1e-3, atol=1e-3)
    assert x1.shape == (B, 128) and x2.shape == (B, 128) and x3.shape == (B, 128)
    print("KERNEL_OK")
</pallas_src>

<mosaic_0001>
module attributes {stable_mosaic.version = 11 : i64} {
  func.func @hfl_kernel(%arg0: i32, %arg1: memref<4x64xf32, #tpu.memory_space<vmem>>, %arg2: memref<1x256xf32, #tpu.memory_space<vmem>>, %arg3: memref<64x384xf32, #tpu.memory_space<vmem>>, %arg4: memref<1x384xf32, #tpu.memory_space<vmem>>, %arg5: memref<256x128xf32, #tpu.memory_space<vmem>>, %arg6: memref<1x128xf32, #tpu.memory_space<vmem>>, %arg7: memref<128x8xf32, #tpu.memory_space<vmem>>, %arg8: memref<128x1xf32, #tpu.memory_space<vmem>>, %arg9: memref<256x640xf32, #tpu.memory_space<vmem>>, %arg10: memref<256x1xf32, #tpu.memory_space<vmem>>, %arg11: memref<128x768xf32, #tpu.memory_space<vmem>>, %arg12: memref<128x1xf32, #tpu.memory_space<vmem>>, %arg13: memref<256x4xf32, #tpu.memory_space<vmem>>, %arg14: memref<4x128xf32, #tpu.memory_space<vmem>>, %arg15: memref<4x128xf32, #tpu.memory_space<vmem>>, %arg16: memref<4x128xf32, #tpu.memory_space<vmem>>, %arg17: memref<8x256xf32, #tpu.memory_space<vmem>>, %arg18: memref<640x256xf32, #tpu.memory_space<vmem>>, %arg19: memref<768x256xf32, #tpu.memory_space<vmem>>) attributes {dimension_semantics = [#tpu.dimension_semantics<arbitrary>], iteration_bounds = array<i64: 1>, scalar_prefetch = 0 : i64, scratch_operands = 3 : i64, tpu.core_type = #tpu.core_type<tc>, window_params = [{pipeline_mode = #tpu.pipeline_mode<synchronous>, transform_indices = @transform_0, window_bounds = array<i64: 4, 64>}, {pipeline_mode = #tpu.pipeline_mode<synchronous>, transform_indices = @transform_1, window_bounds = array<i64: 1, 256>}, {pipeline_mode = #tpu.pipeline_mode<synchronous>, transform_indices = @transform_2, window_bounds = array<i64: 64, 384>}, {pipeline_mode = #tpu.pipeline_mode<synchronous>, transform_indices = @transform_3, window_bounds = array<i64: 1, 384>}, {pipeline_mode = #tpu.pipeline_mode<synchronous>, transform_indices = @transform_4, window_bounds = array<i64: 256, 128>}, {pipeline_mode = #tpu.pipeline_mode<synchronous>, transform_indices = @transform_5, window_bounds = array<i64: 1, 128>}, {pipeline_mode = #tpu.pipeline_mode<synchronous>, transform_indices = @transform_6, window_bounds = array<i64: 128, 8>}, {pipeline_mode = #tpu.pipeline_mode<synchronous>, transform_indices = @transform_7, window_bounds = array<i64: 128, 1>}, {pipeline_mode = #tpu.pipeline_mode<synchronous>, transform_indices = @transform_8, window_bounds = array<i64: 256, 640>}, {pipeline_mode = #tpu.pipeline_mode<synchronous>, transform_indices = @transform_9, window_bounds = array<i64: 256, 1>}, {pipeline_mode = #tpu.pipeline_mode<synchronous>, transform_indices = @transform_10, window_bounds = array<i64: 128, 768>}, {pipeline_mode = #tpu.pipeline_mode<synchronous>, transform_indices = @transform_11, window_bounds = array<i64: 128, 1>}, {pipeline_mode = #tpu.pipeline_mode<synchronous>, transform_indices = @transform_12, window_bounds = array<i64: 256, 4>}, {pipeline_mode = #tpu.pipeline_mode<synchronous>, transform_indices = @transform_13, window_bounds = array<i64: 4, 128>}, {pipeline_mode = #tpu.pipeline_mode<synchronous>, transform_indices = @transform_14, window_bounds = array<i64: 4, 128>}, {pipeline_mode = #tpu.pipeline_mode<synchronous>, transform_indices = @transform_15, window_bounds = array<i64: 4, 128>}]} {
    %c0 = arith.constant 0 : index
    %c0_0 = arith.constant 0 : index
    %0 = vector.load %arg1[%c0, %c0_0] : memref<4x64xf32, #tpu.memory_space<vmem>>, vector<4x64xf32>
    %c0_1 = arith.constant 0 : index
    %c0_2 = arith.constant 0 : index
    %1 = vector.load %arg3[%c0_1, %c0_2] : memref<64x384xf32, #tpu.memory_space<vmem>>, vector<64x384xf32>
    %cst = arith.constant dense<0.000000e+00> : vector<4x384xf32>
    %2 = tpu.matmul %0, %1, %cst {dimension_numbers = #tpu.dot_dimension_numbers<[1], [0], [0], [1], [0, 0, 1, 1], [], []>} : vector<4x64xf32>, vector<64x384xf32>, vector<4x384xf32> -> vector<4x384xf32>
    %c0_3 = arith.constant 0 : index
    %c0_4 = arith.constant 0 : index
    %3 = vector.load %arg4[%c0_3, %c0_4] : memref<1x384xf32, #tpu.memory_space<vmem>>, vector<1x384xf32>
    %4 = vector.broadcast %3 : vector<1x384xf32> to vector<4x384xf32>
    %5 = arith.addf %2, %4 : vector<4x384xf32>
    %6 = vector.extract_strided_slice %5 {offsets = [0, 256], sizes = [4, 128], strides = [1, 1]} : vector<4x384xf32> to vector<4x128xf32>
    %c0_5 = arith.constant 0 : index
    %c0_6 = arith.constant 0 : index
    %7 = vector.load %arg15[%c0_5, %c0_6] : memref<4x128xf32, #tpu.memory_space<vmem>>, vector<4x128xf32>
    tpu.vector_store %arg15[%c0_5, %c0_6], %6 {strides = array<i32>} : memref<4x128xf32, #tpu.memory_space<vmem>>, vector<4x128xf32>,
    %8 = vector.extract_strided_slice %5 {offsets = [0, 0], sizes = [4, 256], strides = [1, 1]} : vector<4x384xf32> to vector<4x256xf32>
    %cst_7 = arith.constant 0.000000e+00 : f32
    %9 = vector.broadcast %cst_7 : f32 to vector<4x256xf32>
    %10 = arith.cmpf ogt, %8, %9 : vector<4x256xf32>
    %cst_8 = arith.constant 0.00999999977 : f32
    %11 = vector.broadcast %cst_8 : f32 to vector<4x256xf32>
    %12 = arith.mulf %11, %8 : vector<4x256xf32>
    %13 = arith.select %10, %8, %12 : vector<4x256xi1>, vector<4x256xf32>
    %c0_9 = arith.constant 0 : index
    %c0_10 = arith.constant 0 : index
    %14 = vector.load %arg5[%c0_9, %c0_10] : memref<256x128xf32, #tpu.memory_space<vmem>>, vector<256x128xf32>
    %cst_11 = arith.constant dense<0.000000e+00> : vector<4x128xf32>
    %15 = tpu.matmul %13, %14, %cst_11 {dimension_numbers = #tpu.dot_dimension_numbers<[1], [0], [0], [1], [0, 0, 1, 1], [], []>} : vector<4x256xf32>, vector<256x128xf32>, vector<4x128xf32> -> vector<4x128xf32>
    %c0_12 = arith.constant 0 : index
    %c0_13 = arith.constant 0 : index
    %16 = vector.load %arg6[%c0_12, %c0_13] : memref<1x128xf32, #tpu.memory_space<vmem>>, vector<1x128xf32>
    %17 = vector.broadcast %16 : vector<1x128xf32> to vector<4x128xf32>
    %18 = arith.addf %15, %17 : vector<4x128xf32>
    %cst_14 = arith.constant 0.000000e+00 : f32
    %19 = vector.broadcast %cst_14 : f32 to vector<4x128xf32>
    %20 = arith.cmpf ogt, %18, %19 : vector<4x128xf32>
    %cst_15 = arith.constant 0.00999999977 : f32
    %21 = vector.broadcast %cst_15 : f32 to vector<4x128xf32>
    %22 = arith.mulf %21, %18 : vector<4x128xf32>
    %23 = arith.select %20, %18, %22 : vector<4x128xi1>, vector<4x128xf32>
    %c0_16 = arith.constant 0 : index
    %c0_17 = arith.constant 0 : index
    %24 = vector.load %arg14[%c0_16, %c0_17] : memref<4x128xf32, #tpu.memory_space<vmem>>, vector<4x128xf32>
    tpu.vector_store %arg14[%c0_16, %c0_17], %23 {strides = array<i32>} : memref<4x128xf32, #tpu.memory_space<vmem>>, vector<4x128xf32>,
    %c0_18 = arith.constant 0 : index
    %c0_19 = arith.constant 0 : index
    %25 = vector.load %arg2[%c0_18, %c0_19] : memref<1x256xf32, #tpu.memory_space<vmem>>, vector<1x256xf32>
    %c0_20 = arith.constant 0 : index
    %c0_21 = arith.constant 0 : index
    %26 = vector.load %arg17[%c0_20, %c0_21] : memref<8x256xf32, #tpu.memory_space<vmem>>, vector<1x256xf32>
    tpu.vector_store %arg17[%c0_20, %c0_21], %25 {strides = array<i32>} : memref<8x256xf32, #tpu.memory_space<vmem>>, vector<1x256xf32>,
    %c255_i32 = arith.constant 255 : i32
    %27 = tpu.dynamic_rotate %25 by %c255_i32 dim 1 : vector<1x256xf32>, i32 -> vector<1x256xf32>
    %c1 = arith.constant 1 : index
    %c0_22 = arith.constant 0 : index
    %28 = vector.load %arg17[%c1, %c0_22] : memref<8x256xf32, #tpu.memory_space<vmem>>, vector<1x256xf32>
    tpu.vector_store %arg17[%c1, %c0_22], %27 {strides = array<i32>} : memref<8x256xf32, #tpu.memory_space<vmem>>, vector<1x256xf32>,
    %c254_i32 = arith.constant 254 : i32
    %29 = tpu.dynamic_rotate %25 by %c254_i32 dim 1 : vector<1x256xf32>, i32 -> vector<1x256xf32>
    %c2 = arith.constant 2 : index
    %c0_23 = arith.constant 0 : index
    %30 = vector.load %arg17[%c2, %c0_23] : memref<8x256xf32, #tpu.memory_space<vmem>>, vector<1x256xf32>
    tpu.vector_store %arg17[%c2, %c0_23], %29 {strides = array<i32>} : memref<8x256xf32, #tpu.memory_space<vmem>>, vector<1x256xf32>,
    %c253_i32 = arith.constant 253 : i32
    %31 = tpu.dynamic_rotate %25 by %c253_i32 dim 1 : vector<1x256xf32>, i32 -> vector<1x256xf32>
    %c3 = arith.constant 3 : index
    %c0_24 = arith.constant 0 : index
    %32 = vector.load %arg17[%c3, %c0_24] : memref<8x256xf32, #tpu.memory_space<vmem>>, vector<1x256xf32>
    tpu.vector_store %arg17[%c3, %c0_24], %31 {strides = array<i32>} : memref<8x256xf32, #tpu.memory_space<vmem>>, vector<1x256xf32>,
    %c252_i32 = arith.constant 252 : i32
    %33 = tpu.dynamic_rotate %25 by %c252_i32 dim 1 : vector<1x256xf32>, i32 -> vector<1x256xf32>
    %c4 = arith.constant 4 : index
    %c0_25 = arith.constant 0 : index
    %34 = vector.load %arg17[%c4, %c0_25] : memref<8x256xf32, #tpu.memory_space<vmem>>, vector<1x256xf32>
    tpu.vector_store %arg17[%c4, %c0_25], %33 {strides = array<i32>} : memref<8x256xf32, #tpu.memory_space<vmem>>, vector<1x256xf32>,
    %c251_i32 = arith.constant 251 : i32
    %35 = tpu.dynamic_rotate %25 by %c251_i32 dim 1 : vector<1x256xf32>, i32 -> vector<1x256xf32>
    %c5 = arith.constant 5 : index
    %c0_26 = arith.constant 0 : index
    %36 = vector.load %arg17[%c5, %c0_26] : memref<8x256xf32, #tpu.memory_space<vmem>>, vector<1x256xf32>
    tpu.vector_store %arg17[%c5, %c0_26], %35 {strides = array<i32>} : memref<8x256xf32, #tpu.memory_space<vmem>>, vector<1x256xf32>,
    %c250_i32 = arith.constant 250 : i32
    %37 = tpu.dynamic_rotate %25 by %c250_i32 dim 1 : vector<1x256xf32>, i32 -> vector<1x256xf32>
    %c6 = arith.constant 6 : index
    %c0_27 = arith.constant 0 : index
    %38 = vector.load %arg17[%c6, %c0_27] : memref<8x256xf32, #tpu.memory_space<vmem>>, vector<1x256xf32>
    tpu.vector_store %arg17[%c6, %c0_27], %37 {strides = array<i32>} : memref<8x256xf32, #tpu.memory_space<vmem>>, vector<1x256xf32>,
    %c7 = arith.constant 7 : index
    %c0_28 = arith.constant 0 : index
    %39 = vector.load %arg17[%c7, %c0_28] : memref<8x256xf32, #tpu.memory_space<vmem>>, vector<1x256xf32>
    tpu.vector_store %arg17[%c7, %c0_28], %25 {strides = array<i32>} : memref<8x256xf32, #tpu.memory_space<vmem>>, vector<1x256xf32>,
    %c0_29 = arith.constant 0 : index
    %c0_30 = arith.constant 0 : index
    %40 = vector.load %arg7[%c0_29, %c0_30] : memref<128x8xf32, #tpu.memory_space<vmem>>, vector<128x8xf32>
    %c0_31 = arith.constant 0 : index
    %c0_32 = arith.constant 0 : index
    %41 = vector.load %arg17[%c0_31, %c0_32] : memref<8x256xf32, #tpu.memory_space<vmem>>, vector<8x256xf32>
    %cst_33 = arith.constant dense<0.000000e+00> : vector<128x256xf32>
    %42 = tpu.matmul %40, %41, %cst_33 {dimension_numbers = #tpu.dot_dimension_numbers<[1], [0], [0], [1], [0, 0, 1, 1], [], []>} : vector<128x8xf32>, vector<8x256xf32>, vector<128x256xf32> -> vector<128x256xf32>
    %c0_34 = arith.constant 0 : index
    %c0_35 = arith.constant 0 : index
    %43 = vector.load %arg8[%c0_34, %c0_35] : memref<128x1xf32, #tpu.memory_space<vmem>>, vector<128x1xf32>
    %44 = vector.broadcast %43 : vector<128x1xf32> to vector<128x256xf32>
    %45 = arith.addf %42, %44 : vector<128x256xf32>
    %cst_36 = arith.constant 0.000000e+00 : f32
    %46 = vector.broadcast %cst_36 : f32 to vector<128x256xf32>
    %47 = arith.maximumf %45, %46 : vector<128x256xf32>
    %c0_37 = arith.constant 0 : index
    %c0_38 = arith.constant 0 : index
    %48 = vector.load %arg18[%c0_37, %c0_38] : memref<640x256xf32, #tpu.memory_space<vmem>>, vector<128x256xf32>
    tpu.vector_store %arg18[%c0_37, %c0_38], %47 {strides = array<i32>} : memref<640x256xf32, #tpu.memory_space<vmem>>, vector<128x256xf32>,
    %c255_i32_39 = arith.constant 255 : i32
    %49 = tpu.dynamic_rotate %47 by %c255_i32_39 dim 1 : vector<128x256xf32>, i32 -> vector<128x256xf32>
    %c128 = arith.constant 128 : index
    %c0_40 = arith.constant 0 : index
    %50 = vector.load %arg18[%c128, %c0_40] : memref<640x256xf32, #tpu.memory_space<vmem>>, vector<128x256xf32>
    tpu.vector_store %arg18[%c128, %c0_40], %49 {strides = array<i32>} : memref<640x256xf32, #tpu.memory_space<vmem>>, vector<128x256xf32>,
    %c254_i32_41 = arith.constant 254 : i32
    %51 = tpu.dynamic_rotate %47 by %c254_i32_41 dim 1 : vector<128x256xf32>, i32 -> vector<128x256xf32>
    %c256 = arith.constant 256 : index
    %c0_42 = arith.constant 0 : index
    %52 = vector.load %arg18[%c256, %c0_42] : memref<640x256xf32, #tpu.memory_space<vmem>>, vector<128x256xf32>
    tpu.vector_store %arg18[%c256, %c0_42], %51 {strides = array<i32>} : memref<640x256xf32, #tpu.memory_space<vmem>>, vector<128x256xf32>,
    %c253_i32_43 = arith.constant 253 : i32
    %53 = tpu.dynamic_rotate %47 by %c253_i32_43 dim 1 : vector<128x256xf32>, i32 -> vector<128x256xf32>
    %c384 = arith.constant 384 : index
    %c0_44 = arith.constant 0 : index
    %54 = vector.load %arg18[%c384, %c0_44] : memref<640x256xf32, #tpu.memory_space<vmem>>, vector<128x256xf32>
    tpu.vector_store %arg18[%c384, %c0_44], %53 {strides = array<i32>} : memref<640x256xf32, #tpu.memory_space<vmem>>, vector<128x256xf32>,
    %c252_i32_45 = arith.constant 252 : i32
    %55 = tpu.dynamic_rotate %47 by %c252_i32_45 dim 1 : vector<128x256xf32>, i32 -> vector<128x256xf32>
    %c512 = arith.constant 512 : index
    %c0_46 = arith.constant 0 : index
    %56 = vector.load %arg18[%c512, %c0_46] : memref<640x256xf32, #tpu.memory_space<vmem>>, vector<128x256xf32>
    tpu.vector_store %arg18[%c512, %c0_46], %55 {strides = array<i32>} : memref<640x256xf32, #tpu.memory_space<vmem>>, vector<128x256xf32>,
    %c0_47 = arith.constant 0 : index
    %c0_48 = arith.constant 0 : index
    %57 = vector.load %arg9[%c0_47, %c0_48] : memref<256x640xf32, #tpu.memory_space<vmem>>, vector<256x640xf32>
    %c0_49 = arith.constant 0 : index
    %c0_50 = arith.constant 0 : index
    %58 = vector.load %arg18[%c0_49, %c0_50] : memref<640x256xf32, #tpu.memory_space<vmem>>, vector<640x256xf32>
    %cst_51 = arith.constant dense<0.000000e+00> : vector<256x256xf32>
    %59 = tpu.matmul %57, %58, %cst_51 {dimension_numbers = #tpu.dot_dimension_numbers<[1], [0], [0], [1], [0, 0, 1, 1], [], []>} : vector<256x640xf32>, vector<640x256xf32>, vector<256x256xf32> -> vector<256x256xf32>
    %c0_52 = arith.constant 0 : index
    %c0_53 = arith.constant 0 : index
    %60 = vector.load %arg10[%c0_52, %c0_53] : memref<256x1xf32, #tpu.memory_space<vmem>>, vector<256x1xf32>
    %61 = vector.broadcast %60 : vector<256x1xf32> to vector<256x256xf32>
    %62 = arith.addf %59, %61 : vector<256x256xf32>
    %cst_54 = arith.constant 0.000000e+00 : f32
    %63 = vector.broadcast %cst_54 : f32 to vector<256x256xf32>
    %64 = arith.maximumf %62, %63 : vector<256x256xf32>
    %c0_55 = arith.constant 0 : index
    %c0_56 = arith.constant 0 : index
    %65 = vector.load %arg19[%c0_55, %c0_56] : memref<768x256xf32, #tpu.memory_space<vmem>>, vector<256x256xf32>
    tpu.vector_store %arg19[%c0_55, %c0_56], %64 {strides = array<i32>} : memref<768x256xf32, #tpu.memory_space<vmem>>, vector<256x256xf32>,
    %c255_i32_57 = arith.constant 255 : i32
    %66 = tpu.dynamic_rotate %64 by %c255_i32_57 dim 1 : vector<256x256xf32>, i32 -> vector<256x256xf32>
    %c256_58 = arith.constant 256 : index
    %c0_59 = arith.constant 0 : index
    %67 = vector.load %arg19[%c256_58, %c0_59] : memref<768x256xf32, #tpu.memory_space<vmem>>, vector<256x256xf32>
    tpu.vector_store %arg19[%c256_58, %c0_59], %66 {strides = array<i32>} : memref<768x256xf32, #tpu.memory_space<vmem>>, vector<256x256xf32>,
    %c254_i32_60 = arith.constant 254 : i32
    %68 = tpu.dynamic_rotate %64 by %c254_i32_60 dim 1 : vector<256x256xf32>, i32 -> vector<256x256xf32>
    %c512_61 = arith.constant 512 : index
    %c0_62 = arith.constant 0 : index
    %69 = vector.load %arg19[%c512_61, %c0_62] : memref<768x256xf32, #tpu.memory_space<vmem>>, vector<256x256xf32>
    tpu.vector_store %arg19[%c512_61, %c0_62], %68 {strides = array<i32>} : memref<768x256xf32, #tpu.memory_space<vmem>>, vector<256x256xf32>,
    %c0_63 = arith.constant 0 : index
    %c0_64 = arith.constant 0 : index
    %70 = vector.load %arg11[%c0_63, %c0_64] : memref<128x768xf32, #tpu.memory_space<vmem>>, vector<128x768xf32>
    %c0_65 = arith.constant 0 : index
    %c0_66 = arith.constant 0 : index
    %71 = vector.load %arg19[%c0_65, %c0_66] : memref<768x256xf32, #tpu.memory_space<vmem>>, vector<768x256xf32>
    %cst_67 = arith.constant dense<0.000000e+00> : vector<128x256xf32>
    %72 = tpu.matmul %70, %71, %cst_67 {dimension_numbers = #tpu.dot_dimension_numbers<[1], [0], [0], [1], [0, 0, 1, 1], [], []>} : vector<128x768xf32>, vector<768x256xf32>, vector<128x256xf32> -> vector<128x256xf32>
    %c0_68 = arith.constant 0 : index
    %c0_69 = arith.constant 0 : index
    %73 = vector.load %arg12[%c0_68, %c0_69] : memref<128x1xf32, #tpu.memory_space<vmem>>, vector<128x1xf32>
    %74 = vector.broadcast %73 : vector<128x1xf32> to vector<128x256xf32>
    %75 = arith.addf %72, %74 : vector<128x256xf32>
    %cst_70 = arith.constant 0.000000e+00 : f32
    %76 = vector.broadcast %cst_70 : f32 to vector<128x256xf32>
    %77 = arith.maximumf %75, %76 : vector<128x256xf32>
    %c0_71 = arith.constant 0 : index
    %c0_72 = arith.constant 0 : index
    %78 = vector.load %arg13[%c0_71, %c0_72] : memref<256x4xf32, #tpu.memory_space<vmem>>, vector<256x4xf32>
    %cst_73 = arith.constant dense<0.000000e+00> : vector<128x4xf32>
    %79 = tpu.matmul %77, %78, %cst_73 {dimension_numbers = #tpu.dot_dimension_numbers<[1], [0], [0], [1], [0, 0, 1, 1], [], []>} : vector<128x256xf32>, vector<256x4xf32>, vector<128x4xf32> -> vector<128x4xf32>
    %80 = tpu.transpose %79, [1, 0] : vector<128x4xf32> -> vector<4x128xf32>
    %c0_74 = arith.constant 0 : index
    %c0_75 = arith.constant 0 : index
    %81 = vector.load %arg16[%c0_74, %c0_75] : memref<4x128xf32, #tpu.memory_space<vmem>>, vector<4x128xf32>
    tpu.vector_store %arg16[%c0_74, %c0_75], %80 {strides = array<i32>} : memref<4x128xf32, #tpu.memory_space<vmem>>, vector<4x128xf32>,
    return
  }
  func.func @transform_0(%arg0: i32) -> (i32, i32) {
    %c0_i32 = arith.constant 0 : i32
    %c0_i32_0 = arith.constant 0 : i32
    %c0_i32_1 = arith.constant 0 : i32
    return %c0_i32, %c0_i32_0 : i32, i32
  }
  func.func @transform_1(%arg0: i32) -> (i32, i32) {
    %c0_i32 = arith.constant 0 : i32
    %c0_i32_0 = arith.constant 0 : i32
    %c0_i32_1 = arith.constant 0 : i32
    return %c0_i32, %c0_i32_0 : i32, i32
  }
  func.func @transform_2(%arg0: i32) -> (i32, i32) {
    %c0_i32 = arith.constant 0 : i32
    %c0_i32_0 = arith.constant 0 : i32
    %c0_i32_1 = arith.constant 0 : i32
    return %c0_i32, %c0_i32_0 : i32, i32
  }
  func.func @transform_3(%arg0: i32) -> (i32, i32) {
    %c0_i32 = arith.constant 0 : i32
    %c0_i32_0 = arith.constant 0 : i32
    %c0_i32_1 = arith.constant 0 : i32
    return %c0_i32, %c0_i32_0 : i32, i32
  }
  func.func @transform_4(%arg0: i32) -> (i32, i32) {
    %c0_i32 = arith.constant 0 : i32
    %c0_i32_0 = arith.constant 0 : i32
    %c0_i32_1 = arith.constant 0 : i32
    return %c0_i32, %c0_i32_0 : i32, i32
  }
  func.func @transform_5(%arg0: i32) -> (i32, i32) {
    %c0_i32 = arith.constant 0 : i32
    %c0_i32_0 = arith.constant 0 : i32
    %c0_i32_1 = arith.constant 0 : i32
    return %c0_i32, %c0_i32_0 : i32, i32
  }
  func.func @transform_6(%arg0: i32) -> (i32, i32) {
    %c0_i32 = arith.constant 0 : i32
    %c0_i32_0 = arith.constant 0 : i32
    %c0_i32_1 = arith.constant 0 : i32
    return %c0_i32, %c0_i32_0 : i32, i32
  }
  func.func @transform_7(%arg0: i32) -> (i32, i32) {
    %c0_i32 = arith.constant 0 : i32
    %c0_i32_0 = arith.constant 0 : i32
    %c0_i32_1 = arith.constant 0 : i32
    return %c0_i32, %c0_i32_0 : i32, i32
  }
  func.func @transform_8(%arg0: i32) -> (i32, i32) {
    %c0_i32 = arith.constant 0 : i32
    %c0_i32_0 = arith.constant 0 : i32
    %c0_i32_1 = arith.constant 0 : i32
    return %c0_i32, %c0_i32_0 : i32, i32
  }
  func.func @transform_9(%arg0: i32) -> (i32, i32) {
    %c0_i32 = arith.constant 0 : i32
    %c0_i32_0 = arith.constant 0 : i32
    %c0_i32_1 = arith.constant 0 : i32
    return %c0_i32, %c0_i32_0 : i32, i32
  }
  func.func @transform_10(%arg0: i32) -> (i32, i32) {
    %c0_i32 = arith.constant 0 : i32
    %c0_i32_0 = arith.constant 0 : i32
    %c0_i32_1 = arith.constant 0 : i32
    return %c0_i32, %c0_i32_0 : i32, i32
  }
  func.func @transform_11(%arg0: i32) -> (i32, i32) {
    %c0_i32 = arith.constant 0 : i32
    %c0_i32_0 = arith.constant 0 : i32
    %c0_i32_1 = arith.constant 0 : i32
    return %c0_i32, %c0_i32_0 : i32, i32
  }
  func.func @transform_12(%arg0: i32) -> (i32, i32) {
    %c0_i32 = arith.constant 0 : i32
    %c0_i32_0 = arith.constant 0 : i32
    %c0_i32_1 = arith.constant 0 : i32
    return %c0_i32, %c0_i32_0 : i32, i32
  }
  func.func @transform_13(%arg0: i32) -> (i32, i32) {
    %c0_i32 = arith.constant 0 : i32
    %c0_i32_0 = arith.constant 0 : i32
    %c0_i32_1 = arith.constant 0 : i32
    return %c0_i32, %c0_i32_0 : i32, i32
  }
  func.func @transform_14(%arg0: i32) -> (i32, i32) {
    %c0_i32 = arith.constant 0 : i32
    %c0_i32_0 = arith.constant 0 : i32
    %c0_i32_1 = arith.constant 0 : i32
    return %c0_i32, %c0_i32_0 : i32, i32
  }
  func.func @transform_15(%arg0: i32) -> (i32, i32) {
    %c0_i32 = arith.constant 0 : i32
    %c0_i32_0 = arith.constant 0 : i32
    %c0_i32_1 = arith.constant 0 : i32
    return %c0_i32, %c0_i32_0 : i32, i32
  }
}

</mosaic_0001>

<bundles_post_ra>
// kernel: tpu_custom_call.1
= control target key start
LH: loop header
LB: loop body
LE: loop exit
PB: predicated region body
PF: predicated region fallthrough
CT: control target
= control target key end

     0   :  { %21 = vsyncpa [#allocation6], 0  ;;  %s8231_s0 = inlined_call_operand.vmem [shape: f32[4,64], index: 0, kind: input, shape index: {}]   ;;  %s8232_s1 = inlined_call_operand.vmem [shape: f32[1,256], index: 1, kind: input, shape index: {}]   ;;  %s8233_s2 = inlined_call_operand.hbm [shape: f32[64,384], index: 2, kind: input, shape index: {}]   ;;  %s8234_s3 = inlined_call_operand.vmem [shape: f32[1,384], index: 3, kind: input, shape index: {}]   ;;  %s8235_s4 = inlined_call_operand.hbm [shape: f32[256,128], index: 4, kind: input, shape index: {}]   ;;  %s8236_s5 = inlined_call_operand.vmem [shape: f32[1,128], index: 5, kind: input, shape index: {}]   ;;  %s8237_s6 = inlined_call_operand.vmem [shape: f32[128,8], index: 6, kind: input, shape index: {}]   ;;  %s8238_s7 = inlined_call_operand.vmem [shape: f32[128,1], index: 7, kind: input, shape index: {}]   ;;  %s8239_s8 = inlined_call_operand.hbm [shape: f32[256,640], index: 8, kind: input, shape index: {}]   ;;  %s8240_s9 = inlined_call_operand.vmem [shape: f32[256,1], index: 9, kind: input, shape index: {}]   ;;  %s8241_s10 = inlined_call_operand.vmem [shape: f32[128,768], index: 10, kind: input, shape index: {}]   ;;  %s8242_s11 = inlined_call_operand.vmem [shape: f32[128,1], index: 11, kind: input, shape index: {}]   ;;  %s8243_s12 = inlined_call_operand.vmem [shape: f32[256,4], index: 12, kind: input, shape index: {}]   ;;  %s8244_s13 = inlined_call_operand.hbm [shape: f32[4,128], index: 13, kind: output, shape index: {0}]   ;;  %s8245_s14 = inlined_call_operand.hbm [shape: f32[4,128], index: 14, kind: output, shape index: {1}]   ;;  %s8246_s15 = inlined_call_operand.hbm [shape: f32[4,128], index: 15, kind: output, shape index: {2}]  }
   0x1   :  { %22 = vsyncpa [#allocation9], 0 }
   0x2   :  { %23 = vsyncpa [#allocation7], 0 }
   0x3   :  { %24 = vsyncpa [#allocation13], 0  ;;  %s6278_s18 = smov [#allocation8]   ;;  %s6138_s22 = scalar_lea.hbm %s8235_s4, 4096 }
   0x4   :  { %s48_s19 = sshll.u32 %s6278_s18, 4  ;;  %p6139_p0 = scmp.ne.s32.totalorder %s8235_s4, %s6138_s22  ;;  %s49_s19 = int_to_ptr.vmem [resolvable:$true] %s48_s19 }
   0x5   :  { %p6142_p1 = scmp.lt.u32.totalorder %s6138_s22, %s8235_s4 }
   0x7   :  { %p6144_p2 = pnand %p6142_p1, %p6139_p0 }
   0x9   :  { %6147 = shalt.err (!%p6144_p2)
}
   0xa   :  { %s6148_s27 = scalar_lea.vmem %s49_s19, 4096  ;;  %p6153_p4 = scmp.lt.s32.totalorder %s49_s19, %s49_s19 }
   0xb   :  { %p6149_p3 = scmp.ne.s32.totalorder %s49_s19, %s6148_s27  ;;  %p6154_p5 = scmp.lt.s32.totalorder %s6148_s27, %s6148_s27 }
   0xd   :  { %p6155_p6 = por %p6154_p5, %p6153_p4 }
   0xf   :  { %p6156_p7 = pnand %p6155_p6, %p6149_p3 }
  0x11   :  { %6159 = shalt.err (!%p6156_p7)
}
  0x12   :  { %s6279_s28 = smov 128   ;;  %s6280_s29 = smov 8  }
  0x13   :  { %54 = dma.hbm_to_vmem [thread:$0]  %s8235_s4, 4096, %s49_s19, [#allocation9], %s6279_s28, %s6279_s28, %s6280_s29  }
  0x14   :  { %s6281_s17 = smov [#allocation5]   ;;  %s6160_s22 = scalar_lea.hbm %s8233_s2, 3072 }
  0x15   :  { %s34_s18 = sshll.u32 %s6281_s17, 4  ;;  %p6161_p8 = scmp.ne.s32.totalorder %s8233_s2, %s6160_s22  ;;  %s35_s18 = int_to_ptr.vmem [resolvable:$true] %s34_s18 }
  0x16   :  { %p6164_p9 = scmp.lt.u32.totalorder %s6160_s22, %s8233_s2 }
  0x18   :  { %p6166_p10 = pnand %p6164_p9, %p6161_p8 }
  0x1a   :  { %6169 = shalt.err (!%p6166_p10)
}
  0x1b   :  { %s6170_s27 = scalar_lea.vmem %s35_s18, 3072  ;;  %p6175_p12 = scmp.lt.s32.totalorder %s35_s18, %s35_s18 }
  0x1c   :  { %p6171_p11 = scmp.ne.s32.totalorder %s35_s18, %s6170_s27  ;;  %p6176_p13 = scmp.lt.s32.totalorder %s6170_s27, %s6170_s27 }
  0x1e   :  { %p6177_p0 = por %p6176_p13, %p6175_p12 }
  0x20   :  { %p6178_p1 = pnand %p6177_p0, %p6171_p11 }
  0x22   :  { %6181 = shalt.err (!%p6178_p1)
}
  0x23   :  { %s6282_s4 = smov 384   ;;  %s6283_s19 = smov 24  }
  0x24   :  { %40 = dma.hbm_to_vmem [thread:$0]  %s8233_s2, 3072, %s35_s18, [#allocation6], %s6282_s4, %s6282_s4, %s6283_s19  }
  0x25   :  { %s6284_s30 = smov [#allocation10]   ;;  %s6182_s21 = scalar_lea.hbm %s8239_s8, 20480 }
  0x26   :  { %s66_s16 = sshll.u32 %s6284_s30, 4  ;;  %p6183_p2 = scmp.ne.s32.totalorder %s8239_s8, %s6182_s21  ;;  %s67_s16 = int_to_ptr.vmem [resolvable:$true] %s66_s16 }
  0x27   :  { %p6186_p3 = scmp.lt.u32.totalorder %s6182_s21, %s8239_s8 }
  0x29   :  { %p6188_p4 = pnand %p6186_p3, %p6183_p2 }
  0x2b   :  { %6191 = shalt.err (!%p6188_p4)
}
  0x2c   :  { %s6192_s26 = scalar_lea.vmem %s67_s16, 20480  ;;  %p6197_p6 = scmp.lt.s32.totalorder %s67_s16, %s67_s16 }
  0x2d   :  { %p6193_p5 = scmp.ne.s32.totalorder %s67_s16, %s6192_s26  ;;  %p6198_p7 = scmp.lt.s32.totalorder %s6192_s26, %s6192_s26 }
  0x2f   :  { %p6199_p8 = por %p6198_p7, %p6197_p6 }
  0x31   :  { %p6200_p9 = pnand %p6199_p8, %p6193_p5 }
  0x33   :  { %6203 = shalt.err (!%p6200_p9)
}
  0x34   :  { %s6285_s2 = smov 640   ;;  %s6286_s18 = smov 40  }
  0x35   :  { %72 = dma.hbm_to_vmem [thread:$0]  %s8239_s8, 20480, %s67_s16, [#allocation9], %s6285_s2, %s6285_s2, %s6286_s18  }
  0x36   :  { %6270 = dma.done.wait [#allocation6], 3072  }
  0x37   :  { %6271 = vsyncadd [#allocation6], 4294964224 }
  0x38   :  { %6272 = dma.done.wait [#allocation9], 24576  }
  0x39   :  { %6273 = vsyncadd [#allocation9], 4294942720  ;;  %v117_v0 = vlaneseq  ;;  %v397_v4 = vld [vmem:[%s8232_s1] sm:$0x3]  ;;  %s6287_s8 = smov 126   ;;  %s6288_s29 = smov 127  }
  0x3a   :  { %v93_v8 = vld [vmem:[#allocation5 + $0x10] sm:$0xff]  ;;  %v96_v9 = vld [vmem:[#allocation5 + $0x28] sm:$0xff]  ;;  %v6289_v11 = vmov 0.0|0.0   ;;  %v99_v12 = vld [vmem:[#allocation5 + $0x40] sm:$0xff]  ;;  %s6290_s1 = smov 125   ;;  %s6291_s30 = smov 124  }
  0x3b   :  { %v6418_v1 = vshrl.u32 %v117_v0, 7  ;;  %vm6426_vm0 = vcmp.lt.s32.totalorder %v117_v0, 256  ;;  %v4742_v10 = vpack.c.bf16 %v96_v9, %v93_v8  ;;  %4741 = vmatprep.subr.bf16.mxu1 %v6289_v11  ;;  %v102_v13 = vld [vmem:[#allocation5 + $0x58] sm:$0xff]  ;;  %v105_v15 = vld [vmem:[#allocation5 + $0x70] sm:$0xff]  ;;  %v108_v16 = vld [vmem:[#allocation5 + $0x88] sm:$0xff]  ;;  %vm6292_vm1 = vmmov 0  }
  0x3c   :  { %586 = vst.msk [vmem:[#allocation2 + $0x7] ss:$8 sm:$0x3] %vm6426_vm0, %v397_v4  ;;  %402 = vst.msk [vmem:[#allocation2] ss:$8 sm:$0x3] %vm6426_vm0, %v397_v4  ;;  %v4745_v14 = vpack.c.bf16 %v102_v13, %v99_v12  ;;  %v4748_v17 = vpack.c.bf16 %v108_v16, %v105_v15 }
  0x3d   :  { %v119_v2 = vsub.s32 0, %v6418_v1  ;;  %v123_v3 = vsub.s32 1, %v6418_v1  ;;  %4743 = vmatpush3.bf16.msra.mxu1 %v4742_v10  ;;  %v111_v18 = vld [vmem:[#allocation5 + $0xa0] sm:$0xff]  ;;  %v114_v19 = vld [vmem:[#allocation5 + $0xb8] sm:$0xff]  ;;  %v6293_v21 = vmov 0.0   ;;  %s6294_s16 = smov 123  }
  0x3e   :  { %4744 = vmatprep.subr.bf16.mxu1 %v6289_v11  ;;  %v4751_v20 = vpack.c.bf16 %v114_v19, %v111_v18  ;;  %4722 = vmatprep.mubr.msk.f32.mxu1 %vm6292_vm1, %v6293_v21  ;;  %v6451_v22 = vld [vmem:[%s8231_s0] sm:$0xf]  ;;  %vm132_vm2 = vcmask 523264   ;;  %s6295_s21 = smov 122   ;;  %v607_v24 = vld [vmem:[%s8238_s7 + $0x8] sm:$0xff]  ;;  %v6296_v25 = vmov 0  }
  0x3f   :  { %v408_v6 = vrot.slane %v397_v4, %v119_v2  ;;  %v412_v7 = vrot.slane %v397_v4, %v123_v3  ;;  %200 = vmatprep.mubr.f32.mxu0 %v6293_v21  ;;  %v606_v23 = vld [vmem:[%s8238_s7] sm:$0xff]  ;;  %5496 = vset.pattern.permute.xlu0 %v6296_v25  ;;  %v608_v26 = vld [vmem:[%s8238_s7 + $0x10] sm:$0xff]  ;;  %v609_v27 = vld [vmem:[%s8238_s7 + $0x18] sm:$0xff]  ;;  %v6297_v38 = vmov 1966171168   ;;  %v6505_v42 = vand.u32 127, %v117_v0 }
  0x40   :  { %5497 = vset.pattern.permute.xlu1 %v6296_v25  ;;  %v610_v28 = vld [vmem:[%s8238_s7 + $0x20] sm:$0xff]  ;;  %v611_v29 = vld [vmem:[%s8238_s7 + $0x28] sm:$0xff]  ;;  %v612_v30 = vld [vmem:[%s8238_s7 + $0x30] sm:$0xff]  ;;  %v428_v39 = vunpack.c.l.s4 %v6297_v38  ;;  %vm702_vm9 = vcmask 64512   ;;  %s6299_s24 = smov [#allocation11]  }
  0x41   :  { %445 = vrot.lane.b32.xlu1 %v408_v6, %s6287_s8  ;;  %415 = vrot.lane.b32.xlu0 %v408_v6, %s6288_s29  ;;  %v613_v31 = vld [vmem:[%s8238_s7 + $0x38] sm:$0xff]  ;;  %v614_v32 = vld [vmem:[%s8238_s7 + $0x40] sm:$0xff]  ;;  %vm449_vm3 = vcmp.lt.s32.totalorder %v6505_v42, 126  ;;  %vm421_vm4 = vcmp.lt.s32.totalorder %v6505_v42, 127  ;;  %vm477_vm5 = vcmp.lt.s32.totalorder %v6505_v42, 125  ;;  %vm505_vm6 = vcmp.lt.s32.totalorder %v6505_v42, 124 }
  0x42   :  { %4746 = vmatpush3.bf16.msra.mxu1 %v4745_v14  ;;  %v615_v33 = vld [vmem:[%s8238_s7 + $0x48] sm:$0xff]  ;;  %v616_v34 = vld [vmem:[%s8238_s7 + $0x50] sm:$0xff]  ;;  %v617_v35 = vld [vmem:[%s8238_s7 + $0x58] sm:$0xff]  ;;  %v429_v43 = vunpack.c.0.s8 %v428_v39  ;;  %vm533_vm7 = vcmp.lt.s32.totalorder %v6505_v42, 123  ;;  %vm561_vm8 = vcmp.lt.s32.totalorder %v6505_v42, 122  ;;  %s4526_s25 = sshll.u32 %s6299_s24, 4  ;;  %s4527_s25 = int_to_ptr.vmem [resolvable:$true] %s4526_s25 }
  0x43   :  { %4747 = vmatprep.subr.bf16.mxu1 %v6289_v11  ;;  %v618_v36 = vld [vmem:[%s8238_s7 + $0x60] sm:$0xff]  ;;  %v619_v37 = vld [vmem:[%s8238_s7 + $0x68] sm:$0xff]  ;;  %v620_v40 = vld [vmem:[%s8238_s7 + $0x70] sm:$0xff] }
  0x44   :  { %v621_v41 = vld [vmem:[%s8238_s7 + $0x78] sm:$0xff]  ;;  %v432_v46 = vsub.s32 %v429_v43, %v6418_v1  ;;  %v590_v5 = vld [vmem:[%s8237_s6 + $0x10] sm:$0xff]  ;;  %v596_v38 = vld [vmem:[%s8237_s6 + $0x40] sm:$0xff] }
  0x45   :  { %447 = vrot.lane.b32.xlu1 %v412_v7, %s6287_s8  ;;  %417 = vrot.lane.b32.xlu0 %v412_v7, %s6288_s29  ;;  %v597_v39 = vld [vmem:[%s8237_s6 + $0x48] sm:$0xff]  ;;  %v600_v43 = vld [vmem:[%s8237_s6 + $0x60] sm:$0xff] }
  0x46   :  { %4749 = vmatpush3.bf16.msra.mxu1 %v4748_v17  ;;  %v4328_v42 = vld [vmem:[%s8243_s12 + $0x90] sm:$0xff] }
  0x47   :  { %4750 = vmatprep.subr.bf16.mxu1 %v6289_v11 }
  0x49   :  { %475 = vrot.lane.b32.xlu1 %v412_v7, %s6290_s1  ;;  %473 = vrot.lane.b32.xlu0 %v408_v6, %s6290_s1 }
  0x4a   :  { %4752 = vmatpush3.bf16.msra.mxu1 %v4751_v20 }
  0x4d   :  { %503 = vrot.lane.b32.xlu1 %v412_v7, %s6291_s30  ;;  %501 = vrot.lane.b32.xlu0 %v408_v6, %s6291_s30 }
  0x4e   :  { %4723 = vmatmul.mubr.msk.f32.vlgmr.msra.gmra.mrb[0].mxu1 %vm132_vm2, %v6451_v22 }
  0x4f   :  { %815 = vmatprep.mubr.f32.mxu1 %v6293_v21 }
  0x51   :  { %531 = vrot.lane.b32.xlu1 %v412_v7, %s6294_s16  ;;  %529 = vrot.lane.b32.xlu0 %v408_v6, %s6294_s16 }
  0x55   :  { %559 = vrot.lane.b32.xlu1 %v412_v7, %s6295_s21  ;;  %557 = vrot.lane.b32.xlu0 %v408_v6, %s6295_s21 }
  0x59   :  { %624 = vperm.xlu0 %5496, %v606_v23   ;;  %629 = vperm.xlu1 %5497, %v607_v24  }
  0x5d   :  { %634 = vperm.xlu1 %5497, %v608_v26   ;;  %639 = vperm.xlu0 %5496, %v609_v27  }
  0x61   :  { %644 = vperm.xlu1 %5497, %v610_v28   ;;  %649 = vperm.xlu0 %5496, %v611_v29  }
  0x65   :  { %654 = vperm.xlu1 %5497, %v612_v30   ;;  %659 = vperm.xlu0 %5496, %v613_v31   ;;  %v588_v31 = vld [vmem:[%s8237_s6] sm:$0xff] }
  0x69   :  { %664 = vperm.xlu1 %5497, %v614_v32   ;;  %669 = vperm.xlu0 %5496, %v615_v33   ;;  %v589_v32 = vld [vmem:[%s8237_s6 + $0x8] sm:$0xff]  ;;  %v591_v33 = vld [vmem:[%s8237_s6 + $0x18] sm:$0xff] }
  0x6d   :  { %674 = vperm.xlu1 %5497, %v616_v34   ;;  %679 = vperm.xlu0 %5496, %v617_v35   ;;  %v592_v34 = vld [vmem:[%s8237_s6 + $0x20] sm:$0xff]  ;;  %v593_v35 = vld [vmem:[%s8237_s6 + $0x28] sm:$0xff] }
  0x71   :  { %684 = vperm.xlu1 %5497, %v618_v36   ;;  %689 = vperm.xlu0 %5496, %v619_v37   ;;  %v594_v36 = vld [vmem:[%s8237_s6 + $0x30] sm:$0xff]  ;;  %v595_v37 = vld [vmem:[%s8237_s6 + $0x38] sm:$0xff] }
  0x75   :  { %694 = vperm.xlu1 %5497, %v620_v40   ;;  %699 = vperm.xlu0 %5496, %v621_v41   ;;  %v598_v40 = vld [vmem:[%s8237_s6 + $0x50] sm:$0xff]  ;;  %v599_v41 = vld [vmem:[%s8237_s6 + $0x58] sm:$0xff] }
  0xb3   :  { %v446_v44 = vpop.permute.xlu1 %445  ;;  %v416_v45 = vpop.permute.xlu0 %415 }
  0xb7   :  { %v448_v47 = vpop.permute.xlu1 %447  ;;  %v418_v48 = vpop.permute.xlu0 %417 }
  0xb8   :  { %v450_v49 = vsel %vm449_vm3, %v446_v44, %v448_v47  ;;  %v451_v50 = vsel %vm449_vm3, %v448_v47, %v446_v44  ;;  %v422_v51 = vsel %vm421_vm4, %v416_v45, %v418_v48  ;;  %v423_v52 = vsel %vm421_vm4, %v418_v48, %v416_v45  ;;  %v601_v44 = vld [vmem:[%s8237_s6 + $0x68] sm:$0xff]  ;;  %v602_v45 = vld [vmem:[%s8237_s6 + $0x70] sm:$0xff]  ;;  %v6625_v48 = vld [vmem:[%s8234_s3] sm:$0x7] }
  0xb9   :  { %v454_v53 = vcombine.low %v450_v49, %v451_v50  ;;  %v426_v54 = vcombine.low %v422_v51, %v423_v52  ;;  %v127_v47 = vsub.s32 2, %v6418_v1 }
  0xbb   :  { %v461_v55 = vrot.slane %v454_v53, %v432_v46  ;;  %v433_v56 = vrot.slane %v426_v54, %v432_v46  ;;  %v476_v57 = vpop.permute.xlu1 %475  ;;  %v474_v58 = vpop.permute.xlu0 %473  ;;  %v128_v49 = vrot.slane %v6625_v48, %v127_v47  ;;  %v92_v53 = vld [vmem:[#allocation5 + $0x8] sm:$0xff]  ;;  %v95_v54 = vld [vmem:[#allocation5 + $0x20] sm:$0xff] }
  0xbc   :  { %v478_v59 = vsel %vm477_vm5, %v474_v58, %v476_v57  ;;  %v479_v60 = vsel %vm477_vm5, %v476_v57, %v474_v58  ;;  %v94_v57 = vld [vmem:[#allocation5 + $0x18] sm:$0xff] }
  0xbd   :  { %v468_v61 = vrot.slane %v461_v55, %v432_v46  ;;  %v440_v62 = vrot.slane %v433_v56, %v432_v46  ;;  %v482_v63 = vcombine.low %v478_v59, %v479_v60  ;;  %v4725_v55 = vpack.c.bf16 %v95_v54, %v92_v53  ;;  %v91_v56 = vld [vmem:[#allocation5] sm:$0xff]  ;;  %v98_v59 = vld [vmem:[#allocation5 + $0x38] sm:$0xff]  ;;  %v101_v60 = vld [vmem:[#allocation5 + $0x50] sm:$0xff] }
  0xbe   :  { %v4727_v58 = vpack.c.bf16 %v94_v57, %v91_v56 }
  0xbf   :  { %471 = vst.msk [vmem:[#allocation2 + $0x2] ss:$8 sm:$0x3] %vm6426_vm0, %v468_v61  ;;  %443 = vst.msk [vmem:[#allocation2 + $0x1] ss:$8 sm:$0x3] %vm6426_vm0, %v440_v62  ;;  %v489_v0 = vrot.slane %v482_v63, %v432_v46  ;;  %v504_v4 = vpop.permute.xlu1 %503  ;;  %v502_v6 = vpop.permute.xlu0 %501  ;;  %4726 = vmatprep.subr.bf16.mxu0 %v4725_v55  ;;  %v4729_v61 = vpack.c.bf16 %v101_v60, %v98_v59 }
  0xc0   :  { %v506_v7 = vsel %vm505_vm6, %v502_v6, %v504_v4  ;;  %v507_v8 = vsel %vm505_vm6, %v504_v4, %v502_v6  ;;  %4728 = vmatpush1.bf16.msra.mxu0 %v4727_v58  ;;  %v97_v62 = vld [vmem:[#allocation5 + $0x30] sm:$0xff]  ;;  %v100_v63 = vld [vmem:[#allocation5 + $0x48] sm:$0xff]  ;;  %v107_v6 = vld [vmem:[#allocation5 + $0x80] sm:$0xff] }
  0xc1   :  { %v496_v9 = vrot.slane %v489_v0, %v432_v46  ;;  %v510_v10 = vcombine.low %v506_v7, %v507_v8  ;;  %v4731_v0 = vpack.c.bf16 %v100_v63, %v97_v62  ;;  %4730 = vmatprep.subr.bf16.mxu0 %v4729_v61  ;;  %v104_v4 = vld [vmem:[#allocation5 + $0x68] sm:$0xff]  ;;  %v103_v8 = vld [vmem:[#allocation5 + $0x60] sm:$0xff] }
  0xc2   :  { %v4733_v7 = vpack.c.bf16 %v107_v6, %v104_v4 }
  0xc3   :  { %499 = vst.msk [vmem:[#allocation2 + $0x3] ss:$8 sm:$0x3] %vm6426_vm0, %v496_v9  ;;  %v517_v11 = vrot.slane %v510_v10, %v432_v46  ;;  %v532_v12 = vpop.permute.xlu1 %531  ;;  %v530_v13 = vpop.permute.xlu0 %529  ;;  %v106_v9 = vld [vmem:[#allocation5 + $0x78] sm:$0xff] }
  0xc4   :  { %v534_v14 = vsel %vm533_vm7, %v530_v13, %v532_v12  ;;  %v535_v15 = vsel %vm533_vm7, %v532_v12, %v530_v13  ;;  %4732 = vmatpush1.bf16.msra.mxu0 %v4731_v0  ;;  %v4735_v10 = vpack.c.bf16 %v106_v9, %v103_v8  ;;  %v113_v12 = vld [vmem:[#allocation5 + $0xb0] sm:$0xff] }
  0xc5   :  { %v524_v16 = vrot.slane %v517_v11, %v432_v46  ;;  %v538_v17 = vcombine.low %v534_v14, %v535_v15  ;;  %4734 = vmatprep.subr.bf16.mxu0 %v4733_v7  ;;  %v110_v11 = vld [vmem:[#allocation5 + $0x98] sm:$0xff]  ;;  %v109_v14 = vld [vmem:[#allocation5 + $0x90] sm:$0xff]  ;;  %v112_v15 = vld [vmem:[#allocation5 + $0xa8] sm:$0xff] }
  0xc6   :  { %v4737_v13 = vpack.c.bf16 %v113_v12, %v110_v11 }
  0xc7   :  { %527 = vst.msk [vmem:[#allocation2 + $0x4] ss:$8 sm:$0x3] %vm6426_vm0, %v524_v16  ;;  %v545_v18 = vrot.slane %v538_v17, %v432_v46  ;;  %v560_v19 = vpop.permute.xlu1 %559  ;;  %v558_v20 = vpop.permute.xlu0 %557  ;;  %v4739_v16 = vpack.c.bf16 %v112_v15, %v109_v14 }
  0xc8   :  { %v562_v23 = vsel %vm561_vm8, %v558_v20, %v560_v19  ;;  %v563_v24 = vsel %vm561_vm8, %v560_v19, %v558_v20  ;;  %4736 = vmatpush1.bf16.msra.mxu0 %v4735_v10 }
  0xc9   :  { %v552_v25 = vrot.slane %v545_v18, %v432_v46  ;;  %v566_v26 = vcombine.low %v562_v23, %v563_v24  ;;  %4738 = vmatprep.subr.bf16.mxu0 %v4737_v13 }
  0xcb   :  { %555 = vst.msk [vmem:[#allocation2 + $0x5] ss:$8 sm:$0x3] %vm6426_vm0, %v552_v25  ;;  %v573_v27 = vrot.slane %v566_v26, %v432_v46 }
  0xcc   :  { %4740 = vmatpush1.bf16.msra.mxu0 %v4739_v16 }
  0xcd   :  { %v580_v28 = vrot.slane %v573_v27, %v432_v46  ;;  %v603_v46 = vld [vmem:[%s8237_s6 + $0x78] sm:$0xff] }
  0xcf   :  { %583 = vst.msk [vmem:[#allocation2 + $0x6] ss:$8 sm:$0x3] %vm6426_vm0, %v580_v28  ;;  %4563 = vmatmul.mubr.msk.f32.vlgmr.msra.gmra.mrb[0].mxu0 %vm132_vm2, %v6451_v22 }
  0xd6   :  { %v605_v29 = vld [vmem:[#allocation2 + $0x8] sm:$0xff]  ;;  %v604_v30 = vld [vmem:[#allocation2] sm:$0xff] }
  0xd7   :  { %751 = vmatprep.subr.mxu1 %v605_v29 }
  0xd8   :  { %752 = vmatpush1.msra.mxu1 %v604_v30  ;;  %v625_v18 = vpop.permute.xlu0 %624  ;;  %v630_v20 = vpop.permute.xlu1 %629 }
  0xd9   :  { %4566 = vmatmul.mubr.msk.f32.vlgmr.msra.gmra.mrb[2].mxu1 %vm702_vm9, %v588_v31 }
  0xda   :  { %821 = vmatprep.mubr.f32.mxu1 %v6293_v21 }
  0xdd   :  { %4567 = vmatmul.mubr.msk.f32.gmra.mrb[4].mxu1 %vm702_vm9, %v589_v32 }
  0xde   :  { %827 = vmatprep.mubr.f32.mxu1 %v6293_v21 }
  0xe1   :  { %4568 = vmatmul.mubr.msk.f32.gmra.mrb[6].mxu1 %vm702_vm9, %v590_v5 }
  0xe2   :  { %833 = vmatprep.mubr.f32.mxu1 %v6293_v21 }
  0xe5   :  { %4569 = vmatmul.mubr.msk.f32.gmra.mrb[8].mxu1 %vm702_vm9, %v591_v33  ;;  %v635_v33 = vpop.permute.xlu1 %634 }
  0xe6   :  { %839 = vmatprep.mubr.f32.mxu1 %v6293_v21 }
  0xe9   :  { %4570 = vmatmul.mubr.msk.f32.gmra.mrb[10].mxu1 %vm702_vm9, %v592_v34  ;;  %v645_v55 = vpop.permute.xlu1 %644 }
  0xea   :  { %845 = vmatprep.mubr.f32.mxu1 %v6293_v21 }
  0xed   :  { %4571 = vmatmul.mubr.msk.f32.gmra.mrb[12].mxu1 %vm702_vm9, %v593_v35  ;;  %v655_v13 = vpop.permute.xlu1 %654 }
  0xee   :  { %851 = vmatprep.mubr.f32.mxu1 %v6293_v21 }
  0xf1   :  { %4572 = vmatmul.mubr.msk.f32.gmra.mrb[14].mxu1 %vm702_vm9, %v594_v36 }
  0xf2   :  { %857 = vmatprep.mubr.f32.mxu1 %v6293_v21 }
  0xf5   :  { %4573 = vmatmul.mubr.msk.f32.gmra.mrb[16].mxu1 %vm702_vm9, %v595_v37 }
  0xf6   :  { %863 = vmatprep.mubr.f32.mxu1 %v6293_v21 }
  0xf9   :  { %4574 = vmatmul.mubr.msk.f32.gmra.mrb[18].mxu1 %vm702_vm9, %v596_v38 }
  0xfa   :  { %869 = vmatprep.mubr.f32.mxu1 %v6293_v21 }
  0xfd   :  { %4575 = vmatmul.mubr.msk.f32.gmra.mrb[20].mxu1 %vm702_vm9, %v597_v39 }
  0xfe   :  { %875 = vmatprep.mubr.f32.mxu1 %v6293_v21 }
 0x101   :  { %4576 = vmatmul.mubr.msk.f32.gmra.mrb[22].mxu1 %vm702_vm9, %v598_v40  ;;  %v640_v40 = vpop.permute.xlu0 %639 }
 0x102   :  { %881 = vmatprep.mubr.f32.mxu1 %v6293_v21 }
 0x105   :  { %4577 = vmatmul.mubr.msk.f32.gmra.mrb[24].mxu1 %vm702_vm9, %v599_v41  ;;  %v650_v59 = vpop.permute.xlu0 %649 }
 0x106   :  { %887 = vmatprep.mubr.f32.mxu1 %v6293_v21 }
 0x109   :  { %4578 = vmatmul.mubr.msk.f32.gmra.mrb[26].mxu1 %vm702_vm9, %v600_v43 }
 0x10a   :  { %893 = vmatprep.mubr.f32.mxu1 %v6293_v21 }
 0x10d   :  { %4579 = vmatmul.mubr.msk.f32.gmra.mrb[28].mxu1 %vm702_vm9, %v601_v44 }
 0x10e   :  { %899 = vmatprep.mubr.f32.mxu1 %v6293_v21 }
 0x111   :  { %4580 = vmatmul.mubr.msk.f32.gmra.mrb[30].mxu1 %vm702_vm9, %v602_v45 }
 0x112   :  { %905 = vmatprep.mubr.f32.mxu1 %v6293_v21 }
 0x115   :  { %4581 = vmatmul.mubr.msk.f32.gmra.mrb[32].mxu1 %vm702_vm9, %v603_v46 }
 0x121   :  { %v273_v50 = vpop.f32.mrb[0].mxu1 }
 0x122   :  { %v274_v51 = vadd.f32 %v273_v50, %v128_v49  ;;  %v4724_v52 = vpop.f32.mrb[1].mxu1 }
 0x124   :  { %277 = vst [vmem:[#allocation12] sm:$0xf] %v274_v51 }
 0x1ac   :  { %v817_v17 = vpop.f32.mrb[2].mxu1 }
 0x1ad   :  { %v819_v19 = vpop.f32.mrb[3].mxu1  ;;  %v818_v23 = vadd.f32 %v817_v17, %v625_v18  ;;  %v660_v17 = vpop.permute.xlu0 %659 }
 0x1ae   :  { %v820_v24 = vadd.f32 %v819_v19, %v625_v18 }
 0x1af   :  { %v912_v29 = vmax.f32 %v818_v23, 0.0 }
 0x1b0   :  { %v823_v25 = vpop.f32.mrb[4].mxu1  ;;  %v913_v31 = vmax.f32 %v820_v24, 0.0 }
 0x1b1   :  { %v824_v26 = vadd.f32 %v823_v25, %v630_v20  ;;  %v825_v27 = vpop.f32.mrb[5].mxu1 }
 0x1b2   :  { %v826_v28 = vadd.f32 %v825_v27, %v630_v20 }
 0x1b3   :  { %v914_v30 = vmax.f32 %v824_v26, 0.0 }
 0x1b4   :  { %v915_v32 = vmax.f32 %v826_v28, 0.0  ;;  %v829_v5 = vpop.f32.mrb[6].mxu1 }
 0x1b5   :  { %v831_v34 = vpop.f32.mrb[7].mxu1  ;;  %v6630_v35 = vpack.i.bf16 %v914_v30, %v912_v29  ;;  %v4787_v22 = vpack.c.bf16 %v914_v30, %v912_v29  ;;  %v830_v38 = vadd.f32 %v829_v5, %v635_v33  ;;  %v665_v5 = vpop.permute.xlu1 %664 }
 0x1b6   :  { %v6632_v36 = vpack.i.bf16 %v915_v32, %v913_v31  ;;  %v4785_v37 = vpack.c.bf16 %v915_v32, %v913_v31  ;;  %v832_v39 = vadd.f32 %v831_v34, %v635_v33 }
 0x1b7   :  { %5499 = vrot.lane.b32.xlu1 %v6630_v35, %s6288_s29  ;;  %v916_v46 = vmax.f32 %v830_v38, 0.0 }
 0x1b8   :  { %v835_v41 = vpop.f32.mrb[8].mxu1  ;;  %5504 = vrot.lane.b32.xlu0 %v6632_v36, %s6288_s29  ;;  %4786 = vmatprep.subr.bf16.mxu1 %v4785_v37  ;;  %v917_v49 = vmax.f32 %v832_v39, 0.0  ;;  %v670_v37 = vpop.permute.xlu0 %669 }
 0x1b9   :  { %v836_v43 = vadd.f32 %v835_v41, %v640_v40  ;;  %v837_v44 = vpop.f32.mrb[9].mxu1  ;;  %4788 = vmatpush1.bf16.msra.mxu1 %v4787_v22 }
 0x1ba   :  { %v838_v45 = vadd.f32 %v837_v44, %v640_v40 }
 0x1bb   :  { %v918_v47 = vmax.f32 %v836_v43, 0.0 }
 0x1bc   :  { %v919_v50 = vmax.f32 %v838_v45, 0.0  ;;  %v841_v51 = vpop.f32.mrb[10].mxu1 }
 0x1bd   :  { %v843_v52 = vpop.f32.mrb[11].mxu1  ;;  %v6638_v53 = vpack.i.bf16 %v918_v47, %v916_v46  ;;  %v4791_v54 = vpack.c.bf16 %v918_v47, %v916_v46  ;;  %v842_v58 = vadd.f32 %v841_v51, %v645_v55 }
 0x1be   :  { %v6640_v56 = vpack.i.bf16 %v919_v50, %v917_v49  ;;  %v4789_v57 = vpack.c.bf16 %v919_v50, %v917_v49  ;;  %v844_v60 = vadd.f32 %v843_v52, %v645_v55 }
 0x1bf   :  { %5509 = vrot.lane.b32.xlu1 %v6638_v53, %s6288_s29  ;;  %v920_v4 = vmax.f32 %v842_v58, 0.0 }
 0x1c0   :  { %v847_v61 = vpop.f32.mrb[12].mxu1  ;;  %5514 = vrot.lane.b32.xlu0 %v6640_v56, %s6288_s29  ;;  %4790 = vmatprep.subr.bf16.mxu1 %v4789_v57  ;;  %v921_v7 = vmax.f32 %v844_v60, 0.0 }
 0x1c1   :  { %v848_v62 = vadd.f32 %v847_v61, %v650_v59  ;;  %v849_v63 = vpop.f32.mrb[13].mxu1  ;;  %4792 = vmatpush1.bf16.msra.mxu1 %v4791_v54  ;;  %v675_v54 = vpop.permute.xlu1 %674 }
 0x1c2   :  { %v850_v0 = vadd.f32 %v849_v63, %v650_v59  ;;  %v680_v59 = vpop.permute.xlu0 %679 }
 0x1c3   :  { %v922_v6 = vmax.f32 %v848_v62, 0.0 }
 0x1c4   :  { %v923_v8 = vmax.f32 %v850_v0, 0.0  ;;  %v853_v9 = vpop.f32.mrb[14].mxu1 }
 0x1c5   :  { %v855_v10 = vpop.f32.mrb[15].mxu1  ;;  %v6646_v11 = vpack.i.bf16 %v922_v6, %v920_v4  ;;  %v4795_v12 = vpack.c.bf16 %v922_v6, %v920_v4  ;;  %v854_v16 = vadd.f32 %v853_v9, %v655_v13 }
 0x1c6   :  { %v6648_v14 = vpack.i.bf16 %v923_v8, %v921_v7  ;;  %v4793_v15 = vpack.c.bf16 %v923_v8, %v921_v7  ;;  %v856_v18 = vadd.f32 %v855_v10, %v655_v13 }
 0x1c7   :  { %5519 = vrot.lane.b32.xlu1 %v6646_v11, %s6288_s29  ;;  %v924_v25 = vmax.f32 %v854_v16, 0.0 }
 0x1c8   :  { %v859_v19 = vpop.f32.mrb[16].mxu1  ;;  %5524 = vrot.lane.b32.xlu0 %v6648_v14, %s6288_s29  ;;  %4794 = vmatprep.subr.bf16.mxu1 %v4793_v15  ;;  %v925_v27 = vmax.f32 %v856_v18, 0.0  ;;  %v685_v15 = vpop.permute.xlu1 %684 }
 0x1c9   :  { %v860_v20 = vadd.f32 %v859_v19, %v660_v17  ;;  %v861_v23 = vpop.f32.mrb[17].mxu1  ;;  %4796 = vmatpush1.bf16.msra.mxu1 %v4795_v12  ;;  %v690_v19 = vpop.permute.xlu0 %689 }
 0x1ca   :  { %v862_v24 = vadd.f32 %v861_v23, %v660_v17 }
 0x1cb   :  { %v926_v26 = vmax.f32 %v860_v20, 0.0 }
 0x1cc   :  { %v927_v28 = vmax.f32 %v862_v24, 0.0  ;;  %v865_v29 = vpop.f32.mrb[18].mxu1 }
 0x1cd   :  { %v867_v30 = vpop.f32.mrb[19].mxu1  ;;  %v6654_v31 = vpack.i.bf16 %v926_v26, %v924_v25  ;;  %v4799_v32 = vpack.c.bf16 %v926_v26, %v924_v25  ;;  %v866_v22 = vadd.f32 %v865_v29, %v665_v5 }
 0x1ce   :  { %v6656_v33 = vpack.i.bf16 %v927_v28, %v925_v27  ;;  %v4797_v34 = vpack.c.bf16 %v927_v28, %v925_v27  ;;  %v868_v38 = vadd.f32 %v867_v30, %v665_v5 }
 0x1cf   :  { %5529 = vrot.lane.b32.xlu1 %v6654_v31, %s6288_s29  ;;  %v928_v44 = vmax.f32 %v866_v22, 0.0 }
 0x1d0   :  { %v871_v39 = vpop.f32.mrb[20].mxu1  ;;  %5534 = vrot.lane.b32.xlu0 %v6656_v33, %s6288_s29  ;;  %4798 = vmatprep.subr.bf16.mxu1 %v4797_v34  ;;  %v929_v46 = vmax.f32 %v868_v38, 0.0 }
 0x1d1   :  { %v872_v40 = vadd.f32 %v871_v39, %v670_v37  ;;  %v873_v41 = vpop.f32.mrb[21].mxu1  ;;  %4800 = vmatpush1.bf16.msra.mxu1 %v4799_v32 }
 0x1d2   :  { %v874_v43 = vadd.f32 %v873_v41, %v670_v37  ;;  %v695_v37 = vpop.permute.xlu1 %694  ;;  %v700_v41 = vpop.permute.xlu0 %699 }
 0x1d3   :  { %v930_v45 = vmax.f32 %v872_v40, 0.0 }
 0x1d4   :  { %v931_v47 = vmax.f32 %v874_v43, 0.0  ;;  %v877_v49 = vpop.f32.mrb[22].mxu1 }
 0x1d5   :  { %v879_v50 = vpop.f32.mrb[23].mxu1  ;;  %v6662_v51 = vpack.i.bf16 %v930_v45, %v928_v44  ;;  %v4803_v52 = vpack.c.bf16 %v930_v45, %v928_v44  ;;  %v878_v58 = vadd.f32 %v877_v49, %v675_v54 }
 0x1d6   :  { %v6664_v55 = vpack.i.bf16 %v931_v47, %v929_v46  ;;  %v4801_v57 = vpack.c.bf16 %v931_v47, %v929_v46  ;;  %v880_v60 = vadd.f32 %v879_v50, %v675_v54 }
 0x1d7   :  { %5539 = vrot.lane.b32.xlu1 %v6662_v51, %s6288_s29  ;;  %v932_v4 = vmax.f32 %v878_v58, 0.0 }
 0x1d8   :  { %v883_v61 = vpop.f32.mrb[24].mxu1  ;;  %5544 = vrot.lane.b32.xlu0 %v6664_v55, %s6288_s29  ;;  %4802 = vmatprep.subr.bf16.mxu1 %v4801_v57  ;;  %v933_v7 = vmax.f32 %v880_v60, 0.0  ;;  %v1489_v57 = vld [vmem:[#allocation10 + $0x8] sm:$0xff] }
 0x1d9   :  { %v884_v62 = vadd.f32 %v883_v61, %v680_v59  ;;  %v885_v63 = vpop.f32.mrb[25].mxu1  ;;  %4804 = vmatpush1.bf16.msra.mxu1 %v4803_v52  ;;  %2064 = vmatprep.mubr.f32.mxu1 %v1489_v57  ;;  %v296_v57 = vld [vmem:[#allocation8 + $0x60] sm:$0xff] }
 0x1da   :  { %v886_v0 = vadd.f32 %v885_v63, %v680_v59  ;;  %v301_v63 = vld [vmem:[#allocation8 + $0x88] sm:$0xff] }
 0x1db   :  { %v934_v6 = vmax.f32 %v884_v62, 0.0  ;;  %v300_v62 = vld [vmem:[#allocation8 + $0x80] sm:$0xff] }
 0x1dc   :  { %v935_v8 = vmax.f32 %v886_v0, 0.0  ;;  %v889_v9 = vpop.f32.mrb[26].mxu1  ;;  %v4753_v0 = vpack.c.bf16 %v301_v63, %v300_v62  ;;  %v120_v62 = vrot.slane %v6625_v48, %v119_v2  ;;  %v202_v63 = vpop.f32.mrb[0].mxu0 }
 0x1dd   :  { %v891_v10 = vpop.f32.mrb[27].mxu1  ;;  %v6670_v12 = vpack.i.bf16 %v934_v6, %v932_v4  ;;  %v4807_v13 = vpack.c.bf16 %v934_v6, %v932_v4  ;;  %v890_v18 = vadd.f32 %v889_v9, %v685_v15  ;;  %v284_v4 = vld [vmem:[#allocation8] sm:$0xff]  ;;  %v285_v6 = vld [vmem:[#allocation8 + $0x8] sm:$0xff]  ;;  %v303_v9 = vld [vmem:[#allocation8 + $0x98] sm:$0xff] }
 0x1de   :  { %v6672_v16 = vpack.i.bf16 %v935_v8, %v933_v7  ;;  %v4805_v17 = vpack.c.bf16 %v935_v8, %v933_v7  ;;  %v892_v20 = vadd.f32 %v891_v10, %v685_v15  ;;  %4754 = vmatprep.subr.bf16.mxu0 %v4753_v0  ;;  %v4755_v7 = vpack.c.bf16 %v285_v6, %v284_v4  ;;  %v302_v8 = vld [vmem:[#allocation8 + $0x90] sm:$0xff]  ;;  %v287_v15 = vld [vmem:[#allocation8 + $0x18] sm:$0xff] }
 0x1df   :  { %5549 = vrot.lane.b32.xlu1 %v6670_v12, %s6288_s29  ;;  %v936_v27 = vmax.f32 %v890_v18, 0.0  ;;  %v4757_v10 = vpack.c.bf16 %v303_v9, %v302_v8  ;;  %v304_v18 = vld [vmem:[#allocation8 + $0xa0] sm:$0xff]  ;;  %v124_v0 = vrot.slane %v6625_v48, %v123_v3  ;;  %v314_v4 = vld [vmem:[#allocation8 + $0xf0] sm:$0xff]  ;;  %v315_v6 = vld [vmem:[#allocation8 + $0xf8] sm:$0xff]  ;;  %v204_v8 = vpop.f32.mrb[1].mxu0 }
 0x1e0   :  { %v895_v23 = vpop.f32.mrb[28].mxu1  ;;  %5554 = vrot.lane.b32.xlu0 %v6672_v16, %s6288_s29  ;;  %4806 = vmatprep.subr.bf16.mxu1 %v4805_v17  ;;  %v937_v29 = vmax.f32 %v892_v20, 0.0  ;;  %v4781_v9 = vpack.c.bf16 %v315_v6, %v314_v4 }
 0x1e1   :  { %v896_v24 = vadd.f32 %v895_v23, %v690_v19  ;;  %v897_v25 = vpop.f32.mrb[29].mxu1  ;;  %4808 = vmatpush1.bf16.msra.mxu1 %v4807_v13  ;;  %4756 = vmatpush3.bf16.msra.mxu0 %v4755_v7  ;;  %v286_v13 = vld [vmem:[#allocation8 + $0x10] sm:$0xff]  ;;  %v288_v23 = vld [vmem:[#allocation8 + $0x20] sm:$0xff]  ;;  %v203_v7 = vadd.f32 %v202_v63, %v120_v62 }
 0x1e2   :  { %v898_v26 = vadd.f32 %v897_v25, %v690_v19  ;;  %4758 = vmatprep.subr.bf16.mxu0 %v4757_v10  ;;  %v4759_v17 = vpack.c.bf16 %v287_v15, %v286_v13  ;;  %v305_v19 = vld [vmem:[#allocation8 + $0xa8] sm:$0xff]  ;;  %v298_v10 = vld [vmem:[#allocation8 + $0x70] sm:$0xff]  ;;  %v299_v13 = vld [vmem:[#allocation8 + $0x78] sm:$0xff]  ;;  %v205_v15 = vadd.f32 %v204_v8, %v124_v0 }
 0x1e3   :  { %v938_v28 = vmax.f32 %v896_v24, 0.0  ;;  %v4761_v20 = vpack.c.bf16 %v305_v19, %v304_v18  ;;  %v289_v24 = vld [vmem:[#allocation8 + $0x28] sm:$0xff]  ;;  %v280_v1 = vmul.f32 0.01, %v203_v7  ;;  %vm278_vm10 = vcmp.gt.f32.partialorder %v203_v7, 0.0 }
 0x1e4   :  { %v939_v30 = vmax.f32 %v898_v26, 0.0  ;;  %v901_v32 = vpop.f32.mrb[30].mxu1  ;;  %v4763_v25 = vpack.c.bf16 %v289_v24, %v288_v23  ;;  %v306_v26 = vld [vmem:[#allocation8 + $0xb0] sm:$0xff]  ;;  %v281_v23 = vmul.f32 0.01, %v205_v15  ;;  %vm279_vm11 = vcmp.gt.f32.partialorder %v205_v15, 0.0 }
 0x1e5   :  { %v903_v5 = vpop.f32.mrb[31].mxu1  ;;  %v6678_v34 = vpack.i.bf16 %v938_v28, %v936_v27  ;;  %v4811_v22 = vpack.c.bf16 %v938_v28, %v936_v27  ;;  %v902_v40 = vadd.f32 %v901_v32, %v695_v37  ;;  %4760 = vmatpush3.bf16.msra.mxu0 %v4759_v17  ;;  %v307_v27 = vld [vmem:[#allocation8 + $0xb8] sm:$0xff]  ;;  %v4783_v17 = vpack.c.bf16 %v299_v13, %v298_v10 }
 0x1e6   :  { %v6680_v38 = vpack.i.bf16 %v939_v30, %v937_v29  ;;  %v4809_v39 = vpack.c.bf16 %v939_v30, %v937_v29  ;;  %v904_v43 = vadd.f32 %v903_v5, %v695_v37  ;;  %4762 = vmatprep.subr.bf16.mxu0 %v4761_v20  ;;  %v4765_v28 = vpack.c.bf16 %v307_v27, %v306_v26  ;;  %v290_v29 = vld [vmem:[#allocation8 + $0x30] sm:$0xff]  ;;  %v291_v30 = vld [vmem:[#allocation8 + $0x38] sm:$0xff]  ;;  %v308_v5 = vld [vmem:[#allocation8 + $0xc0] sm:$0xff] }
 0x1e7   :  { %5559 = vrot.lane.b32.xlu1 %v6678_v34, %s6288_s29  ;;  %v940_v49 = vmax.f32 %v902_v40, 0.0  ;;  %v4767_v32 = vpack.c.bf16 %v291_v30, %v290_v29  ;;  %v293_v40 = vld [vmem:[#allocation8 + $0x48] sm:$0xff]  ;;  %v283_v30 = vsel %vm279_vm11, %v205_v15, %v281_v23 }
 0x1e8   :  { %v907_v44 = vpop.f32.mrb[32].mxu1  ;;  %5564 = vrot.lane.b32.xlu0 %v6680_v38, %s6288_s29  ;;  %4810 = vmatprep.subr.bf16.mxu1 %v4809_v39  ;;  %v941_v52 = vmax.f32 %v904_v43, 0.0  ;;  %v292_v39 = vld [vmem:[#allocation8 + $0x40] sm:$0xff]  ;;  %v310_v43 = vld [vmem:[#allocation8 + $0xd0] sm:$0xff] }
 0x1e9   :  { %v908_v45 = vadd.f32 %v907_v44, %v700_v41  ;;  %v909_v46 = vpop.f32.mrb[33].mxu1  ;;  %4812 = vmatpush1.bf16.msra.mxu1 %v4811_v22  ;;  %4764 = vmatpush3.bf16.msra.mxu0 %v4763_v25  ;;  %v309_v22 = vld [vmem:[#allocation8 + $0xc8] sm:$0xff]  ;;  %v311_v44 = vld [vmem:[#allocation8 + $0xd8] sm:$0xff] }
 0x1ea   :  { %v910_v47 = vadd.f32 %v909_v46, %v700_v41  ;;  %4766 = vmatprep.subr.bf16.mxu0 %v4765_v28  ;;  %v4769_v37 = vpack.c.bf16 %v309_v22, %v308_v5  ;;  %v4771_v41 = vpack.c.bf16 %v293_v40, %v292_v39  ;;  %v294_v46 = vld [vmem:[#allocation8 + $0x50] sm:$0xff]  ;;  %387 = vmatprep.mubr.f32.mxu0 %v283_v30 }
 0x1eb   :  { %v942_v50 = vmax.f32 %v908_v45, 0.0  ;;  %v4773_v45 = vpack.c.bf16 %v311_v44, %v310_v43 }
 0x1ec   :  { %v943_v54 = vmax.f32 %v910_v47, 0.0  ;;  %v295_v47 = vld [vmem:[#allocation8 + $0x58] sm:$0xff] }
 0x1ed   :  { %v6686_v58 = vpack.i.bf16 %v942_v50, %v940_v49  ;;  %v4815_v59 = vpack.c.bf16 %v942_v50, %v940_v49  ;;  %4768 = vmatpush3.bf16.msra.mxu0 %v4767_v32  ;;  %v4775_v49 = vpack.c.bf16 %v295_v47, %v294_v46  ;;  %v312_v50 = vld [vmem:[#allocation8 + $0xe0] sm:$0xff]  ;;  %v282_v32 = vsel %vm278_vm10, %v203_v7, %v280_v1 }
 0x1ee   :  { %v6688_v60 = vpack.i.bf16 %v943_v54, %v941_v52  ;;  %v4813_v61 = vpack.c.bf16 %v943_v54, %v941_v52  ;;  %4770 = vmatprep.subr.bf16.mxu0 %v4769_v37  ;;  %v313_v52 = vld [vmem:[#allocation8 + $0xe8] sm:$0xff] }
 0x1ef   :  { %5569 = vrot.lane.b32.xlu1 %v6686_v58, %s6288_s29  ;;  %v4777_v54 = vpack.c.bf16 %v313_v52, %v312_v50 }
 0x1f0   :  { %5574 = vrot.lane.b32.xlu0 %v6688_v60, %s6288_s29  ;;  %4814 = vmatprep.subr.bf16.mxu1 %v4813_v61 }
 0x1f1   :  { %4816 = vmatpush1.bf16.msra.mxu1 %v4815_v59  ;;  %4772 = vmatpush3.bf16.msra.mxu0 %v4771_v41  ;;  %v297_v59 = vld [vmem:[#allocation8 + $0x68] sm:$0xff] }
 0x1f2   :  { %4774 = vmatprep.subr.bf16.mxu0 %v4773_v45  ;;  %v4779_v61 = vpack.c.bf16 %v297_v59, %v296_v57 }
 0x1f3   :  { %5579 = vrot.lane.b32.xlu1 %v6630_v35, %s6287_s8 }
 0x1f4   :  { %5584 = vrot.lane.b32.xlu0 %v6632_v36, %s6287_s8 }
 0x1f5   :  { %4776 = vmatpush3.bf16.msra.mxu0 %v4775_v49 }
 0x1f6   :  { %4778 = vmatprep.subr.bf16.mxu0 %v4777_v54 }
 0x1f7   :  { %5589 = vrot.lane.b32.xlu1 %v6638_v53, %s6287_s8 }
 0x1f8   :  { %5594 = vrot.lane.b32.xlu0 %v6640_v56, %s6287_s8 }
 0x1f9   :  { %4780 = vmatpush3.bf16.msra.mxu0 %v4779_v61 }
 0x1fa   :  { %4782 = vmatprep.subr.bf16.mxu0 %v4781_v9 }
 0x1fb   :  { %5599 = vrot.lane.b32.xlu1 %v6646_v11, %s6287_s8 }
 0x1fc   :  { %5604 = vrot.lane.b32.xlu0 %v6648_v14, %s6287_s8 }
 0x1fd   :  { %4784 = vmatpush3.bf16.msra.mxu0 %v4783_v17 }
 0x1ff   :  { %5609 = vrot.lane.b32.xlu1 %v6654_v31, %s6287_s8 }
 0x200   :  { %5614 = vrot.lane.b32.xlu0 %v6656_v33, %s6287_s8  ;;  %388 = vmatmul.mubr.f32.vlgmr.msra.gmra.mrb[2].mxu0 %v282_v32 }
 0x201   :  { %2578 = vmatprep.mubr.f32.mxu0 %v6293_v21 }
 0x203   :  { %5619 = vrot.lane.b32.xlu1 %v6662_v51, %s6287_s8 }
 0x204   :  { %5624 = vrot.lane.b32.xlu0 %v6664_v55, %s6287_s8 }
 0x207   :  { %5629 = vrot.lane.b32.xlu1 %v6670_v12, %s6287_s8 }
 0x208   :  { %5634 = vrot.lane.b32.xlu0 %v6672_v16, %s6287_s8 }
 0x20b   :  { %5639 = vrot.lane.b32.xlu1 %v6678_v34, %s6287_s8 }
 0x20c   :  { %5644 = vrot.lane.b32.xlu0 %v6680_v38, %s6287_s8 }
 0x20f   :  { %5649 = vrot.lane.b32.xlu1 %v6686_v58, %s6287_s8 }
 0x210   :  { %5659 = vrot.lane.b32.xlu0 %v6688_v60, %s6287_s8 }
 0x213   :  { %5654 = vrot.lane.b32.xlu1 %v6630_v35, %s6290_s1 }
 0x214   :  { %5664 = vrot.lane.b32.xlu0 %v6632_v36, %s6290_s1 }
 0x217   :  { %5669 = vrot.lane.b32.xlu1 %v6638_v53, %s6290_s1 }
 0x218   :  { %5674 = vrot.lane.b32.xlu0 %v6640_v56, %s6290_s1 }
 0x21b   :  { %5679 = vrot.lane.b32.xlu1 %v6646_v11, %s6290_s1 }
 0x21c   :  { %5684 = vrot.lane.b32.xlu0 %v6648_v14, %s6290_s1 }
 0x21f   :  { %5689 = vrot.lane.b32.xlu1 %v6654_v31, %s6290_s1 }
 0x220   :  { %5694 = vrot.lane.b32.xlu0 %v6656_v33, %s6290_s1 }
 0x223   :  { %5699 = vrot.lane.b32.xlu1 %v6662_v51, %s6290_s1 }
 0x224   :  { %5704 = vrot.lane.b32.xlu0 %v6664_v55, %s6290_s1 }
 0x227   :  { %5709 = vrot.lane.b32.xlu1 %v6670_v12, %s6290_s1 }
 0x228   :  { %5714 = vrot.lane.b32.xlu0 %v6672_v16, %s6290_s1 }
 0x229   :  { %v5500_v2 = vpop.permute.xlu1 %5499 }
 0x22a   :  { %v5502_v18 = vunpack.i.h.bf16 %v5500_v2  ;;  %v5501_v19 = vunpack.i.l.bf16 %v5500_v2  ;;  %v5505_v20 = vpop.permute.xlu0 %5504 }
 0x22b   :  { %v5507_v3 = vunpack.i.h.bf16 %v5505_v20  ;;  %v5506_v48 = vunpack.i.l.bf16 %v5505_v20  ;;  %5719 = vrot.lane.b32.xlu1 %v6678_v34, %s6290_s1 }
 0x22c   :  { %5724 = vrot.lane.b32.xlu0 %v6680_v38, %s6290_s1 }
 0x22d   :  { %v1040_v24 = vsel %vm421_vm4, %v5501_v19, %v5506_v48  ;;  %v1041_v25 = vsel %vm421_vm4, %v5502_v18, %v5507_v3  ;;  %v1056_v26 = vsel %vm421_vm4, %v5506_v48, %v5501_v19  ;;  %v1057_v27 = vsel %vm421_vm4, %v5507_v3, %v5502_v18  ;;  %v1809_v48 = vld [vmem:[%s8240_s9 + $0x8] sm:$0xff] }
 0x22e   :  { %v4817_v28 = vpack.c.bf16 %v1057_v27, %v1056_v26  ;;  %v4819_v29 = vpack.c.bf16 %v1041_v25, %v1040_v24 }
 0x22f   :  { %5729 = vrot.lane.b32.xlu1 %v6686_v58, %s6290_s1 }
 0x230   :  { %5734 = vrot.lane.b32.xlu0 %v6688_v60, %s6290_s1  ;;  %4818 = vmatprep.subr.bf16.mxu1 %v4817_v28 }
 0x231   :  { %v5510_v5 = vpop.permute.xlu1 %5509  ;;  %4820 = vmatpush1.bf16.msra.mxu1 %v4819_v29  ;;  %v1811_v29 = vld [vmem:[%s8240_s9 + $0x18] sm:$0xff] }
 0x232   :  { %v5512_v22 = vunpack.i.h.bf16 %v5510_v5  ;;  %v5511_v37 = vunpack.i.l.bf16 %v5510_v5  ;;  %v5515_v39 = vpop.permute.xlu0 %5514 }
 0x233   :  { %v5517_v40 = vunpack.i.h.bf16 %v5515_v39  ;;  %v5516_v41 = vunpack.i.l.bf16 %v5515_v39  ;;  %5739 = vrot.lane.b32.xlu1 %v6630_v35, %s6291_s30 }
 0x234   :  { %5744 = vrot.lane.b32.xlu0 %v6632_v36, %s6291_s30 }
 0x235   :  { %v1042_v43 = vsel %vm421_vm4, %v5511_v37, %v5516_v41  ;;  %v1043_v44 = vsel %vm421_vm4, %v5512_v22, %v5517_v40  ;;  %v1058_v45 = vsel %vm421_vm4, %v5516_v41, %v5511_v37  ;;  %v1059_v46 = vsel %vm421_vm4, %v5517_v40, %v5512_v22  ;;  %v1812_v37 = vld [vmem:[%s8240_s9 + $0x20] sm:$0xff]  ;;  %v1813_v40 = vld [vmem:[%s8240_s9 + $0x28] sm:$0xff] }
 0x236   :  { %v4821_v47 = vpack.c.bf16 %v1059_v46, %v1058_v45  ;;  %v4823_v49 = vpack.c.bf16 %v1043_v44, %v1042_v43 }
 0x237   :  { %5749 = vrot.lane.b32.xlu1 %v6638_v53, %s6291_s30 }
 0x238   :  { %5754 = vrot.lane.b32.xlu0 %v6640_v56, %s6291_s30  ;;  %4822 = vmatprep.subr.bf16.mxu1 %v4821_v47  ;;  %v1814_v47 = vld [vmem:[%s8240_s9 + $0x30] sm:$0xff] }
 0x239   :  { %v5520_v35 = vpop.permute.xlu1 %5519  ;;  %4824 = vmatpush1.bf16.msra.mxu1 %v4823_v49 }
 0x23a   :  { %v5522_v36 = vunpack.i.h.bf16 %v5520_v35  ;;  %v5521_v50 = vunpack.i.l.bf16 %v5520_v35  ;;  %v5525_v52 = vpop.permute.xlu0 %5524 }
 0x23b   :  { %v5527_v54 = vunpack.i.h.bf16 %v5525_v52  ;;  %v5526_v57 = vunpack.i.l.bf16 %v5525_v52  ;;  %5759 = vrot.lane.b32.xlu1 %v6646_v11, %s6291_s30 }
 0x23c   :  { %5764 = vrot.lane.b32.xlu0 %v6648_v14, %s6291_s30 }
 0x23d   :  { %v1044_v53 = vsel %vm421_vm4, %v5521_v50, %v5526_v57  ;;  %v1045_v56 = vsel %vm421_vm4, %v5522_v36, %v5527_v54  ;;  %v1060_v59 = vsel %vm421_vm4, %v5526_v57, %v5521_v50  ;;  %v1061_v61 = vsel %vm421_vm4, %v5527_v54, %v5522_v36  ;;  %v1815_v36 = vld [vmem:[%s8240_s9 + $0x38] sm:$0xff] }
 0x23e   :  { %v4825_v62 = vpack.c.bf16 %v1061_v61, %v1060_v59  ;;  %v4827_v63 = vpack.c.bf16 %v1045_v56, %v1044_v53  ;;  %v1816_v53 = vld [vmem:[%s8240_s9 + $0x40] sm:$0xff]  ;;  %v1817_v59 = vld [vmem:[%s8240_s9 + $0x48] sm:$0xff] }
 0x23f   :  { %5769 = vrot.lane.b32.xlu1 %v6654_v31, %s6291_s30 }
 0x240   :  { %5774 = vrot.lane.b32.xlu0 %v6656_v33, %s6291_s30  ;;  %4826 = vmatprep.subr.bf16.mxu1 %v4825_v62 }
 0x241   :  { %v5530_v11 = vpop.permute.xlu1 %5529  ;;  %4828 = vmatpush1.bf16.msra.mxu1 %v4827_v63 }
 0x242   :  { %v5532_v14 = vunpack.i.h.bf16 %v5530_v11  ;;  %v5531_v0 = vunpack.i.l.bf16 %v5530_v11  ;;  %v5535_v4 = vpop.permute.xlu0 %5534 }
 0x243   :  { %v5537_v6 = vunpack.i.h.bf16 %v5535_v4  ;;  %v5536_v7 = vunpack.i.l.bf16 %v5535_v4  ;;  %5779 = vrot.lane.b32.xlu1 %v6662_v51, %s6291_s30 }
 0x244   :  { %5784 = vrot.lane.b32.xlu0 %v6664_v55, %s6291_s30 }
 0x245   :  { %v1046_v31 = vsel %vm421_vm4, %v5531_v0, %v5536_v7  ;;  %v1047_v33 = vsel %vm421_vm4, %v5532_v14, %v5537_v6  ;;  %v1062_v8 = vsel %vm421_vm4, %v5536_v7, %v5531_v0  ;;  %v1063_v9 = vsel %vm421_vm4, %v5537_v6, %v5532_v14  ;;  %v1818_v0 = vld [vmem:[%s8240_s9 + $0x50] sm:$0xff] }
 0x246   :  { %v4829_v10 = vpack.c.bf16 %v1063_v9, %v1062_v8  ;;  %v4831_v13 = vpack.c.bf16 %v1047_v33, %v1046_v31  ;;  %v1819_v31 = vld [vmem:[%s8240_s9 + $0x58] sm:$0xff] }
 0x247   :  { %5789 = vrot.lane.b32.xlu1 %v6670_v12, %s6291_s30 }
 0x248   :  { %5794 = vrot.lane.b32.xlu0 %v6672_v16, %s6291_s30  ;;  %4830 = vmatprep.subr.bf16.mxu1 %v4829_v10 }
 0x249   :  { %v5540_v51 = vpop.permute.xlu1 %5539  ;;  %4832 = vmatpush1.bf16.msra.mxu1 %v4831_v13 }
 0x24a   :  { %v5542_v55 = vunpack.i.h.bf16 %v5540_v51  ;;  %v5541_v2 = vunpack.i.l.bf16 %v5540_v51  ;;  %v5545_v15 = vpop.permute.xlu0 %5544 }
 0x24b   :  { %v5547_v17 = vunpack.i.h.bf16 %v5545_v15  ;;  %v5546_v18 = vunpack.i.l.bf16 %v5545_v15  ;;  %5799 = vrot.lane.b32.xlu1 %v6678_v34, %s6291_s30  ;;  %v1808_v34 = vld [vmem:[%s8240_s9] sm:$0xff] }
 0x24c   :  { %5804 = vrot.lane.b32.xlu0 %v6680_v38, %s6291_s30 }
 0x24d   :  { %v1048_v12 = vsel %vm421_vm4, %v5541_v2, %v5546_v18  ;;  %v1049_v16 = vsel %vm421_vm4, %v5542_v55, %v5547_v17  ;;  %v1064_v19 = vsel %vm421_vm4, %v5546_v18, %v5541_v2  ;;  %v1065_v20 = vsel %vm421_vm4, %v5547_v17, %v5542_v55  ;;  %v1820_v17 = vld [vmem:[%s8240_s9 + $0x60] sm:$0xff] }
 0x24e   :  { %v4833_v1 = vpack.c.bf16 %v1065_v20, %v1064_v19  ;;  %v4835_v3 = vpack.c.bf16 %v1049_v16, %v1048_v12  ;;  %v1821_v19 = vld [vmem:[%s8240_s9 + $0x68] sm:$0xff]  ;;  %v1488_v20 = vld [vmem:[#allocation10] sm:$0xff] }
 0x24f   :  { %5809 = vrot.lane.b32.xlu1 %v6686_v58, %s6291_s30  ;;  %v1810_v58 = vld [vmem:[%s8240_s9 + $0x10] sm:$0xff] }
 0x250   :  { %5814 = vrot.lane.b32.xlu0 %v6688_v60, %s6291_s30  ;;  %4834 = vmatprep.subr.bf16.mxu1 %v4833_v1 }
 0x251   :  { %v5550_v38 = vpop.permute.xlu1 %5549  ;;  %4836 = vmatpush1.bf16.msra.mxu1 %v4835_v3 }
 0x252   :  { %v5552_v23 = vunpack.i.h.bf16 %v5550_v38  ;;  %v5551_v24 = vunpack.i.l.bf16 %v5550_v38  ;;  %v5555_v25 = vpop.permute.xlu0 %5554 }
 0x253   :  { %v5557_v26 = vunpack.i.h.bf16 %v5555_v25  ;;  %v5556_v27 = vunpack.i.l.bf16 %v5555_v25  ;;  %1842 = vperm.xlu1 %5497, %v1808_v34   ;;  %v1494_v25 = vld [vmem:[#allocation10 + $0x30] sm:$0xff] }
 0x254   :  { %1847 = vperm.xlu0 %5496, %v1809_v48  }
 0x255   :  { %v1050_v60 = vsel %vm421_vm4, %v5551_v24, %v5556_v27  ;;  %v1051_v28 = vsel %vm421_vm4, %v5552_v23, %v5557_v26  ;;  %v1066_v30 = vsel %vm421_vm4, %v5556_v27, %v5551_v24  ;;  %v1067_v32 = vsel %vm421_vm4, %v5557_v26, %v5552_v23 }
 0x256   :  { %v4837_v5 = vpack.c.bf16 %v1067_v32, %v1066_v30  ;;  %v4839_v22 = vpack.c.bf16 %v1051_v28, %v1050_v60  ;;  %v1823_v30 = vld [vmem:[%s8240_s9 + $0x78] sm:$0xff] }
 0x257   :  { %1852 = vperm.xlu1 %5497, %v1810_v58   ;;  %v1822_v58 = vld [vmem:[%s8240_s9 + $0x70] sm:$0xff]  ;;  %v1493_v32 = vld [vmem:[#allocation10 + $0x28] sm:$0xff] }
 0x258   :  { %1857 = vperm.xlu0 %5496, %v1811_v29   ;;  %4838 = vmatprep.subr.bf16.mxu1 %v4837_v5 }
 0x259   :  { %v5560_v39 = vpop.permute.xlu1 %5559  ;;  %4840 = vmatpush1.bf16.msra.mxu1 %v4839_v22 }
 0x25a   :  { %v5562_v41 = vunpack.i.h.bf16 %v5560_v39  ;;  %v5561_v43 = vunpack.i.l.bf16 %v5560_v39  ;;  %v5565_v44 = vpop.permute.xlu0 %5564 }
 0x25b   :  { %v5567_v45 = vunpack.i.h.bf16 %v5565_v44  ;;  %v5566_v46 = vunpack.i.l.bf16 %v5565_v44  ;;  %1862 = vperm.xlu1 %5497, %v1812_v37  }
 0x25c   :  { %1867 = vperm.xlu0 %5496, %v1813_v40  }
 0x25d   :  { %v1052_v49 = vsel %vm421_vm4, %v5561_v43, %v5566_v46  ;;  %v1053_v35 = vsel %vm421_vm4, %v5562_v41, %v5567_v45  ;;  %v1068_v50 = vsel %vm421_vm4, %v5566_v46, %v5561_v43  ;;  %v1069_v52 = vsel %vm421_vm4, %v5567_v45, %v5562_v41  ;;  %v1499_v43 = vld [vmem:[#allocation10 + $0x58] sm:$0xff] }
 0x25e   :  { %v4841_v54 = vpack.c.bf16 %v1069_v52, %v1068_v50  ;;  %v4843_v57 = vpack.c.bf16 %v1053_v35, %v1052_v49  ;;  %v1825_v50 = vld [vmem:[%s8240_s9 + $0x88] sm:$0xff]  ;;  %v1498_v52 = vld [vmem:[#allocation10 + $0x50] sm:$0xff] }
 0x25f   :  { %1872 = vperm.xlu1 %5497, %v1814_v47   ;;  %v1824_v47 = vld [vmem:[%s8240_s9 + $0x80] sm:$0xff] }
 0x260   :  { %1877 = vperm.xlu0 %5496, %v1815_v36   ;;  %4842 = vmatprep.subr.bf16.mxu1 %v4841_v54 }
 0x261   :  { %v5570_v56 = vpop.permute.xlu1 %5569  ;;  %4844 = vmatpush1.bf16.msra.mxu1 %v4843_v57 }
 0x262   :  { %v5572_v61 = vunpack.i.h.bf16 %v5570_v56  ;;  %v5571_v62 = vunpack.i.l.bf16 %v5570_v56  ;;  %v5575_v63 = vpop.permute.xlu0 %5574 }
 0x263   :  { %v5577_v11 = vunpack.i.h.bf16 %v5575_v63  ;;  %v5576_v14 = vunpack.i.l.bf16 %v5575_v63  ;;  %1882 = vperm.xlu1 %5497, %v1816_v53  }
 0x264   :  { %1887 = vperm.xlu0 %5496, %v1817_v59  }
 0x265   :  { %v1054_v4 = vsel %vm421_vm4, %v5571_v62, %v5576_v14  ;;  %v1055_v6 = vsel %vm421_vm4, %v5572_v61, %v5577_v11  ;;  %v5580_v7 = vpop.permute.xlu1 %5579  ;;  %v1070_v33 = vsel %vm421_vm4, %v5576_v14, %v5571_v62  ;;  %v1071_v8 = vsel %vm421_vm4, %v5577_v11, %v5572_v61  ;;  %v1504_v62 = vld [vmem:[#allocation10 + $0x80] sm:$0xff] }
 0x266   :  { %v5582_v9 = vunpack.i.h.bf16 %v5580_v7  ;;  %v5581_v10 = vunpack.i.l.bf16 %v5580_v7  ;;  %v5585_v13 = vpop.permute.xlu0 %5584  ;;  %v4845_v51 = vpack.c.bf16 %v1071_v8, %v1070_v33  ;;  %v4847_v55 = vpack.c.bf16 %v1055_v6, %v1054_v4  ;;  %v1503_v33 = vld [vmem:[#allocation10 + $0x78] sm:$0xff] }
 0x267   :  { %v5587_v2 = vunpack.i.h.bf16 %v5585_v13  ;;  %v5586_v15 = vunpack.i.l.bf16 %v5585_v13  ;;  %1892 = vperm.xlu1 %5497, %v1818_v0   ;;  %v1826_v0 = vld [vmem:[%s8240_s9 + $0x90] sm:$0xff] }
 0x268   :  { %1897 = vperm.xlu0 %5496, %v1819_v31   ;;  %4846 = vmatprep.subr.bf16.mxu1 %v4845_v51  ;;  %v1827_v31 = vld [vmem:[%s8240_s9 + $0x98] sm:$0xff] }
 0x269   :  { %v1168_v18 = vsel %vm449_vm3, %v5581_v10, %v5586_v15  ;;  %v1169_v12 = vsel %vm449_vm3, %v5582_v9, %v5587_v2  ;;  %v5590_v16 = vpop.permute.xlu1 %5589  ;;  %4848 = vmatpush1.bf16.msra.mxu1 %v4847_v55  ;;  %v1184_v1 = vsel %vm449_vm3, %v5586_v15, %v5581_v10  ;;  %v1185_v3 = vsel %vm449_vm3, %v5587_v2, %v5582_v9  ;;  %v1509_v2 = vld [vmem:[#allocation10 + $0xa8] sm:$0xff] }
 0x26a   :  { %v5592_v34 = vunpack.i.h.bf16 %v5590_v16  ;;  %v5591_v38 = vunpack.i.l.bf16 %v5590_v16  ;;  %v5595_v48 = vpop.permute.xlu0 %5594  ;;  %v4849_v23 = vpack.c.bf16 %v1185_v3, %v1184_v1  ;;  %v4851_v24 = vpack.c.bf16 %v1169_v12, %v1168_v18  ;;  %v1828_v12 = vld [vmem:[%s8240_s9 + $0xa0] sm:$0xff]  ;;  %v1829_v1 = vld [vmem:[%s8240_s9 + $0xa8] sm:$0xff]  ;;  %v1508_v3 = vld [vmem:[#allocation10 + $0xa0] sm:$0xff] }
 0x26b   :  { %v5597_v26 = vunpack.i.h.bf16 %v5595_v48  ;;  %v5596_v27 = vunpack.i.l.bf16 %v5595_v48  ;;  %1902 = vperm.xlu1 %5497, %v1820_v17  }
 0x26c   :  { %1907 = vperm.xlu0 %5496, %v1821_v19   ;;  %2065 = vmatmul.mubr.f32.vlgmr.msra.gmra.mrb[34].mxu1 %v1488_v20 }
 0x26d   :  { %v1170_v60 = vsel %vm449_vm3, %v5591_v38, %v5596_v27  ;;  %v1171_v28 = vsel %vm449_vm3, %v5592_v34, %v5597_v26  ;;  %4850 = vmatprep.subr.bf16.mxu1 %v4849_v23  ;;  %v5600_v29 = vpop.permute.xlu1 %5599  ;;  %2070 = vmatprep.mubr.f32.mxu1 %v1494_v25  ;;  %v1186_v5 = vsel %vm449_vm3, %v5596_v27, %v5591_v38 }
 0x26e   :  { %v5602_v22 = vunpack.i.h.bf16 %v5600_v29  ;;  %v5601_v37 = vunpack.i.l.bf16 %v5600_v29  ;;  %4852 = vmatpush1.bf16.msra.mxu1 %v4851_v24  ;;  %v5605_v39 = vpop.permute.xlu0 %5604  ;;  %v1187_v40 = vsel %vm449_vm3, %v5597_v26, %v5592_v34  ;;  %v4855_v41 = vpack.c.bf16 %v1171_v28, %v1170_v60  ;;  %v1514_v26 = vld [vmem:[#allocation10 + $0xd0] sm:$0xff]  ;;  %v1830_v28 = vld [vmem:[%s8240_s9 + $0xb0] sm:$0xff] }
 0x26f   :  { %v5607_v44 = vunpack.i.h.bf16 %v5605_v39  ;;  %v5606_v45 = vunpack.i.l.bf16 %v5605_v39  ;;  %1912 = vperm.xlu1 %5497, %v1822_v58   ;;  %v4853_v46 = vpack.c.bf16 %v1187_v40, %v1186_v5  ;;  %v1831_v5 = vld [vmem:[%s8240_s9 + $0xb8] sm:$0xff] }
 0x270   :  { %1917 = vperm.xlu0 %5496, %v1823_v30   ;;  %2071 = vmatmul.mubr.f32.gmra.mrb[36].mxu1 %v1493_v32 }
 0x271   :  { %v1172_v49 = vsel %vm449_vm3, %v5601_v37, %v5606_v45  ;;  %v1173_v35 = vsel %vm449_vm3, %v5602_v22, %v5607_v44  ;;  %4854 = vmatprep.subr.bf16.mxu1 %v4853_v46  ;;  %v5610_v36 = vpop.permute.xlu1 %5609  ;;  %2076 = vmatprep.mubr.f32.mxu1 %v1499_v43  ;;  %v1188_v54 = vsel %vm449_vm3, %v5606_v45, %v5601_v37  ;;  %v1519_v45 = vld [vmem:[#allocation10 + $0xf8] sm:$0xff] }
 0x272   :  { %v5612_v57 = vunpack.i.h.bf16 %v5610_v36  ;;  %v5611_v53 = vunpack.i.l.bf16 %v5610_v36  ;;  %4856 = vmatpush1.bf16.msra.mxu1 %v4855_v41  ;;  %v5615_v56 = vpop.permute.xlu0 %5614  ;;  %v1189_v59 = vsel %vm449_vm3, %v5607_v44, %v5602_v22  ;;  %v4859_v61 = vpack.c.bf16 %v1173_v35, %v1172_v49  ;;  %v1513_v22 = vld [vmem:[#allocation10 + $0xc8] sm:$0xff]  ;;  %v1832_v35 = vld [vmem:[%s8240_s9 + $0xc0] sm:$0xff] }
 0x273   :  { %v5617_v63 = vunpack.i.h.bf16 %v5615_v56  ;;  %v5616_v11 = vunpack.i.l.bf16 %v5615_v56  ;;  %1922 = vperm.xlu1 %5497, %v1824_v47   ;;  %v4857_v14 = vpack.c.bf16 %v1189_v59, %v1188_v54  ;;  %v1833_v54 = vld [vmem:[%s8240_s9 + $0xc8] sm:$0xff] }
 0x274   :  { %1927 = vperm.xlu0 %5496, %v1825_v50   ;;  %2077 = vmatmul.mubr.f32.gmra.mrb[38].mxu1 %v1498_v52 }
 0x275   :  { %v1174_v4 = vsel %vm449_vm3, %v5611_v53, %v5616_v11  ;;  %v1175_v6 = vsel %vm449_vm3, %v5612_v57, %v5617_v63  ;;  %4858 = vmatprep.subr.bf16.mxu1 %v4857_v14  ;;  %v5620_v7 = vpop.permute.xlu1 %5619  ;;  %2082 = vmatprep.mubr.f32.mxu1 %v1504_v62  ;;  %v1190_v8 = vsel %vm449_vm3, %v5616_v11, %v5611_v53  ;;  %v1524_v11 = vld [vmem:[#allocation10 + $0x120] sm:$0xff] }
 0x276   :  { %v5622_v9 = vunpack.i.h.bf16 %v5620_v7  ;;  %v5621_v10 = vunpack.i.l.bf16 %v5620_v7  ;;  %4860 = vmatpush1.bf16.msra.mxu1 %v4859_v61  ;;  %v5625_v13 = vpop.permute.xlu0 %5624  ;;  %v1191_v51 = vsel %vm449_vm3, %v5617_v63, %v5612_v57  ;;  %v4863_v55 = vpack.c.bf16 %v1175_v6, %v1174_v4  ;;  %v1518_v57 = vld [vmem:[#allocation10 + $0xf0] sm:$0xff]  ;;  %v1834_v6 = vld [vmem:[%s8240_s9 + $0xd0] sm:$0xff] }
 0x277   :  { %v5627_v15 = vunpack.i.h.bf16 %v5625_v13  ;;  %v5626_v17 = vunpack.i.l.bf16 %v5625_v13  ;;  %1932 = vperm.xlu1 %5497, %v1826_v0   ;;  %v4861_v18 = vpack.c.bf16 %v1191_v51, %v1190_v8  ;;  %v1835_v8 = vld [vmem:[%s8240_s9 + $0xd8] sm:$0xff] }
 0x278   :  { %1937 = vperm.xlu0 %5496, %v1827_v31   ;;  %2083 = vmatmul.mubr.f32.gmra.mrb[40].mxu1 %v1503_v33 }
 0x279   :  { %v1176_v16 = vsel %vm449_vm3, %v5621_v10, %v5626_v17  ;;  %v1177_v19 = vsel %vm449_vm3, %v5622_v9, %v5627_v15  ;;  %4862 = vmatprep.subr.bf16.mxu1 %v4861_v18  ;;  %v5630_v20 = vpop.permute.xlu1 %5629  ;;  %2088 = vmatprep.mubr.f32.mxu1 %v1509_v2  ;;  %v1192_v34 = vsel %vm449_vm3, %v5626_v17, %v5621_v10  ;;  %v1529_v17 = vld [vmem:[#allocation10 + $0x148] sm:$0xff] }
 0x27a   :  { %v5632_v38 = vunpack.i.h.bf16 %v5630_v20  ;;  %v5631_v48 = vunpack.i.l.bf16 %v5630_v20  ;;  %4864 = vmatpush1.bf16.msra.mxu1 %v4863_v55  ;;  %v5635_v23 = vpop.permute.xlu0 %5634  ;;  %v1193_v24 = vsel %vm449_vm3, %v5627_v15, %v5622_v9  ;;  %v4867_v25 = vpack.c.bf16 %v1177_v19, %v1176_v16  ;;  %v1523_v9 = vld [vmem:[#allocation10 + $0x118] sm:$0xff]  ;;  %v1836_v19 = vld [vmem:[%s8240_s9 + $0xe0] sm:$0xff] }
 0x27b   :  { %v5637_v27 = vunpack.i.h.bf16 %v5635_v23  ;;  %v5636_v58 = vunpack.i.l.bf16 %v5635_v23  ;;  %1942 = vperm.xlu1 %5497, %v1828_v12   ;;  %v4865_v60 = vpack.c.bf16 %v1193_v24, %v1192_v34  ;;  %v1837_v34 = vld [vmem:[%s8240_s9 + $0xe8] sm:$0xff] }
 0x27c   :  { %1947 = vperm.xlu0 %5496, %v1829_v1   ;;  %2089 = vmatmul.mubr.f32.gmra.mrb[42].mxu1 %v1508_v3 }
 0x27d   :  { %v1178_v29 = vsel %vm449_vm3, %v5631_v48, %v5636_v58  ;;  %v1179_v30 = vsel %vm449_vm3, %v5632_v38, %v5637_v27  ;;  %4866 = vmatprep.subr.bf16.mxu1 %v4865_v60  ;;  %v5640_v32 = vpop.permute.xlu1 %5639  ;;  %2094 = vmatprep.mubr.f32.mxu1 %v1514_v26  ;;  %v1194_v37 = vsel %vm449_vm3, %v5636_v58, %v5631_v48  ;;  %v1534_v58 = vld [vmem:[#allocation10 + $0x170] sm:$0xff] }
 0x27e   :  { %v5642_v39 = vunpack.i.h.bf16 %v5640_v32  ;;  %v5641_v40 = vunpack.i.l.bf16 %v5640_v32  ;;  %4868 = vmatpush1.bf16.msra.mxu1 %v4867_v25  ;;  %v5645_v41 = vpop.permute.xlu0 %5644  ;;  %v1195_v43 = vsel %vm449_vm3, %v5637_v27, %v5632_v38  ;;  %v4871_v44 = vpack.c.bf16 %v1179_v30, %v1178_v29  ;;  %v1528_v38 = vld [vmem:[#allocation10 + $0x140] sm:$0xff] }
 0x27f   :  { %v5647_v46 = vunpack.i.h.bf16 %v5645_v41  ;;  %v5646_v47 = vunpack.i.l.bf16 %v5645_v41  ;;  %1952 = vperm.xlu1 %5497, %v1830_v28   ;;  %v4869_v49 = vpack.c.bf16 %v1195_v43, %v1194_v37  ;;  %v1838_v30 = vld [vmem:[%s8240_s9 + $0xf0] sm:$0xff]  ;;  %v1839_v37 = vld [vmem:[%s8240_s9 + $0xf8] sm:$0xff] }
 0x280   :  { %1957 = vperm.xlu0 %5496, %v1831_v5   ;;  %2095 = vmatmul.mubr.f32.gmra.mrb[44].mxu1 %v1513_v22 }
 0x281   :  { %v1180_v36 = vsel %vm449_vm3, %v5641_v40, %v5646_v47  ;;  %v1181_v50 = vsel %vm449_vm3, %v5642_v39, %v5647_v46  ;;  %4870 = vmatprep.subr.bf16.mxu1 %v4869_v49  ;;  %v5650_v52 = vpop.permute.xlu1 %5649  ;;  %2100 = vmatprep.mubr.f32.mxu1 %v1519_v45  ;;  %v1196_v53 = vsel %vm449_vm3, %v5646_v47, %v5641_v40  ;;  %v1539_v47 = vld [vmem:[#allocation10 + $0x198] sm:$0xff] }
 0x282   :  { %v5652_v56 = vunpack.i.h.bf16 %v5650_v52  ;;  %v5651_v59 = vunpack.i.l.bf16 %v5650_v52  ;;  %4872 = vmatpush1.bf16.msra.mxu1 %v4871_v44  ;;  %v5660_v61 = vpop.permute.xlu0 %5659  ;;  %v1197_v62 = vsel %vm449_vm3, %v5647_v46, %v5642_v39  ;;  %v4875_v63 = vpack.c.bf16 %v1181_v50, %v1180_v36  ;;  %v1533_v39 = vld [vmem:[#allocation10 + $0x168] sm:$0xff] }
 0x283   :  { %v5662_v14 = vunpack.i.h.bf16 %v5660_v61  ;;  %v5661_v0 = vunpack.i.l.bf16 %v5660_v61  ;;  %1962 = vperm.xlu1 %5497, %v1832_v35   ;;  %v4873_v4 = vpack.c.bf16 %v1197_v62, %v1196_v53 }
 0x284   :  { %1967 = vperm.xlu0 %5496, %v1833_v54   ;;  %2101 = vmatmul.mubr.f32.gmra.mrb[46].mxu1 %v1518_v57  ;;  %v1538_v57 = vld [vmem:[#allocation10 + $0x190] sm:$0xff] }
 0x285   :  { %v1182_v7 = vsel %vm449_vm3, %v5651_v59, %v5661_v0  ;;  %v1183_v31 = vsel %vm449_vm3, %v5652_v56, %v5662_v14  ;;  %4874 = vmatprep.subr.bf16.mxu1 %v4873_v4  ;;  %v5655_v33 = vpop.permute.xlu1 %5654  ;;  %2106 = vmatprep.mubr.f32.mxu1 %v1524_v11  ;;  %v1198_v10 = vsel %vm449_vm3, %v5661_v0, %v5651_v59  ;;  %v1544_v11 = vld [vmem:[#allocation10 + $0x1c0] sm:$0xff] }
 0x286   :  { %v5657_v13 = vunpack.i.h.bf16 %v5655_v33  ;;  %v5656_v51 = vunpack.i.l.bf16 %v5655_v33  ;;  %4876 = vmatpush1.bf16.msra.mxu1 %v4875_v63  ;;  %v5665_v55 = vpop.permute.xlu0 %5664  ;;  %v1199_v2 = vsel %vm449_vm3, %v5662_v14, %v5652_v56  ;;  %v4879_v15 = vpack.c.bf16 %v1183_v31, %v1182_v7  ;;  %v1543_v33 = vld [vmem:[#allocation10 + $0x1b8] sm:$0xff] }
 0x287   :  { %v5667_v18 = vunpack.i.h.bf16 %v5665_v55  ;;  %v5666_v12 = vunpack.i.l.bf16 %v5665_v55  ;;  %1972 = vperm.xlu1 %5497, %v1834_v6   ;;  %v4877_v16 = vpack.c.bf16 %v1199_v2, %v1198_v10  ;;  %v1549_v2 = vld [vmem:[#allocation10 + $0x1e8] sm:$0xff] }
 0x288   :  { %1977 = vperm.xlu0 %5496, %v1835_v8   ;;  %2107 = vmatmul.mubr.f32.gmra.mrb[48].mxu1 %v1523_v9 }
 0x289   :  { %v1296_v20 = vsel %vm477_vm5, %v5656_v51, %v5666_v12  ;;  %v1297_v1 = vsel %vm477_vm5, %v5657_v13, %v5667_v18  ;;  %4878 = vmatprep.subr.bf16.mxu1 %v4877_v16  ;;  %v5670_v3 = vpop.permute.xlu1 %5669  ;;  %2112 = vmatprep.mubr.f32.mxu1 %v1529_v17  ;;  %v1312_v48 = vsel %vm477_vm5, %v5666_v12, %v5656_v51 }
 0x28a   :  { %v5672_v23 = vunpack.i.h.bf16 %v5670_v3  ;;  %v5671_v24 = vunpack.i.l.bf16 %v5670_v3  ;;  %4880 = vmatpush1.bf16.msra.mxu1 %v4879_v15  ;;  %v5675_v25 = vpop.permute.xlu0 %5674  ;;  %v1313_v26 = vsel %vm477_vm5, %v5667_v18, %v5657_v13  ;;  %v4883_v27 = vpack.c.bf16 %v1297_v1, %v1296_v20  ;;  %v1548_v20 = vld [vmem:[#allocation10 + $0x1e0] sm:$0xff] }
 0x28b   :  { %v5677_v60 = vunpack.i.h.bf16 %v5675_v25  ;;  %v5676_v28 = vunpack.i.l.bf16 %v5675_v25  ;;  %1982 = vperm.xlu1 %5497, %v1836_v19   ;;  %v4881_v29 = vpack.c.bf16 %v1313_v26, %v1312_v48 }
 0x28c   :  { %1987 = vperm.xlu0 %5496, %v1837_v34   ;;  %2113 = vmatmul.mubr.f32.gmra.mrb[50].mxu1 %v1528_v38 }
 0x28d   :  { %v1298_v32 = vsel %vm477_vm5, %v5671_v24, %v5676_v28  ;;  %v1299_v5 = vsel %vm477_vm5, %v5672_v23, %v5677_v60  ;;  %4882 = vmatprep.subr.bf16.mxu1 %v4881_v29  ;;  %v5680_v22 = vpop.permute.xlu1 %5679  ;;  %2118 = vmatprep.mubr.f32.mxu1 %v1534_v58  ;;  %v1314_v40 = vsel %vm477_vm5, %v5676_v28, %v5671_v24  ;;  %v1554_v24 = vld [vmem:[#allocation10 + $0x210] sm:$0xff]  ;;  %v1553_v29 = vld [vmem:[#allocation10 + $0x208] sm:$0xff] }
 0x28e   :  { %v5682_v41 = vunpack.i.h.bf16 %v5680_v22  ;;  %v5681_v43 = vunpack.i.l.bf16 %v5680_v22  ;;  %4884 = vmatpush1.bf16.msra.mxu1 %v4883_v27  ;;  %v5685_v44 = vpop.permute.xlu0 %5684  ;;  %v1315_v45 = vsel %vm477_vm5, %v5677_v60, %v5672_v23  ;;  %v4887_v46 = vpack.c.bf16 %v1299_v5, %v1298_v32 }
 0x28f   :  { %v5687_v49 = vunpack.i.h.bf16 %v5685_v44  ;;  %v5686_v35 = vunpack.i.l.bf16 %v5685_v44  ;;  %1992 = vperm.xlu1 %5497, %v1838_v30   ;;  %v4885_v36 = vpack.c.bf16 %v1315_v45, %v1314_v40  ;;  %v1559_v40 = vld [vmem:[#allocation10 + $0x238] sm:$0xff] }
 0x290   :  { %1997 = vperm.xlu0 %5496, %v1839_v37   ;;  %2119 = vmatmul.mubr.f32.gmra.mrb[52].mxu1 %v1533_v39 }
 0x291   :  { %v1300_v50 = vsel %vm477_vm5, %v5681_v43, %v5686_v35  ;;  %v1301_v52 = vsel %vm477_vm5, %v5682_v41, %v5687_v49  ;;  %4886 = vmatprep.subr.bf16.mxu1 %v4885_v36  ;;  %v5690_v54 = vpop.permute.xlu1 %5689  ;;  %2124 = vmatprep.mubr.f32.mxu1 %v1539_v47  ;;  %v1316_v53 = vsel %vm477_vm5, %v5686_v35, %v5681_v43 }
 0x292   :  { %v5692_v56 = vunpack.i.h.bf16 %v5690_v54  ;;  %v5691_v59 = vunpack.i.l.bf16 %v5690_v54  ;;  %4888 = vmatpush1.bf16.msra.mxu1 %v4887_v46  ;;  %v5695_v61 = vpop.permute.xlu0 %5694  ;;  %v1317_v62 = vsel %vm477_vm5, %v5687_v49, %v5682_v41  ;;  %v4891_v63 = vpack.c.bf16 %v1301_v52, %v1300_v50  ;;  %v1558_v49 = vld [vmem:[#allocation10 + $0x230] sm:$0xff] }
 0x293   :  { %v5697_v14 = vunpack.i.h.bf16 %v5695_v61  ;;  %v5696_v0 = vunpack.i.l.bf16 %v5695_v61  ;;  %v4889_v4 = vpack.c.bf16 %v1317_v62, %v1316_v53  ;;  %v1564_v53 = vld [vmem:[#allocation10 + $0x260] sm:$0xff] }
 0x294   :  { %2125 = vmatmul.mubr.f32.gmra.mrb[54].mxu1 %v1538_v57 }
 0x295   :  { %v1302_v6 = vsel %vm477_vm5, %v5691_v59, %v5696_v0  ;;  %v1303_v7 = vsel %vm477_vm5, %v5692_v56, %v5697_v14  ;;  %4890 = vmatprep.subr.bf16.mxu1 %v4889_v4  ;;  %v5700_v31 = vpop.permute.xlu1 %5699  ;;  %2130 = vmatprep.mubr.f32.mxu1 %v1544_v11  ;;  %v1318_v8 = vsel %vm477_vm5, %v5696_v0, %v5691_v59 }
 0x296   :  { %v5702_v9 = vunpack.i.h.bf16 %v5700_v31  ;;  %v5701_v10 = vunpack.i.l.bf16 %v5700_v31  ;;  %4892 = vmatpush1.bf16.msra.mxu1 %v4891_v63  ;;  %v5705_v13 = vpop.permute.xlu0 %5704  ;;  %v1319_v51 = vsel %vm477_vm5, %v5697_v14, %v5692_v56  ;;  %v4895_v55 = vpack.c.bf16 %v1303_v7, %v1302_v6  ;;  %v1563_v14 = vld [vmem:[#allocation10 + $0x258] sm:$0xff] }
 0x297   :  { %v5707_v15 = vunpack.i.h.bf16 %v5705_v13  ;;  %v5706_v17 = vunpack.i.l.bf16 %v5705_v13  ;;  %v4893_v18 = vpack.c.bf16 %v1319_v51, %v1318_v8  ;;  %v1569_v8 = vld [vmem:[#allocation10 + $0x288] sm:$0xff] }
 0x298   :  { %2131 = vmatmul.mubr.f32.gmra.mrb[56].mxu1 %v1543_v33 }
 0x299   :  { %v1304_v12 = vsel %vm477_vm5, %v5701_v10, %v5706_v17  ;;  %v1305_v16 = vsel %vm477_vm5, %v5702_v9, %v5707_v15  ;;  %4894 = vmatprep.subr.bf16.mxu1 %v4893_v18  ;;  %v5710_v19 = vpop.permute.xlu1 %5709  ;;  %2136 = vmatprep.mubr.f32.mxu1 %v1549_v2  ;;  %v1320_v1 = vsel %vm477_vm5, %v5706_v17, %v5701_v10 }
 0x29a   :  { %v5712_v3 = vunpack.i.h.bf16 %v5710_v19  ;;  %v5711_v34 = vunpack.i.l.bf16 %v5710_v19  ;;  %4896 = vmatpush1.bf16.msra.mxu1 %v4895_v55  ;;  %v5715_v38 = vpop.permute.xlu0 %5714  ;;  %v1321_v48 = vsel %vm477_vm5, %v5707_v15, %v5702_v9  ;;  %v4899_v23 = vpack.c.bf16 %v1305_v16, %v1304_v12  ;;  %v1568_v15 = vld [vmem:[#allocation10 + $0x280] sm:$0xff] }
 0x29b   :  { %v5717_v25 = vunpack.i.h.bf16 %v5715_v38  ;;  %v5716_v26 = vunpack.i.l.bf16 %v5715_v38  ;;  %v4897_v27 = vpack.c.bf16 %v1321_v48, %v1320_v1  ;;  %v1574_v38 = vld [vmem:[#allocation10 + $0x2b0] sm:$0xff] }
 0x29c   :  { %2137 = vmatmul.mubr.f32.gmra.mrb[58].mxu1 %v1548_v20 }
 0x29d   :  { %v1306_v58 = vsel %vm477_vm5, %v5711_v34, %v5716_v26  ;;  %v1307_v60 = vsel %vm477_vm5, %v5712_v3, %v5717_v25  ;;  %4898 = vmatprep.subr.bf16.mxu1 %v4897_v27  ;;  %v5720_v28 = vpop.permute.xlu1 %5719  ;;  %2142 = vmatprep.mubr.f32.mxu1 %v1554_v24  ;;  %v1322_v30 = vsel %vm477_vm5, %v5716_v26, %v5711_v34 }
 0x29e   :  { %v5722_v32 = vunpack.i.h.bf16 %v5720_v28  ;;  %v5721_v5 = vunpack.i.l.bf16 %v5720_v28  ;;  %4900 = vmatpush1.bf16.msra.mxu1 %v4899_v23  ;;  %v5725_v22 = vpop.permute.xlu0 %5724  ;;  %v1323_v37 = vsel %vm477_vm5, %v5717_v25, %v5712_v3  ;;  %v4903_v39 = vpack.c.bf16 %v1307_v60, %v1306_v58  ;;  %v1573_v25 = vld [vmem:[#allocation10 + $0x2a8] sm:$0xff] }
 0x29f   :  { %v5727_v41 = vunpack.i.h.bf16 %v5725_v22  ;;  %v5726_v43 = vunpack.i.l.bf16 %v5725_v22  ;;  %v4901_v44 = vpack.c.bf16 %v1323_v37, %v1322_v30  ;;  %v1579_v30 = vld [vmem:[#allocation10 + $0x2d8] sm:$0xff] }
 0x2a0   :  { %2143 = vmatmul.mubr.f32.gmra.mrb[60].mxu1 %v1553_v29 }
 0x2a1   :  { %v1308_v45 = vsel %vm477_vm5, %v5721_v5, %v5726_v43  ;;  %v1309_v46 = vsel %vm477_vm5, %v5722_v32, %v5727_v41  ;;  %4902 = vmatprep.subr.bf16.mxu1 %v4901_v44  ;;  %v5730_v47 = vpop.permute.xlu1 %5729  ;;  %2148 = vmatprep.mubr.f32.mxu1 %v1559_v40  ;;  %v1324_v35 = vsel %vm477_vm5, %v5726_v43, %v5721_v5 }
 0x2a2   :  { %v5732_v36 = vunpack.i.h.bf16 %v5730_v47  ;;  %v5731_v50 = vunpack.i.l.bf16 %v5730_v47  ;;  %4904 = vmatpush1.bf16.msra.mxu1 %v4903_v39  ;;  %v5735_v52 = vpop.permute.xlu0 %5734  ;;  %v1325_v54 = vsel %vm477_vm5, %v5727_v41, %v5722_v32  ;;  %v4907_v57 = vpack.c.bf16 %v1309_v46, %v1308_v45  ;;  %v1578_v41 = vld [vmem:[#allocation10 + $0x2d0] sm:$0xff] }
 0x2a3   :  { %v5737_v56 = vunpack.i.h.bf16 %v5735_v52  ;;  %v5736_v59 = vunpack.i.l.bf16 %v5735_v52  ;;  %v4905_v61 = vpack.c.bf16 %v1325_v54, %v1324_v35  ;;  %v1584_v35 = vld [vmem:[#allocation10 + $0x300] sm:$0xff] }
 0x2a4   :  { %2149 = vmatmul.mubr.f32.gmra.mrb[62].mxu1 %v1558_v49 }
 0x2a5   :  { %v1310_v62 = vsel %vm477_vm5, %v5731_v50, %v5736_v59  ;;  %v1311_v63 = vsel %vm477_vm5, %v5732_v36, %v5737_v56  ;;  %4906 = vmatprep.subr.bf16.mxu1 %v4905_v61  ;;  %v5740_v11 = vpop.permute.xlu1 %5739  ;;  %2154 = vmatprep.mubr.f32.mxu1 %v1564_v53  ;;  %v1326_v0 = vsel %vm477_vm5, %v5736_v59, %v5731_v50 }
 0x2a6   :  { %v5742_v4 = vunpack.i.h.bf16 %v5740_v11  ;;  %v5741_v6 = vunpack.i.l.bf16 %v5740_v11  ;;  %4908 = vmatpush1.bf16.msra.mxu1 %v4907_v57  ;;  %v5745_v7 = vpop.permute.xlu0 %5744  ;;  %v1327_v31 = vsel %vm477_vm5, %v5737_v56, %v5732_v36  ;;  %v4911_v33 = vpack.c.bf16 %v1311_v63, %v1310_v62  ;;  %v1583_v56 = vld [vmem:[#allocation10 + $0x2f8] sm:$0xff] }
 0x2a7   :  { %v5747_v9 = vunpack.i.h.bf16 %v5745_v7  ;;  %v5746_v10 = vunpack.i.l.bf16 %v5745_v7  ;;  %v4909_v13 = vpack.c.bf16 %v1327_v31, %v1326_v0  ;;  %v1589_v0 = vld [vmem:[#allocation10 + $0x328] sm:$0xff] }
 0x2a8   :  { %2155 = vmatmul.mubr.f32.gmra.mrb[64].mxu1 %v1563_v14 }
 0x2a9   :  { %v1424_v51 = vsel %vm505_vm6, %v5741_v6, %v5746_v10  ;;  %v1425_v55 = vsel %vm505_vm6, %v5742_v4, %v5747_v9  ;;  %4910 = vmatprep.subr.bf16.mxu1 %v4909_v13  ;;  %v5750_v2 = vpop.permute.xlu1 %5749  ;;  %2160 = vmatprep.mubr.f32.mxu1 %v1569_v8  ;;  %v1440_v17 = vsel %vm505_vm6, %v5746_v10, %v5741_v6 }
 0x2aa   :  { %v5752_v18 = vunpack.i.h.bf16 %v5750_v2  ;;  %v5751_v12 = vunpack.i.l.bf16 %v5750_v2  ;;  %4912 = vmatpush1.bf16.msra.mxu1 %v4911_v33  ;;  %v5755_v16 = vpop.permute.xlu0 %5754  ;;  %v1441_v19 = vsel %vm505_vm6, %v5747_v9, %v5742_v4  ;;  %v7093_v20 = vpack.c.bf16 %v1425_v55, %v1424_v51  ;;  %v1588_v9 = vld [vmem:[#allocation10 + $0x320] sm:$0xff] }
 0x2ab   :  { %v5757_v1 = vunpack.i.h.bf16 %v5755_v16  ;;  %v5756_v3 = vunpack.i.l.bf16 %v5755_v16  ;;  %v4913_v34 = vpack.c.bf16 %v1441_v19, %v1440_v17  ;;  %v1594_v17 = vld [vmem:[#allocation10 + $0x350] sm:$0xff] }
 0x2ac   :  { %2161 = vmatmul.mubr.f32.gmra.mrb[66].mxu1 %v1568_v15 }
 0x2ad   :  { %v1426_v48 = vsel %vm505_vm6, %v5751_v12, %v5756_v3  ;;  %v1427_v23 = vsel %vm505_vm6, %v5752_v18, %v5757_v1  ;;  %4914 = vmatprep.subr.bf16.mxu0 %v4913_v34  ;;  %5169 = vmatprep.subr.bf16.mxu1 %v4913_v34  ;;  %v5760_v24 = vpop.permute.xlu1 %5759  ;;  %v1442_v26 = vsel %vm505_vm6, %v5756_v3, %v5751_v12  ;;  %v1593_v34 = vld [vmem:[#allocation10 + $0x348] sm:$0xff] }
 0x2ae   :  { %v5762_v27 = vunpack.i.h.bf16 %v5760_v24  ;;  %v5761_v58 = vunpack.i.l.bf16 %v5760_v24  ;;  %4916 = vmatpush1.bf16.msra.mxu0 %v7093_v20  ;;  %v5765_v60 = vpop.permute.xlu0 %5764  ;;  %2166 = vmatprep.mubr.f32.mxu1 %v1574_v38  ;;  %v1443_v28 = vsel %vm505_vm6, %v5757_v1, %v5752_v18  ;;  %v7104_v29 = vpack.c.bf16 %v1427_v23, %v1426_v48 }
 0x2af   :  { %v5767_v32 = vunpack.i.h.bf16 %v5765_v60  ;;  %v5766_v5 = vunpack.i.l.bf16 %v5765_v60  ;;  %v7106_v22 = vpack.c.bf16 %v1443_v28, %v1442_v26 }
 0x2b0   :  { %2167 = vmatmul.mubr.f32.gmra.mrb[68].mxu1 %v1573_v25 }
 0x2b1   :  { %v1428_v37 = vsel %vm505_vm6, %v5761_v58, %v5766_v5  ;;  %v1429_v39 = vsel %vm505_vm6, %v5762_v27, %v5767_v32  ;;  %4918 = vmatprep.subr.bf16.mxu0 %v7106_v22  ;;  %v5770_v40 = vpop.permute.xlu1 %5769  ;;  %2172 = vmatprep.mubr.f32.mxu1 %v1579_v30  ;;  %v1444_v43 = vsel %vm505_vm6, %v5766_v5, %v5761_v58 }
 0x2b2   :  { %v5772_v44 = vunpack.i.h.bf16 %v5770_v40  ;;  %v5771_v45 = vunpack.i.l.bf16 %v5770_v40  ;;  %4920 = vmatpush1.bf16.msra.mxu0 %v7104_v29  ;;  %v5775_v46 = vpop.permute.xlu0 %5774  ;;  %v1445_v47 = vsel %vm505_vm6, %v5767_v32, %v5762_v27  ;;  %v7118_v49 = vpack.c.bf16 %v1429_v39, %v1428_v37  ;;  %v1599_v27 = vld [vmem:[#allocation10 + $0x378] sm:$0xff]  ;;  %v1598_v37 = vld [vmem:[#allocation10 + $0x370] sm:$0xff] }
 0x2b3   :  { %v5777_v36 = vunpack.i.h.bf16 %v5775_v46  ;;  %v5776_v50 = vunpack.i.l.bf16 %v5775_v46  ;;  %v7120_v52 = vpack.c.bf16 %v1445_v47, %v1444_v43  ;;  %v1604_v46 = vld [vmem:[#allocation10 + $0x3a0] sm:$0xff] }
 0x2b4   :  { %2173 = vmatmul.mubr.f32.gmra.mrb[70].mxu1 %v1578_v41 }
 0x2b5   :  { %v1430_v54 = vsel %vm505_vm6, %v5771_v45, %v5776_v50  ;;  %v1431_v57 = vsel %vm505_vm6, %v5772_v44, %v5777_v36  ;;  %4922 = vmatprep.subr.bf16.mxu0 %v7120_v52  ;;  %v5780_v53 = vpop.permute.xlu1 %5779  ;;  %2178 = vmatprep.mubr.f32.mxu1 %v1584_v35  ;;  %v1446_v59 = vsel %vm505_vm6, %v5776_v50, %v5771_v45 }
 0x2b6   :  { %v5782_v61 = vunpack.i.h.bf16 %v5780_v53  ;;  %v5781_v62 = vunpack.i.l.bf16 %v5780_v53  ;;  %4924 = vmatpush1.bf16.msra.mxu0 %v7118_v49  ;;  %v5785_v63 = vpop.permute.xlu0 %5784  ;;  %v1447_v11 = vsel %vm505_vm6, %v5777_v36, %v5772_v44  ;;  %v7132_v14 = vpack.c.bf16 %v1431_v57, %v1430_v54  ;;  %v1603_v57 = vld [vmem:[#allocation10 + $0x398] sm:$0xff] }
 0x2b7   :  { %v5787_v4 = vunpack.i.h.bf16 %v5785_v63  ;;  %v5786_v6 = vunpack.i.l.bf16 %v5785_v63  ;;  %v7134_v7 = vpack.c.bf16 %v1447_v11, %v1446_v59  ;;  %v1608_v63 = vld [vmem:[#allocation10 + $0x3c0] sm:$0xff]  ;;  %v1614_v11 = vld [vmem:[#allocation10 + $0x3f0] sm:$0xff] }
 0x2b8   :  { %2179 = vmatmul.mubr.f32.gmra.mrb[72].mxu1 %v1583_v56 }
 0x2b9   :  { %v1432_v31 = vsel %vm505_vm6, %v5781_v62, %v5786_v6  ;;  %v1433_v33 = vsel %vm505_vm6, %v5782_v61, %v5787_v4  ;;  %4926 = vmatprep.subr.bf16.mxu0 %v7134_v7  ;;  %v5790_v8 = vpop.permute.xlu1 %5789  ;;  %2184 = vmatprep.mubr.f32.mxu1 %v1589_v0  ;;  %v1448_v10 = vsel %vm505_vm6, %v5786_v6, %v5781_v62  ;;  %v1492_v0 = vld [vmem:[#allocation10 + $0x20] sm:$0xff]  ;;  %v1619_v6 = vld [vmem:[#allocation10 + $0x418] sm:$0xff] }
 0x2ba   :  { %v5792_v13 = vunpack.i.h.bf16 %v5790_v8  ;;  %v5791_v51 = vunpack.i.l.bf16 %v5790_v8  ;;  %4928 = vmatpush1.bf16.msra.mxu0 %v7132_v14  ;;  %v5795_v55 = vpop.permute.xlu0 %5794  ;;  %v1449_v2 = vsel %vm505_vm6, %v5787_v4, %v5782_v61  ;;  %v7146_v15 = vpack.c.bf16 %v1433_v33, %v1432_v31  ;;  %v1609_v61 = vld [vmem:[#allocation10 + $0x3c8] sm:$0xff]  ;;  %v1618_v33 = vld [vmem:[#allocation10 + $0x410] sm:$0xff]  ;;  %v1624_v8 = vld [vmem:[#allocation10 + $0x440] sm:$0xff] }
 0x2bb   :  { %v5797_v18 = vunpack.i.h.bf16 %v5795_v55  ;;  %v5796_v12 = vunpack.i.l.bf16 %v5795_v55  ;;  %v7148_v16 = vpack.c.bf16 %v1449_v2, %v1448_v10  ;;  %v1613_v4 = vld [vmem:[#allocation10 + $0x3e8] sm:$0xff]  ;;  %v1623_v10 = vld [vmem:[#allocation10 + $0x438] sm:$0xff]  ;;  %v1628_v55 = vld [vmem:[#allocation10 + $0x460] sm:$0xff] }
 0x2bc   :  { %2185 = vmatmul.mubr.f32.gmra.mrb[74].mxu1 %v1588_v9  ;;  %v1497_v31 = vld [vmem:[#allocation10 + $0x48] sm:$0xff]  ;;  %v1502_v9 = vld [vmem:[#allocation10 + $0x70] sm:$0xff] }
 0x2bd   :  { %v1434_v19 = vsel %vm505_vm6, %v5791_v51, %v5796_v12  ;;  %v1435_v1 = vsel %vm505_vm6, %v5792_v13, %v5797_v18  ;;  %4930 = vmatprep.subr.bf16.mxu0 %v7148_v16  ;;  %v5800_v3 = vpop.permute.xlu1 %5799  ;;  %2190 = vmatprep.mubr.f32.mxu1 %v1594_v17  ;;  %v1450_v38 = vsel %vm505_vm6, %v5796_v12, %v5791_v51  ;;  %v1507_v51 = vld [vmem:[#allocation10 + $0x98] sm:$0xff]  ;;  %v1634_v2 = vld [vmem:[#allocation10 + $0x490] sm:$0xff]  ;;  %v1512_v17 = vld [vmem:[#allocation10 + $0xc0] sm:$0xff] }
 0x2be   :  { %v5802_v48 = vunpack.i.h.bf16 %v5800_v3  ;;  %v5801_v23 = vunpack.i.l.bf16 %v5800_v3  ;;  %4932 = vmatpush1.bf16.msra.mxu0 %v7146_v15  ;;  %v5805_v24 = vpop.permute.xlu0 %5804  ;;  %v1451_v25 = vsel %vm505_vm6, %v5797_v18, %v5792_v13  ;;  %v7160_v26 = vpack.c.bf16 %v1435_v1, %v1434_v19  ;;  %v1629_v13 = vld [vmem:[#allocation10 + $0x468] sm:$0xff]  ;;  %v1639_v12 = vld [vmem:[#allocation10 + $0x4b8] sm:$0xff]  ;;  %v1638_v1 = vld [vmem:[#allocation10 + $0x4b0] sm:$0xff] }
 0x2bf   :  { %v5807_v58 = vunpack.i.h.bf16 %v5805_v24  ;;  %v5806_v60 = vunpack.i.l.bf16 %v5805_v24  ;;  %v7162_v28 = vpack.c.bf16 %v1451_v25, %v1450_v38  ;;  %v1633_v18 = vld [vmem:[#allocation10 + $0x488] sm:$0xff]  ;;  %v1644_v3 = vld [vmem:[#allocation10 + $0x4e0] sm:$0xff]  ;;  %v1643_v38 = vld [vmem:[#allocation10 + $0x4d8] sm:$0xff] }
 0x2c0   :  { %2191 = vmatmul.mubr.f32.gmra.mrb[76].mxu1 %v1593_v34  ;;  %v1517_v19 = vld [vmem:[#allocation10 + $0xe8] sm:$0xff]  ;;  %v1522_v34 = vld [vmem:[#allocation10 + $0x110] sm:$0xff]  ;;  %v1496_v25 = vld [vmem:[#allocation10 + $0x40] sm:$0xff] }
 0x2c1   :  { %v1436_v30 = vsel %vm505_vm6, %v5801_v23, %v5806_v60  ;;  %v1437_v32 = vsel %vm505_vm6, %v5802_v48, %v5807_v58  ;;  %4934 = vmatprep.subr.bf16.mxu0 %v7162_v28  ;;  %v5810_v5 = vpop.permute.xlu1 %5809  ;;  %2196 = vmatprep.mubr.f32.mxu1 %v1599_v27  ;;  %v1452_v39 = vsel %vm505_vm6, %v5806_v60, %v5801_v23  ;;  %v1527_v23 = vld [vmem:[#allocation10 + $0x138] sm:$0xff]  ;;  %v1490_v24 = vld [vmem:[#allocation10 + $0x10] sm:$0xff]  ;;  %v1532_v27 = vld [vmem:[#allocation10 + $0x160] sm:$0xff] }
 0x2c2   :  { %v5812_v40 = vunpack.i.h.bf16 %v5810_v5  ;;  %v5811_v41 = vunpack.i.l.bf16 %v5810_v5  ;;  %4936 = vmatpush1.bf16.msra.mxu0 %v7160_v26  ;;  %v5815_v43 = vpop.permute.xlu0 %5814  ;;  %v1453_v44 = vsel %vm505_vm6, %v5807_v58, %v5802_v48  ;;  %v7174_v45 = vpack.c.bf16 %v1437_v32, %v1436_v30  ;;  %v1491_v48 = vld [vmem:[#allocation10 + $0x18] sm:$0xff]  ;;  %v1501_v60 = vld [vmem:[#allocation10 + $0x68] sm:$0xff]  ;;  %v1500_v32 = vld [vmem:[#allocation10 + $0x60] sm:$0xff] }
 0x2c3   :  { %v5817_v47 = vunpack.i.h.bf16 %v5815_v43  ;;  %v5816_v35 = vunpack.i.l.bf16 %v5815_v43  ;;  %v7176_v36 = vpack.c.bf16 %v1453_v44, %v1452_v39  ;;  %v1495_v58 = vld [vmem:[#allocation10 + $0x38] sm:$0xff]  ;;  %v1537_v30 = vld [vmem:[#allocation10 + $0x188] sm:$0xff]  ;;  %v1506_v5 = vld [vmem:[#allocation10 + $0x90] sm:$0xff] }
 0x2c4   :  { %2197 = vmatmul.mubr.f32.gmra.mrb[78].mxu1 %v1598_v37  ;;  %v1511_v37 = vld [vmem:[#allocation10 + $0xb8] sm:$0xff]  ;;  %v1516_v39 = vld [vmem:[#allocation10 + $0xe0] sm:$0xff]  ;;  %v1530_v44 = vld [vmem:[#allocation10 + $0x150] sm:$0xff] }
 0x2c5   :  { %v1438_v50 = vsel %vm505_vm6, %v5811_v41, %v5816_v35  ;;  %v1439_v54 = vsel %vm505_vm6, %v5812_v40, %v5817_v47  ;;  %4938 = vmatprep.subr.bf16.mxu0 %v7176_v36  ;;  %2202 = vmatprep.mubr.f32.mxu1 %v1604_v46  ;;  %v1454_v53 = vsel %vm505_vm6, %v5816_v35, %v5811_v41  ;;  %v1526_v41 = vld [vmem:[#allocation10 + $0x130] sm:$0xff]  ;;  %v1531_v43 = vld [vmem:[#allocation10 + $0x158] sm:$0xff]  ;;  %v1536_v46 = vld [vmem:[#allocation10 + $0x180] sm:$0xff] }
 0x2c6   :  { %4940 = vmatpush1.bf16.msra.mxu0 %v7174_v45  ;;  %v1455_v56 = vsel %vm505_vm6, %v5817_v47, %v5812_v40  ;;  %v7188_v59 = vpack.c.bf16 %v1439_v54, %v1438_v50  ;;  %v1521_v40 = vld [vmem:[#allocation10 + $0x108] sm:$0xff]  ;;  %v1535_v47 = vld [vmem:[#allocation10 + $0x178] sm:$0xff]  ;;  %v1540_v35 = vld [vmem:[#allocation10 + $0x1a0] sm:$0xff] }
 0x2c7   :  { %v7190_v62 = vpack.c.bf16 %v1455_v56, %v1454_v53  ;;  %v1545_v50 = vld [vmem:[#allocation10 + $0x1c8] sm:$0xff]  ;;  %v1551_v54 = vld [vmem:[#allocation10 + $0x1f8] sm:$0xff]  ;;  %v1556_v53 = vld [vmem:[#allocation10 + $0x220] sm:$0xff] }
 0x2c8   :  { %2203 = vmatmul.mubr.f32.gmra.mrb[80].mxu1 %v1603_v57  ;;  %v1550_v57 = vld [vmem:[#allocation10 + $0x1f0] sm:$0xff]  ;;  %v1555_v56 = vld [vmem:[#allocation10 + $0x218] sm:$0xff] }
 0x2c9   :  { %4942 = vmatprep.subr.bf16.mxu0 %v7190_v62  ;;  %2208 = vmatprep.mubr.f32.mxu1 %v1609_v61  ;;  %v1560_v61 = vld [vmem:[#allocation10 + $0x240] sm:$0xff] }
 0x2ca   :  { %4944 = vmatpush1.bf16.msra.mxu0 %v7188_v59 }
 0x2cc   :  { %2209 = vmatmul.mubr.f32.gmra.mrb[82].mxu1 %v1608_v63  ;;  %v1565_v63 = vld [vmem:[#allocation10 + $0x268] sm:$0xff] }
 0x2cd   :  { %2214 = vmatprep.mubr.f32.mxu1 %v1614_v11  ;;  %2579 = vmatmul.mubr.f32.vlgmr.msra.gmra.mrb[4].mxu0 %v1492_v0  ;;  %v1571_v11 = vld [vmem:[#allocation10 + $0x298] sm:$0xff] }
 0x2ce   :  { %2584 = vmatprep.mubr.f32.mxu0 %v6293_v21 }
 0x2d0   :  { %2215 = vmatmul.mubr.f32.gmra.mrb[84].mxu1 %v1613_v4  ;;  %v1570_v4 = vld [vmem:[#allocation10 + $0x290] sm:$0xff] }
 0x2d1   :  { %2220 = vmatprep.mubr.f32.mxu1 %v1619_v6  ;;  %2585 = vmatmul.mubr.f32.gmra.mrb[6].mxu0 %v1497_v31  ;;  %v1576_v6 = vld [vmem:[#allocation10 + $0x2c0] sm:$0xff]  ;;  %v1575_v31 = vld [vmem:[#allocation10 + $0x2b8] sm:$0xff] }
 0x2d2   :  { %2590 = vmatprep.mubr.f32.mxu0 %v6293_v21 }
 0x2d3   :  { %v4623_v0 = vpop.f32.mrb[2].mxu0 }
 0x2d4   :  { %2221 = vmatmul.mubr.f32.gmra.mrb[86].mxu1 %v1618_v33  ;;  %v1581_v33 = vld [vmem:[#allocation10 + $0x2e8] sm:$0xff] }
 0x2d5   :  { %2226 = vmatprep.mubr.f32.mxu1 %v1624_v8  ;;  %2591 = vmatmul.mubr.f32.gmra.mrb[8].mxu0 %v1502_v9  ;;  %v1580_v8 = vld [vmem:[#allocation10 + $0x2e0] sm:$0xff]  ;;  %v1586_v9 = vld [vmem:[#allocation10 + $0x310] sm:$0xff] }
 0x2d6   :  { %2596 = vmatprep.mubr.f32.mxu0 %v6293_v21 }
 0x2d8   :  { %2227 = vmatmul.mubr.f32.gmra.mrb[88].mxu1 %v1623_v10  ;;  %v1585_v10 = vld [vmem:[#allocation10 + $0x308] sm:$0xff] }
 0x2d9   :  { %2232 = vmatprep.mubr.f32.mxu1 %v1629_v13  ;;  %2597 = vmatmul.mubr.f32.gmra.mrb[10].mxu0 %v1507_v51  ;;  %v1591_v13 = vld [vmem:[#allocation10 + $0x338] sm:$0xff]  ;;  %v1590_v51 = vld [vmem:[#allocation10 + $0x330] sm:$0xff] }
 0x2da   :  { %2602 = vmatprep.mubr.f32.mxu0 %v6293_v21 }
 0x2dc   :  { %2233 = vmatmul.mubr.f32.gmra.mrb[90].mxu1 %v1628_v55  ;;  %v1596_v55 = vld [vmem:[#allocation10 + $0x360] sm:$0xff] }
 0x2dd   :  { %2238 = vmatprep.mubr.f32.mxu1 %v1634_v2  ;;  %2603 = vmatmul.mubr.f32.gmra.mrb[12].mxu0 %v1512_v17  ;;  %v1595_v2 = vld [vmem:[#allocation10 + $0x358] sm:$0xff]  ;;  %v1601_v17 = vld [vmem:[#allocation10 + $0x388] sm:$0xff] }
 0x2de   :  { %2608 = vmatprep.mubr.f32.mxu0 %v6293_v21 }
 0x2e0   :  { %2239 = vmatmul.mubr.f32.gmra.mrb[92].mxu1 %v1633_v18  ;;  %v4624_v18 = vpop.f32.mrb[3].mxu0 }
 0x2e1   :  { %2244 = vmatprep.mubr.f32.mxu1 %v1639_v12  ;;  %2609 = vmatmul.mubr.f32.gmra.mrb[14].mxu0 %v1517_v19  ;;  %v1600_v12 = vld [vmem:[#allocation10 + $0x380] sm:$0xff]  ;;  %v4625_v19 = vadd.f32 %v4624_v18, %v4623_v0 }
 0x2e2   :  { %2614 = vmatprep.mubr.f32.mxu0 %v6293_v21 }
 0x2e4   :  { %2245 = vmatmul.mubr.f32.gmra.mrb[94].mxu1 %v1638_v1  ;;  %v1606_v1 = vld [vmem:[#allocation10 + $0x3b0] sm:$0xff] }
 0x2e5   :  { %2250 = vmatprep.mubr.f32.mxu1 %v1644_v3  ;;  %2615 = vmatmul.mubr.f32.gmra.mrb[16].mxu0 %v1522_v34  ;;  %v1605_v3 = vld [vmem:[#allocation10 + $0x3a8] sm:$0xff]  ;;  %v1611_v34 = vld [vmem:[#allocation10 + $0x3d8] sm:$0xff] }
 0x2e6   :  { %2620 = vmatprep.mubr.f32.mxu0 %v6293_v21 }
 0x2e8   :  { %2251 = vmatmul.mubr.f32.gmra.mrb[96].mxu1 %v1643_v38  ;;  %v1610_v38 = vld [vmem:[#allocation10 + $0x3d0] sm:$0xff] }
 0x2e9   :  { %2321 = vmatprep.mubr.f32.mxu1 %v1491_v48  ;;  %2621 = vmatmul.mubr.f32.gmra.mrb[18].mxu0 %v1527_v23  ;;  %v1616_v48 = vld [vmem:[#allocation10 + $0x400] sm:$0xff]  ;;  %v1615_v23 = vld [vmem:[#allocation10 + $0x3f8] sm:$0xff] }
 0x2ea   :  { %2626 = vmatprep.mubr.f32.mxu0 %v6293_v21 }
 0x2ec   :  { %2322 = vmatmul.mubr.f32.vlgmr.msra.gmra.mrb[34].mxu1 %v1490_v24  ;;  %v1621_v24 = vld [vmem:[#allocation10 + $0x428] sm:$0xff] }
 0x2ed   :  { %5177 = vmatpush1.bf16.msra.mxu1 %v7093_v20  ;;  %2327 = vmatprep.mubr.f32.mxu1 %v1496_v25  ;;  %v1542_v20 = vld [vmem:[#allocation10 + $0x1b0] sm:$0xff]  ;;  %v1620_v25 = vld [vmem:[#allocation10 + $0x420] sm:$0xff] }
 0x2ee   :  { %5170 = vmatprep.subr.bf16.mxu1 %v7106_v22  ;;  %2627 = vmatmul.mubr.f32.gmra.mrb[20].mxu0 %v1532_v27  ;;  %v1505_v22 = vld [vmem:[#allocation10 + $0x88] sm:$0xff]  ;;  %v1626_v27 = vld [vmem:[#allocation10 + $0x450] sm:$0xff] }
 0x2ef   :  { %2632 = vmatprep.mubr.f32.mxu0 %v6293_v21 }
 0x2f0   :  { %2328 = vmatmul.mubr.f32.gmra.mrb[36].mxu1 %v1495_v58  ;;  %v1625_v58 = vld [vmem:[#allocation10 + $0x448] sm:$0xff] }
 0x2f1   :  { %5178 = vmatpush1.bf16.msra.mxu1 %v7104_v29  ;;  %2333 = vmatprep.mubr.f32.mxu1 %v1501_v60  ;;  %v1547_v29 = vld [vmem:[#allocation10 + $0x1d8] sm:$0xff] }
 0x2f2   :  { %5171 = vmatprep.subr.bf16.mxu1 %v7120_v52  ;;  %2633 = vmatmul.mubr.f32.gmra.mrb[22].mxu0 %v1537_v30  ;;  %v1510_v52 = vld [vmem:[#allocation10 + $0xb0] sm:$0xff]  ;;  %v1631_v60 = vld [vmem:[#allocation10 + $0x478] sm:$0xff] }
 0x2f3   :  { %2638 = vmatprep.mubr.f32.mxu0 %v6293_v21  ;;  %v1630_v30 = vld [vmem:[#allocation10 + $0x470] sm:$0xff] }
 0x2f4   :  { %2334 = vmatmul.mubr.f32.gmra.mrb[38].mxu1 %v1500_v32  ;;  %v1636_v32 = vld [vmem:[#allocation10 + $0x4a0] sm:$0xff] }
 0x2f5   :  { %5179 = vmatpush1.bf16.msra.mxu1 %v7118_v49  ;;  %2339 = vmatprep.mubr.f32.mxu1 %v1506_v5  ;;  %v1552_v49 = vld [vmem:[#allocation10 + $0x200] sm:$0xff]  ;;  %v1635_v5 = vld [vmem:[#allocation10 + $0x498] sm:$0xff] }
 0x2f6   :  { %5172 = vmatprep.subr.bf16.mxu1 %v7134_v7  ;;  %2639 = vmatmul.mubr.f32.gmra.mrb[24].mxu0 %v1542_v20  ;;  %v1515_v7 = vld [vmem:[#allocation10 + $0xd8] sm:$0xff]  ;;  %v1641_v20 = vld [vmem:[#allocation10 + $0x4c8] sm:$0xff] }
 0x2f7   :  { %2644 = vmatprep.mubr.f32.mxu0 %v6293_v21 }
 0x2f8   :  { %2340 = vmatmul.mubr.f32.gmra.mrb[40].mxu1 %v1505_v22  ;;  %v1640_v22 = vld [vmem:[#allocation10 + $0x4c0] sm:$0xff] }
 0x2f9   :  { %5180 = vmatpush1.bf16.msra.mxu1 %v7132_v14  ;;  %2345 = vmatprep.mubr.f32.mxu1 %v1511_v37  ;;  %v1557_v14 = vld [vmem:[#allocation10 + $0x228] sm:$0xff]  ;;  %v1646_v37 = vld [vmem:[#allocation10 + $0x4f0] sm:$0xff] }
 0x2fa   :  { %5173 = vmatprep.subr.bf16.mxu1 %v7148_v16  ;;  %2645 = vmatmul.mubr.f32.gmra.mrb[26].mxu0 %v1547_v29  ;;  %v1520_v16 = vld [vmem:[#allocation10 + $0x100] sm:$0xff]  ;;  %v1645_v29 = vld [vmem:[#allocation10 + $0x4e8] sm:$0xff] }
 0x2fb   :  { %2650 = vmatprep.mubr.f32.mxu0 %v6293_v21 }
 0x2fc   :  { %2346 = vmatmul.mubr.f32.gmra.mrb[42].mxu1 %v1510_v52  ;;  %v1572_v52 = vld [vmem:[#allocation10 + $0x2a0] sm:$0xff] }
 0x2fd   :  { %5181 = vmatpush1.bf16.msra.mxu1 %v7146_v15  ;;  %2351 = vmatprep.mubr.f32.mxu1 %v1516_v39  ;;  %v1562_v15 = vld [vmem:[#allocation10 + $0x250] sm:$0xff]  ;;  %v1577_v39 = vld [vmem:[#allocation10 + $0x2c8] sm:$0xff] }
 0x2fe   :  { %5174 = vmatprep.subr.bf16.mxu1 %v7162_v28  ;;  %2651 = vmatmul.mubr.f32.gmra.mrb[28].mxu0 %v1552_v49  ;;  %v1525_v28 = vld [vmem:[#allocation10 + $0x128] sm:$0xff]  ;;  %v1582_v49 = vld [vmem:[#allocation10 + $0x2f0] sm:$0xff] }
 0x2ff   :  { %2656 = vmatprep.mubr.f32.mxu0 %v6293_v21 }
 0x300   :  { %2352 = vmatmul.mubr.f32.gmra.mrb[44].mxu1 %v1515_v7  ;;  %v1587_v7 = vld [vmem:[#allocation10 + $0x318] sm:$0xff] }
 0x301   :  { %5182 = vmatpush1.bf16.msra.mxu1 %v7160_v26  ;;  %2357 = vmatprep.mubr.f32.mxu1 %v1521_v40  ;;  %v1567_v26 = vld [vmem:[#allocation10 + $0x278] sm:$0xff]  ;;  %v4565_v40 = vld [vmem:[%s8236_s5] ss:$0 sm:$0xff] }
 0x302   :  { %5175 = vmatprep.subr.bf16.mxu1 %v7176_v36  ;;  %2657 = vmatmul.mubr.f32.gmra.mrb[30].mxu0 %v1557_v14  ;;  %v1546_v36 = vld [vmem:[#allocation10 + $0x1d0] sm:$0xff]  ;;  %v1592_v14 = vld [vmem:[#allocation10 + $0x340] sm:$0xff] }
 0x303   :  { %2662 = vmatprep.mubr.f32.mxu0 %v6293_v21 }
 0x304   :  { %2358 = vmatmul.mubr.f32.gmra.mrb[46].mxu1 %v1520_v16  ;;  %v390_v16 = vadd.f32 %v4625_v19, %v4565_v40  ;;  %v1848_v19 = vpop.permute.xlu0 %1847 }
 0x305   :  { %5183 = vmatpush1.bf16.msra.mxu1 %v7174_v45  ;;  %2363 = vmatprep.mubr.f32.mxu1 %v1526_v41  ;;  %v1541_v45 = vld [vmem:[#allocation10 + $0x1a8] sm:$0xff] }
 0x306   :  { %5176 = vmatprep.subr.bf16.mxu1 %v7190_v62  ;;  %2663 = vmatmul.mubr.f32.gmra.mrb[32].mxu0 %v1562_v15  ;;  %v1566_v62 = vld [vmem:[#allocation10 + $0x270] sm:$0xff]  ;;  %v1597_v41 = vld [vmem:[#allocation10 + $0x368] sm:$0xff]  ;;  %v394_v15 = vmul.f32 0.01, %v390_v16  ;;  %vm393_vm12 = vcmp.gt.f32.partialorder %v390_v16, 0.0 }
 0x307   :  { %2668 = vmatprep.mubr.f32.mxu0 %v6293_v21 }
 0x308   :  { %2364 = vmatmul.mubr.f32.gmra.mrb[48].mxu1 %v1525_v28  ;;  %v1602_v28 = vld [vmem:[#allocation10 + $0x390] sm:$0xff] }
 0x309   :  { %5184 = vmatpush1.bf16.msra.mxu1 %v7188_v59  ;;  %2369 = vmatprep.mubr.f32.mxu1 %v1531_v43  ;;  %v1561_v59 = vld [vmem:[#allocation10 + $0x248] sm:$0xff]  ;;  %v395_v43 = vsel %vm393_vm12, %v390_v16, %v394_v15 }
 0x30a   :  { %2669 = vmatmul.mubr.f32.gmra.mrb[34].mxu0 %v1567_v26  ;;  %396 = vst [vmem:[#allocation11] sm:$0xf] %v395_v43  ;;  %v1607_v26 = vld [vmem:[#allocation10 + $0x3b8] sm:$0xff] }
 0x30c   :  { %2370 = vmatmul.mubr.f32.gmra.mrb[50].mxu1 %v1530_v44  ;;  %v1612_v44 = vld [vmem:[#allocation10 + $0x3e0] sm:$0xff] }
 0x30d   :  { %2375 = vmatprep.mubr.f32.mxu1 %v1536_v46  ;;  %v1617_v46 = vld [vmem:[#allocation10 + $0x408] sm:$0xff] }
 0x310   :  { %2376 = vmatmul.mubr.f32.gmra.mrb[52].mxu1 %v1535_v47  ;;  %v1622_v47 = vld [vmem:[#allocation10 + $0x430] sm:$0xff] }
 0x311   :  { %2381 = vmatprep.mubr.f32.mxu1 %v1541_v45  ;;  %v1627_v45 = vld [vmem:[#allocation10 + $0x458] sm:$0xff] }
 0x314   :  { %2382 = vmatmul.mubr.f32.gmra.mrb[54].mxu1 %v1540_v35  ;;  %v1632_v35 = vld [vmem:[#allocation10 + $0x480] sm:$0xff] }
 0x315   :  { %2387 = vmatprep.mubr.f32.mxu1 %v1546_v36  ;;  %v1637_v36 = vld [vmem:[#allocation10 + $0x4a8] sm:$0xff] }
 0x318   :  { %2388 = vmatmul.mubr.f32.gmra.mrb[56].mxu1 %v1545_v50 }
 0x319   :  { %2393 = vmatprep.mubr.f32.mxu1 %v1551_v54  ;;  %v1642_v54 = vld [vmem:[#allocation10 + $0x4d0] sm:$0xff] }
 0x31c   :  { %2394 = vmatmul.mubr.f32.gmra.mrb[58].mxu1 %v1550_v57 }
 0x31d   :  { %2399 = vmatprep.mubr.f32.mxu1 %v1556_v53 }
 0x320   :  { %2400 = vmatmul.mubr.f32.gmra.mrb[60].mxu1 %v1555_v56  ;;  %v1647_v56 = vld [vmem:[#allocation10 + $0x4f8] sm:$0xff] }
 0x321   :  { %2405 = vmatprep.mubr.f32.mxu1 %v1561_v59 }
 0x324   :  { %2406 = vmatmul.mubr.f32.gmra.mrb[62].mxu1 %v1560_v61 }
 0x325   :  { %2411 = vmatprep.mubr.f32.mxu1 %v1566_v62 }
 0x328   :  { %2412 = vmatmul.mubr.f32.gmra.mrb[64].mxu1 %v1565_v63 }
 0x329   :  { %2417 = vmatprep.mubr.f32.mxu1 %v1571_v11 }
 0x32c   :  { %2418 = vmatmul.mubr.f32.gmra.mrb[66].mxu1 %v1570_v4 }
 0x32d   :  { %2423 = vmatprep.mubr.f32.mxu1 %v1576_v6 }
 0x330   :  { %2424 = vmatmul.mubr.f32.gmra.mrb[68].mxu1 %v1575_v31 }
 0x331   :  { %2429 = vmatprep.mubr.f32.mxu1 %v1581_v33 }
 0x334   :  { %2430 = vmatmul.mubr.f32.gmra.mrb[70].mxu1 %v1580_v8 }
 0x335   :  { %2435 = vmatprep.mubr.f32.mxu1 %v1586_v9 }
 0x338   :  { %2436 = vmatmul.mubr.f32.gmra.mrb[72].mxu1 %v1585_v10  ;;  %v1843_v10 = vpop.permute.xlu1 %1842 }
 0x339   :  { %2441 = vmatprep.mubr.f32.mxu1 %v1591_v13 }
 0x33c   :  { %2442 = vmatmul.mubr.f32.gmra.mrb[74].mxu1 %v1590_v51 }
 0x33d   :  { %2447 = vmatprep.mubr.f32.mxu1 %v1596_v55 }
 0x340   :  { %2448 = vmatmul.mubr.f32.gmra.mrb[76].mxu1 %v1595_v2 }
 0x341   :  { %2453 = vmatprep.mubr.f32.mxu1 %v1601_v17 }
 0x344   :  { %2454 = vmatmul.mubr.f32.gmra.mrb[78].mxu1 %v1600_v12 }
 0x345   :  { %2459 = vmatprep.mubr.f32.mxu1 %v1606_v1 }
 0x348   :  { %2460 = vmatmul.mubr.f32.gmra.mrb[80].mxu1 %v1605_v3 }
 0x349   :  { %2465 = vmatprep.mubr.f32.mxu1 %v1611_v34 }
 0x34c   :  { %2466 = vmatmul.mubr.f32.gmra.mrb[82].mxu1 %v1610_v38 }
 0x34d   :  { %2471 = vmatprep.mubr.f32.mxu1 %v1616_v48 }
 0x350   :  { %2472 = vmatmul.mubr.f32.gmra.mrb[84].mxu1 %v1615_v23 }
 0x351   :  { %2477 = vmatprep.mubr.f32.mxu1 %v1621_v24 }
 0x354   :  { %2478 = vmatmul.mubr.f32.gmra.mrb[86].mxu1 %v1620_v25 }
 0x355   :  { %2483 = vmatprep.mubr.f32.mxu1 %v1626_v27  ;;  %v1853_v27 = vpop.permute.xlu1 %1852 }
 0x358   :  { %2484 = vmatmul.mubr.f32.gmra.mrb[88].mxu1 %v1625_v58 }
 0x359   :  { %2489 = vmatprep.mubr.f32.mxu1 %v1631_v60 }
 0x35c   :  { %2490 = vmatmul.mubr.f32.gmra.mrb[90].mxu1 %v1630_v30 }
 0x35d   :  { %2495 = vmatprep.mubr.f32.mxu1 %v1636_v32 }
 0x360   :  { %2496 = vmatmul.mubr.f32.gmra.mrb[92].mxu1 %v1635_v5 }
 0x361   :  { %2501 = vmatprep.mubr.f32.mxu1 %v1641_v20 }
 0x364   :  { %2502 = vmatmul.mubr.f32.gmra.mrb[94].mxu1 %v1640_v22 }
 0x365   :  { %2507 = vmatprep.mubr.f32.mxu1 %v1646_v37 }
 0x368   :  { %2508 = vmatmul.mubr.f32.gmra.mrb[96].mxu1 %v1645_v29 }
 0x369   :  { %2674 = vmatprep.mubr.f32.mxu1 %v6293_v21 }
 0x36c   :  { %2675 = vmatmul.mubr.f32.vlgmr.msra.gmra.mrb[66].mxu1 %v1572_v52 }
 0x36d   :  { %2680 = vmatprep.mubr.f32.mxu1 %v6293_v21 }
 0x370   :  { %2681 = vmatmul.mubr.f32.gmra.mrb[68].mxu1 %v1577_v39 }
 0x371   :  { %2686 = vmatprep.mubr.f32.mxu1 %v6293_v21 }
 0x374   :  { %2687 = vmatmul.mubr.f32.gmra.mrb[70].mxu1 %v1582_v49 }
 0x375   :  { %2692 = vmatprep.mubr.f32.mxu1 %v6293_v21 }
 0x378   :  { %2693 = vmatmul.mubr.f32.gmra.mrb[72].mxu1 %v1587_v7 }
 0x379   :  { %2698 = vmatprep.mubr.f32.mxu1 %v6293_v21 }
 0x37c   :  { %2699 = vmatmul.mubr.f32.gmra.mrb[74].mxu1 %v1592_v14  ;;  %v1858_v14 = vpop.permute.xlu0 %1857 }
 0x37d   :  { %2704 = vmatprep.mubr.f32.mxu1 %v6293_v21 }
 0x380   :  { %2705 = vmatmul.mubr.f32.gmra.mrb[76].mxu1 %v1597_v41 }
 0x381   :  { %2710 = vmatprep.mubr.f32.mxu1 %v6293_v21 }
 0x384   :  { %2711 = vmatmul.mubr.f32.gmra.mrb[78].mxu1 %v1602_v28 }
 0x385   :  { %2716 = vmatprep.mubr.f32.mxu1 %v6293_v21 }
 0x388   :  { %2717 = vmatmul.mubr.f32.gmra.mrb[80].mxu1 %v1607_v26 }
 0x389   :  { %2722 = vmatprep.mubr.f32.mxu1 %v6293_v21 }
 0x38c   :  { %2723 = vmatmul.mubr.f32.gmra.mrb[82].mxu1 %v1612_v44 }
 0x38d   :  { %2728 = vmatprep.mubr.f32.mxu1 %v6293_v21 }
 0x390   :  { %2729 = vmatmul.mubr.f32.gmra.mrb[84].mxu1 %v1617_v46 }
 0x391   :  { %2734 = vmatprep.mubr.f32.mxu1 %v6293_v21 }
 0x394   :  { %2735 = vmatmul.mubr.f32.gmra.mrb[86].mxu1 %v1622_v47 }
 0x395   :  { %2740 = vmatprep.mubr.f32.mxu1 %v6293_v21 }
 0x398   :  { %2741 = vmatmul.mubr.f32.gmra.mrb[88].mxu1 %v1627_v45 }
 0x399   :  { %2746 = vmatprep.mubr.f32.mxu1 %v6293_v21 }
 0x39c   :  { %2747 = vmatmul.mubr.f32.gmra.mrb[90].mxu1 %v1632_v35  ;;  %v1863_v35 = vpop.permute.xlu1 %1862 }
 0x39d   :  { %2752 = vmatprep.mubr.f32.mxu1 %v6293_v21 }
 0x3a0   :  { %2753 = vmatmul.mubr.f32.gmra.mrb[92].mxu1 %v1637_v36  ;;  %v2580_v50 = vpop.f32.mrb[4].mxu0 }
 0x3a1   :  { %2758 = vmatprep.mubr.f32.mxu1 %v6293_v21  ;;  %v2582_v57 = vpop.f32.mrb[5].mxu0 }
 0x3a4   :  { %2759 = vmatmul.mubr.f32.gmra.mrb[94].mxu1 %v1642_v54  ;;  %v2586_v53 = vpop.f32.mrb[6].mxu0 }
 0x3a5   :  { %2764 = vmatprep.mubr.f32.mxu1 %v6293_v21  ;;  %v2588_v59 = vpop.f32.mrb[7].mxu0 }
 0x3a8   :  { %2765 = vmatmul.mubr.f32.gmra.mrb[96].mxu1 %v1647_v56  ;;  %v2592_v61 = vpop.f32.mrb[8].mxu0 }
 0x3a9   :  { %v2594_v62 = vpop.f32.mrb[9].mxu0 }
 0x3ac   :  { %v2598_v63 = vpop.f32.mrb[10].mxu0 }
 0x3ad   :  { %v2600_v11 = vpop.f32.mrb[11].mxu0 }
 0x3b0   :  { %v7243_v0 = vpop.f32.mrb[12].mxu0 }
 0x3b1   :  { %v7245_v4 = vpop.f32.mrb[13].mxu0 }
 0x3b4   :  { %v7247_v6 = vpop.f32.mrb[14].mxu0 }
 0x3b5   :  { %v7249_v31 = vpop.f32.mrb[15].mxu0 }
 0x3b8   :  { %v7251_v33 = vpop.f32.mrb[16].mxu0 }
 0x3b9   :  { %v7253_v8 = vpop.f32.mrb[17].mxu0 }
 0x3bc   :  { %v7255_v21 = vpop.f32.mrb[18].mxu0 }
 0x3bd   :  { %v7257_v9 = vpop.f32.mrb[19].mxu0 }
 0x3bf   :  { %v2323_v13 = vpop.f32.mrb[34].mxu1 }
 0x3c0   :  { %v5185_v51 = vadd.f32 %v2323_v13, %v1843_v10  ;;  %v2325_v55 = vpop.f32.mrb[35].mxu1 }
 0x3c1   :  { %v5187_v2 = vadd.f32 %v2325_v55, %v1843_v10  ;;  %v7259_v17 = vpop.f32.mrb[20].mxu0 }
 0x3c2   :  { %v5186_v18 = vadd.f32 %v5185_v51, %v2580_v50  ;;  %v7261_v12 = vpop.f32.mrb[21].mxu0 }
 0x3c3   :  { %v5188_v1 = vadd.f32 %v5187_v2, %v2582_v57  ;;  %v2329_v3 = vpop.f32.mrb[36].mxu1  ;;  %v1868_v2 = vpop.permute.xlu0 %1867 }
 0x3c4   :  { %v5189_v34 = vadd.f32 %v2329_v3, %v1848_v19  ;;  %v2331_v38 = vpop.f32.mrb[37].mxu1  ;;  %v2771_v30 = vmax.f32 %v5186_v18, 0.0 }
 0x3c5   :  { %v5191_v48 = vadd.f32 %v2331_v38, %v1848_v19  ;;  %v7263_v23 = vpop.f32.mrb[22].mxu0  ;;  %v2772_v22 = vmax.f32 %v5188_v1, 0.0 }
 0x3c6   :  { %v5190_v24 = vadd.f32 %v5189_v34, %v2586_v53  ;;  %v7265_v25 = vpop.f32.mrb[23].mxu0 }
 0x3c7   :  { %v5192_v58 = vadd.f32 %v5191_v48, %v2588_v59  ;;  %v2335_v60 = vpop.f32.mrb[38].mxu1 }
 0x3c8   :  { %v2773_v32 = vmax.f32 %v5190_v24, 0.0  ;;  %v5193_v5 = vadd.f32 %v2335_v60, %v1853_v27  ;;  %v2337_v20 = vpop.f32.mrb[39].mxu1 }
 0x3c9   :  { %v2774_v37 = vmax.f32 %v5192_v58, 0.0  ;;  %v5195_v29 = vadd.f32 %v2337_v20, %v1853_v27  ;;  %v7267_v52 = vpop.f32.mrb[24].mxu0 }
 0x3ca   :  { %v7269_v39 = vpack.i.bf16 %v2773_v32, %v2771_v30  ;;  %v4947_v49 = vpack.c.bf16 %v2773_v32, %v2771_v30  ;;  %v5194_v7 = vadd.f32 %v5193_v5, %v2592_v61  ;;  %v7271_v40 = vpop.f32.mrb[25].mxu0 }
 0x3cb   :  { %v7273_v16 = vpack.i.bf16 %v2774_v37, %v2772_v22  ;;  %v5196_v41 = vadd.f32 %v5195_v29, %v2594_v62  ;;  %v2341_v15 = vpop.f32.mrb[40].mxu1  ;;  %v4945_v28 = vpack.c.bf16 %v2774_v37, %v2772_v22 }
 0x3cc   :  { %v5197_v43 = vadd.f32 %v2341_v15, %v1858_v14  ;;  %v2343_v26 = vpop.f32.mrb[41].mxu1  ;;  %5819 = vrot.lane.b32.xlu1 %v7269_v39, %s6288_s29  ;;  %v2775_v54 = vmax.f32 %v5194_v7, 0.0 }
 0x3cd   :  { %v5199_v44 = vadd.f32 %v2343_v26, %v1858_v14  ;;  %5824 = vrot.lane.b32.xlu0 %v7273_v16, %s6288_s29  ;;  %4946 = vmatprep.subr.bf16.mxu0 %v4945_v28  ;;  %v7279_v46 = vpop.f32.mrb[26].mxu0  ;;  %v2776_v59 = vmax.f32 %v5196_v41, 0.0  ;;  %v1878_v41 = vpop.permute.xlu0 %1877 }
 0x3ce   :  { %v5198_v47 = vadd.f32 %v5197_v43, %v2598_v63  ;;  %4948 = vmatpush1.bf16.msra.mxu0 %v4947_v49  ;;  %v7281_v45 = vpop.f32.mrb[27].mxu0 }
 0x3cf   :  { %v5200_v36 = vadd.f32 %v5199_v44, %v2600_v11  ;;  %v2347_v50 = vpop.f32.mrb[42].mxu1 }
 0x3d0   :  { %v2777_v57 = vmax.f32 %v5198_v47, 0.0  ;;  %v5201_v53 = vadd.f32 %v2347_v50, %v1863_v35  ;;  %v2349_v56 = vpop.f32.mrb[43].mxu1 }
 0x3d1   :  { %v2778_v61 = vmax.f32 %v5200_v36, 0.0  ;;  %v5203_v62 = vadd.f32 %v2349_v56, %v1863_v35  ;;  %v7283_v10 = vpop.f32.mrb[28].mxu0 }
 0x3d2   :  { %v7285_v13 = vpack.i.bf16 %v2777_v57, %v2775_v54  ;;  %v4951_v51 = vpack.c.bf16 %v2777_v57, %v2775_v54  ;;  %v5202_v63 = vadd.f32 %v5201_v53, %v7243_v0  ;;  %v7288_v55 = vpop.f32.mrb[29].mxu0 }
 0x3d3   :  { %v7290_v18 = vpack.i.bf16 %v2778_v61, %v2776_v59  ;;  %v5204_v11 = vadd.f32 %v5203_v62, %v7245_v4  ;;  %v2353_v19 = vpop.f32.mrb[44].mxu1  ;;  %v4949_v1 = vpack.c.bf16 %v2778_v61, %v2776_v59  ;;  %v1873_v4 = vpop.permute.xlu1 %1872 }
 0x3d4   :  { %v5205_v3 = vadd.f32 %v2353_v19, %v1868_v2  ;;  %v2355_v34 = vpop.f32.mrb[45].mxu1  ;;  %5829 = vrot.lane.b32.xlu1 %v7285_v13, %s6288_s29  ;;  %v2779_v60 = vmax.f32 %v5202_v63, 0.0 }
 0x3d5   :  { %v5207_v38 = vadd.f32 %v2355_v34, %v1868_v2  ;;  %5834 = vrot.lane.b32.xlu0 %v7290_v18, %s6288_s29  ;;  %4950 = vmatprep.subr.bf16.mxu0 %v4949_v1  ;;  %v7297_v0 = vpop.f32.mrb[30].mxu0  ;;  %v2780_v20 = vmax.f32 %v5204_v11, 0.0 }
 0x3d6   :  { %v5206_v48 = vadd.f32 %v5205_v3, %v7247_v6  ;;  %4952 = vmatpush1.bf16.msra.mxu0 %v4951_v51  ;;  %v7300_v24 = vpop.f32.mrb[31].mxu0 }
 0x3d7   :  { %v5208_v27 = vadd.f32 %v5207_v38, %v7249_v31  ;;  %v2359_v58 = vpop.f32.mrb[46].mxu1 }
 0x3d8   :  { %v2781_v30 = vmax.f32 %v5206_v48, 0.0  ;;  %v5209_v32 = vadd.f32 %v2359_v58, %v1873_v4  ;;  %v2361_v5 = vpop.f32.mrb[47].mxu1 }
 0x3d9   :  { %v2782_v22 = vmax.f32 %v5208_v27, 0.0  ;;  %v5211_v37 = vadd.f32 %v2361_v5, %v1873_v4  ;;  %v7303_v29 = vpop.f32.mrb[32].mxu0 }
 0x3da   :  { %v7305_v49 = vpack.i.bf16 %v2781_v30, %v2779_v60  ;;  %v4955_v7 = vpack.c.bf16 %v2781_v30, %v2779_v60  ;;  %v5210_v6 = vadd.f32 %v5209_v32, %v7251_v33  ;;  %v7308_v14 = vpop.f32.mrb[33].mxu0 }
 0x3db   :  { %v7310_v15 = vpack.i.bf16 %v2782_v22, %v2780_v20  ;;  %v5212_v31 = vadd.f32 %v5211_v37, %v7253_v8  ;;  %v2365_v28 = vpop.f32.mrb[48].mxu1  ;;  %v4953_v43 = vpack.c.bf16 %v2782_v22, %v2780_v20  ;;  %v1883_v8 = vpop.permute.xlu1 %1882 }
 0x3dc   :  { %v5213_v26 = vadd.f32 %v2365_v28, %v1878_v41  ;;  %v2367_v44 = vpop.f32.mrb[49].mxu1  ;;  %5839 = vrot.lane.b32.xlu1 %v7305_v49, %s6288_s29  ;;  %v2783_v57 = vmax.f32 %v5210_v6, 0.0 }
 0x3dd   :  { %v5215_v47 = vadd.f32 %v2367_v44, %v1878_v41  ;;  %5844 = vrot.lane.b32.xlu0 %v7310_v15, %s6288_s29  ;;  %4954 = vmatprep.subr.bf16.mxu0 %v4953_v43  ;;  %v7317_v33 = vpop.f32.mrb[34].mxu0  ;;  %v2784_v61 = vmax.f32 %v5212_v31, 0.0 }
 0x3de   :  { %v5214_v35 = vadd.f32 %v5213_v26, %v7255_v21  ;;  %4956 = vmatpush1.bf16.msra.mxu0 %v4955_v7  ;;  %v7320_v36 = vpop.f32.mrb[35].mxu0  ;;  %v1888_v21 = vpop.permute.xlu0 %1887 }
 0x3df   :  { %v5216_v50 = vadd.f32 %v5215_v47, %v7257_v9  ;;  %v2371_v54 = vpop.f32.mrb[50].mxu1 }
 0x3e0   :  { %v2785_v53 = vmax.f32 %v5214_v35, 0.0  ;;  %v5217_v56 = vadd.f32 %v2371_v54, %v1883_v8  ;;  %v2373_v59 = vpop.f32.mrb[51].mxu1 }
 0x3e1   :  { %v2786_v62 = vmax.f32 %v5216_v50, 0.0  ;;  %v5219_v51 = vadd.f32 %v2373_v59, %v1883_v8 }
 0x3e2   :  { %v7323_v63 = vpack.i.bf16 %v2785_v53, %v2783_v57  ;;  %v4959_v2 = vpack.c.bf16 %v2785_v53, %v2783_v57  ;;  %v5218_v11 = vadd.f32 %v5217_v56, %v7259_v17  ;;  %v1893_v17 = vpop.permute.xlu1 %1892  ;;  %v1898_v41 = vpop.permute.xlu0 %1897 }
 0x3e3   :  { %v7326_v19 = vpack.i.bf16 %v2786_v62, %v2784_v61  ;;  %v5220_v1 = vadd.f32 %v5219_v51, %v7261_v12  ;;  %v2377_v3 = vpop.f32.mrb[52].mxu1  ;;  %v4957_v9 = vpack.c.bf16 %v2786_v62, %v2784_v61 }
 0x3e4   :  { %v5221_v34 = vadd.f32 %v2377_v3, %v1888_v21  ;;  %v2379_v38 = vpop.f32.mrb[53].mxu1  ;;  %5849 = vrot.lane.b32.xlu1 %v7323_v63, %s6288_s29  ;;  %v2787_v12 = vmax.f32 %v5218_v11, 0.0 }
 0x3e5   :  { %v5223_v48 = vadd.f32 %v2379_v38, %v1888_v21  ;;  %5854 = vrot.lane.b32.xlu0 %v7326_v19, %s6288_s29  ;;  %4958 = vmatprep.subr.bf16.mxu0 %v4957_v9  ;;  %v2788_v5 = vmax.f32 %v5220_v1, 0.0 }
 0x3e6   :  { %v5222_v4 = vadd.f32 %v5221_v34, %v7263_v23  ;;  %4960 = vmatpush1.bf16.msra.mxu0 %v4959_v2  ;;  %v1908_v2 = vpop.permute.xlu0 %1907 }
 0x3e7   :  { %v5224_v27 = vadd.f32 %v5223_v48, %v7265_v25  ;;  %v2383_v58 = vpop.f32.mrb[54].mxu1 }
 0x3e8   :  { %v2789_v60 = vmax.f32 %v5222_v4, 0.0  ;;  %v5225_v30 = vadd.f32 %v2383_v58, %v1893_v17  ;;  %v2385_v32 = vpop.f32.mrb[55].mxu1 }
 0x3e9   :  { %v2790_v20 = vmax.f32 %v5224_v27, 0.0  ;;  %v5227_v22 = vadd.f32 %v2385_v32, %v1893_v17 }
 0x3ea   :  { %v7335_v37 = vpack.i.bf16 %v2789_v60, %v2787_v12  ;;  %v4963_v7 = vpack.c.bf16 %v2789_v60, %v2787_v12  ;;  %v5226_v6 = vadd.f32 %v5225_v30, %v7267_v52  ;;  %v1903_v52 = vpop.permute.xlu1 %1902 }
 0x3eb   :  { %v7338_v31 = vpack.i.bf16 %v2790_v20, %v2788_v5  ;;  %v5228_v23 = vadd.f32 %v5227_v22, %v7271_v40  ;;  %v2389_v28 = vpop.f32.mrb[56].mxu1  ;;  %v4961_v25 = vpack.c.bf16 %v2790_v20, %v2788_v5  ;;  %v1918_v20 = vpop.permute.xlu0 %1917 }
 0x3ec   :  { %v5229_v43 = vadd.f32 %v2389_v28, %v1898_v41  ;;  %v2391_v26 = vpop.f32.mrb[57].mxu1  ;;  %5859 = vrot.lane.b32.xlu1 %v7335_v37, %s6288_s29  ;;  %v2791_v40 = vmax.f32 %v5226_v6, 0.0 }
 0x3ed   :  { %v5231_v44 = vadd.f32 %v2391_v26, %v1898_v41  ;;  %5864 = vrot.lane.b32.xlu0 %v7338_v31, %s6288_s29  ;;  %4962 = vmatprep.subr.bf16.mxu0 %v4961_v25  ;;  %v2792_v53 = vmax.f32 %v5228_v23, 0.0 }
 0x3ee   :  { %v5230_v47 = vadd.f32 %v5229_v43, %v7279_v46  ;;  %4964 = vmatpush1.bf16.msra.mxu0 %v4963_v7 }
 0x3ef   :  { %v5232_v35 = vadd.f32 %v5231_v44, %v7281_v45  ;;  %v2395_v8 = vpop.f32.mrb[58].mxu1 }
 0x3f0   :  { %v2793_v50 = vmax.f32 %v5230_v47, 0.0  ;;  %v5233_v54 = vadd.f32 %v2395_v8, %v1903_v52  ;;  %v2397_v57 = vpop.f32.mrb[59].mxu1 }
 0x3f1   :  { %v2794_v56 = vmax.f32 %v5232_v35, 0.0  ;;  %v5235_v59 = vadd.f32 %v2397_v57, %v1903_v52 }
 0x3f2   :  { %v7347_v61 = vpack.i.bf16 %v2793_v50, %v2791_v40  ;;  %v4967_v62 = vpack.c.bf16 %v2793_v50, %v2791_v40  ;;  %v5234_v51 = vadd.f32 %v5233_v54, %v7283_v10  ;;  %v1913_v10 = vpop.permute.xlu1 %1912  ;;  %v1928_v54 = vpop.permute.xlu0 %1927 }
 0x3f3   :  { %v7350_v11 = vpack.i.bf16 %v2794_v56, %v2792_v53  ;;  %v5236_v46 = vadd.f32 %v5235_v59, %v7288_v55  ;;  %v2401_v21 = vpop.f32.mrb[60].mxu1  ;;  %v4965_v45 = vpack.c.bf16 %v2794_v56, %v2792_v53 }
 0x3f4   :  { %v5237_v1 = vadd.f32 %v2401_v21, %v1908_v2  ;;  %v2403_v3 = vpop.f32.mrb[61].mxu1  ;;  %5869 = vrot.lane.b32.xlu1 %v7347_v61, %s6288_s29  ;;  %v2795_v55 = vmax.f32 %v5234_v51, 0.0 }
 0x3f5   :  { %v5239_v9 = vadd.f32 %v2403_v3, %v1908_v2  ;;  %5874 = vrot.lane.b32.xlu0 %v7350_v11, %s6288_s29  ;;  %4966 = vmatprep.subr.bf16.mxu0 %v4965_v45  ;;  %v2796_v58 = vmax.f32 %v5236_v46, 0.0 }
 0x3f6   :  { %v5238_v34 = vadd.f32 %v5237_v1, %v7297_v0  ;;  %4968 = vmatpush1.bf16.msra.mxu0 %v4967_v62  ;;  %v1923_v40 = vpop.permute.xlu1 %1922 }
 0x3f7   :  { %v5240_v38 = vadd.f32 %v5239_v9, %v7300_v24  ;;  %v2407_v48 = vpop.f32.mrb[62].mxu1 }
 0x3f8   :  { %v2797_v4 = vmax.f32 %v5238_v34, 0.0  ;;  %v5241_v17 = vadd.f32 %v2407_v48, %v1913_v10  ;;  %v2409_v27 = vpop.f32.mrb[63].mxu1 }
 0x3f9   :  { %v2798_v12 = vmax.f32 %v5240_v38, 0.0  ;;  %v5243_v60 = vadd.f32 %v2409_v27, %v1913_v10 }
 0x3fa   :  { %v7359_v30 = vpack.i.bf16 %v2797_v4, %v2795_v55  ;;  %v4971_v32 = vpack.c.bf16 %v2797_v4, %v2795_v55  ;;  %v5242_v5 = vadd.f32 %v5241_v17, %v7303_v29  ;;  %v1933_v34 = vpop.permute.xlu1 %1932  ;;  %v1938_v55 = vpop.permute.xlu0 %1937 }
 0x3fb   :  { %v7362_v22 = vpack.i.bf16 %v2798_v12, %v2796_v58  ;;  %v5244_v0 = vadd.f32 %v5243_v60, %v7308_v14  ;;  %v2413_v7 = vpop.f32.mrb[64].mxu1  ;;  %v4969_v24 = vpack.c.bf16 %v2798_v12, %v2796_v58 }
 0x3fc   :  { %v5245_v6 = vadd.f32 %v2413_v7, %v1918_v20  ;;  %v2415_v41 = vpop.f32.mrb[65].mxu1  ;;  %5879 = vrot.lane.b32.xlu1 %v7359_v30, %s6288_s29  ;;  %v2799_v25 = vmax.f32 %v5242_v5, 0.0 }
 0x3fd   :  { %v5247_v23 = vadd.f32 %v2415_v41, %v1918_v20  ;;  %5884 = vrot.lane.b32.xlu0 %v7362_v22, %s6288_s29  ;;  %4970 = vmatprep.subr.bf16.mxu0 %v4969_v24  ;;  %v2800_v14 = vmax.f32 %v5244_v0, 0.0 }
 0x3fe   :  { %v5246_v28 = vadd.f32 %v5245_v6, %v7317_v33  ;;  %4972 = vmatpush1.bf16.msra.mxu0 %v4971_v32  ;;  %v3412_v33 = vld [vmem:[%s8241_s10 + $0x8] sm:$0xff]  ;;  %v1943_v41 = vpop.permute.xlu1 %1942 }
 0x3ff   :  { %v5248_v29 = vadd.f32 %v5247_v23, %v7320_v36  ;;  %3859 = vmatprep.mubr.f32.mxu0 %v3412_v33 }
 0x400   :  { %v2801_v43 = vmax.f32 %v5246_v28, 0.0 }
 0x401   :  { %v2802_v26 = vmax.f32 %v5248_v29, 0.0 }
 0x402   :  { %v7371_v44 = vpack.i.bf16 %v2801_v43, %v2799_v25  ;;  %v4975_v47 = vpack.c.bf16 %v2801_v43, %v2799_v25  ;;  %v1948_v25 = vpop.permute.xlu0 %1947 }
 0x403   :  { %v7373_v52 = vpack.i.bf16 %v2802_v26, %v2800_v14  ;;  %v4973_v35 = vpack.c.bf16 %v2802_v26, %v2800_v14 }
 0x404   :  { %5889 = vrot.lane.b32.xlu1 %v7371_v44, %s6288_s29 }
 0x405   :  { %5894 = vrot.lane.b32.xlu0 %v7373_v52, %s6288_s29  ;;  %4974 = vmatprep.subr.bf16.mxu0 %v4973_v35 }
 0x406   :  { %4976 = vmatpush1.bf16.msra.mxu0 %v4975_v47 }
 0x43f   :  { %v2676_v36 = vpop.f32.mrb[66].mxu1 }
 0x440   :  { %v2678_v8 = vpop.f32.mrb[67].mxu1  ;;  %v5249_v50 = vadd.f32 %v2676_v36, %v1923_v40 }
 0x441   :  { %v5250_v57 = vadd.f32 %v2678_v8, %v1923_v40 }
 0x442   :  { %v2803_v51 = vmax.f32 %v5249_v50, 0.0 }
 0x443   :  { %v2682_v53 = vpop.f32.mrb[68].mxu1  ;;  %v2804_v46 = vmax.f32 %v5250_v57, 0.0 }
 0x444   :  { %v5251_v56 = vadd.f32 %v2682_v53, %v1928_v54  ;;  %v2684_v59 = vpop.f32.mrb[69].mxu1 }
 0x445   :  { %v5252_v62 = vadd.f32 %v2684_v59, %v1928_v54 }
 0x446   :  { %v2805_v2 = vmax.f32 %v5251_v56, 0.0  ;;  %v1953_v56 = vpop.permute.xlu1 %1952 }
 0x447   :  { %v2806_v21 = vmax.f32 %v5252_v62, 0.0  ;;  %v2688_v45 = vpop.f32.mrb[70].mxu1  ;;  %v1958_v62 = vpop.permute.xlu0 %1957 }
 0x448   :  { %v7382_v1 = vpack.i.bf16 %v2805_v2, %v2803_v51  ;;  %v4979_v3 = vpack.c.bf16 %v2805_v2, %v2803_v51  ;;  %v2690_v9 = vpop.f32.mrb[71].mxu1  ;;  %v5253_v38 = vadd.f32 %v2688_v45, %v1933_v34 }
 0x449   :  { %v7384_v10 = vpack.i.bf16 %v2806_v21, %v2804_v46  ;;  %v4977_v48 = vpack.c.bf16 %v2806_v21, %v2804_v46  ;;  %v5254_v4 = vadd.f32 %v2690_v9, %v1933_v34 }
 0x44a   :  { %5899 = vrot.lane.b32.xlu1 %v7382_v1, %s6288_s29  ;;  %v2807_v60 = vmax.f32 %v5253_v38, 0.0 }
 0x44b   :  { %v2694_v17 = vpop.f32.mrb[72].mxu1  ;;  %5904 = vrot.lane.b32.xlu0 %v7384_v10, %s6288_s29  ;;  %4978 = vmatprep.subr.bf16.mxu0 %v4977_v48  ;;  %v2808_v5 = vmax.f32 %v5254_v4, 0.0  ;;  %v1963_v48 = vpop.permute.xlu1 %1962 }
 0x44c   :  { %v5255_v27 = vadd.f32 %v2694_v17, %v1938_v55  ;;  %v2696_v58 = vpop.f32.mrb[73].mxu1  ;;  %4980 = vmatpush1.bf16.msra.mxu0 %v4979_v3 }
 0x44d   :  { %v5256_v12 = vadd.f32 %v2696_v58, %v1938_v55 }
 0x44e   :  { %v2809_v32 = vmax.f32 %v5255_v27, 0.0  ;;  %v1968_v27 = vpop.permute.xlu0 %1967 }
 0x44f   :  { %v2810_v20 = vmax.f32 %v5256_v12, 0.0  ;;  %v2700_v0 = vpop.f32.mrb[74].mxu1 }
 0x450   :  { %v7390_v7 = vpack.i.bf16 %v2809_v32, %v2807_v60  ;;  %v4983_v24 = vpack.c.bf16 %v2809_v32, %v2807_v60  ;;  %v2702_v6 = vpop.f32.mrb[75].mxu1  ;;  %v5257_v28 = vadd.f32 %v2700_v0, %v1943_v41 }
 0x451   :  { %v7392_v23 = vpack.i.bf16 %v2810_v20, %v2808_v5  ;;  %v4981_v29 = vpack.c.bf16 %v2810_v20, %v2808_v5  ;;  %v5258_v43 = vadd.f32 %v2702_v6, %v1943_v41 }
 0x452   :  { %5909 = vrot.lane.b32.xlu1 %v7390_v7, %s6288_s29  ;;  %v2811_v33 = vmax.f32 %v5257_v28, 0.0  ;;  %v1973_v28 = vpop.permute.xlu1 %1972 }
 0x453   :  { %v2706_v14 = vpop.f32.mrb[76].mxu1  ;;  %5914 = vrot.lane.b32.xlu0 %v7392_v23, %s6288_s29  ;;  %4982 = vmatprep.subr.bf16.mxu0 %v4981_v29  ;;  %v2812_v8 = vmax.f32 %v5258_v43, 0.0 }
 0x454   :  { %v5259_v26 = vadd.f32 %v2706_v14, %v1948_v25  ;;  %v2708_v47 = vpop.f32.mrb[77].mxu1  ;;  %4984 = vmatpush1.bf16.msra.mxu0 %v4983_v24 }
 0x455   :  { %v5260_v35 = vadd.f32 %v2708_v47, %v1948_v25  ;;  %v1978_v25 = vpop.permute.xlu0 %1977 }
 0x456   :  { %v2813_v36 = vmax.f32 %v5259_v26, 0.0 }
 0x457   :  { %v2814_v40 = vmax.f32 %v5260_v35, 0.0  ;;  %v2712_v50 = vpop.f32.mrb[78].mxu1 }
 0x458   :  { %v7398_v54 = vpack.i.bf16 %v2813_v36, %v2811_v33  ;;  %v4987_v57 = vpack.c.bf16 %v2813_v36, %v2811_v33  ;;  %v2714_v53 = vpop.f32.mrb[79].mxu1  ;;  %v5261_v51 = vadd.f32 %v2712_v50, %v1953_v56 }
 0x459   :  { %v7400_v59 = vpack.i.bf16 %v2814_v40, %v2812_v8  ;;  %v4985_v2 = vpack.c.bf16 %v2814_v40, %v2812_v8  ;;  %v5262_v46 = vadd.f32 %v2714_v53, %v1953_v56  ;;  %v1983_v53 = vpop.permute.xlu1 %1982 }
 0x45a   :  { %5919 = vrot.lane.b32.xlu1 %v7398_v54, %s6288_s29  ;;  %v2815_v34 = vmax.f32 %v5261_v51, 0.0  ;;  %v1988_v51 = vpop.permute.xlu0 %1987 }
 0x45b   :  { %v2718_v21 = vpop.f32.mrb[80].mxu1  ;;  %5924 = vrot.lane.b32.xlu0 %v7400_v59, %s6288_s29  ;;  %4986 = vmatprep.subr.bf16.mxu0 %v4985_v2  ;;  %v2816_v55 = vmax.f32 %v5262_v46, 0.0 }
 0x45c   :  { %v5263_v45 = vadd.f32 %v2718_v21, %v1958_v62  ;;  %v2720_v3 = vpop.f32.mrb[81].mxu1  ;;  %4988 = vmatpush1.bf16.msra.mxu0 %v4987_v57 }
 0x45d   :  { %v5264_v9 = vadd.f32 %v2720_v3, %v1958_v62 }
 0x45e   :  { %v2817_v38 = vmax.f32 %v5263_v45, 0.0 }
 0x45f   :  { %v2818_v4 = vmax.f32 %v5264_v9, 0.0  ;;  %v2724_v17 = vpop.f32.mrb[82].mxu1 }
 0x460   :  { %v7406_v58 = vpack.i.bf16 %v2817_v38, %v2815_v34  ;;  %v4991_v12 = vpack.c.bf16 %v2817_v38, %v2815_v34  ;;  %v2726_v60 = vpop.f32.mrb[83].mxu1  ;;  %v5265_v5 = vadd.f32 %v2724_v17, %v1963_v48 }
 0x461   :  { %v7408_v32 = vpack.i.bf16 %v2818_v4, %v2816_v55  ;;  %v4989_v20 = vpack.c.bf16 %v2818_v4, %v2816_v55  ;;  %v5266_v0 = vadd.f32 %v2726_v60, %v1963_v48 }
 0x462   :  { %5929 = vrot.lane.b32.xlu1 %v7406_v58, %s6288_s29  ;;  %v2819_v43 = vmax.f32 %v5265_v5, 0.0 }
 0x463   :  { %v2730_v24 = vpop.f32.mrb[84].mxu1  ;;  %5934 = vrot.lane.b32.xlu0 %v7408_v32, %s6288_s29  ;;  %4990 = vmatprep.subr.bf16.mxu0 %v4989_v20  ;;  %v2820_v26 = vmax.f32 %v5266_v0, 0.0 }
 0x464   :  { %v5267_v6 = vadd.f32 %v2730_v24, %v1968_v27  ;;  %v2732_v41 = vpop.f32.mrb[85].mxu1  ;;  %4992 = vmatpush1.bf16.msra.mxu0 %v4991_v12  ;;  %v1998_v12 = vpop.permute.xlu0 %1997 }
 0x465   :  { %v5268_v29 = vadd.f32 %v2732_v41, %v1968_v27  ;;  %v1993_v27 = vpop.permute.xlu1 %1992 }
 0x466   :  { %v2821_v14 = vmax.f32 %v5267_v6, 0.0 }
 0x467   :  { %v2822_v47 = vmax.f32 %v5268_v29, 0.0  ;;  %v2736_v35 = vpop.f32.mrb[86].mxu1 }
 0x468   :  { %v7414_v33 = vpack.i.bf16 %v2821_v14, %v2819_v43  ;;  %v4995_v36 = vpack.c.bf16 %v2821_v14, %v2819_v43  ;;  %v2738_v8 = vpop.f32.mrb[87].mxu1  ;;  %v5269_v50 = vadd.f32 %v2736_v35, %v1973_v28  ;;  %v5825_v29 = vpop.permute.xlu0 %5824 }
 0x469   :  { %v7416_v40 = vpack.i.bf16 %v2822_v47, %v2820_v26  ;;  %v4993_v57 = vpack.c.bf16 %v2822_v47, %v2820_v26  ;;  %v5270_v56 = vadd.f32 %v2738_v8, %v1973_v28  ;;  %v5820_v28 = vpop.permute.xlu1 %5819 }
 0x46a   :  { %5939 = vrot.lane.b32.xlu1 %v7414_v33, %s6288_s29  ;;  %v2823_v45 = vmax.f32 %v5269_v50, 0.0  ;;  %v5821_v50 = vunpack.i.l.bf16 %v5820_v28 }
 0x46b   :  { %v2742_v62 = vpop.f32.mrb[88].mxu1  ;;  %5944 = vrot.lane.b32.xlu0 %v7416_v40, %s6288_s29  ;;  %4994 = vmatprep.subr.bf16.mxu0 %v4993_v57  ;;  %v2824_v9 = vmax.f32 %v5270_v56, 0.0  ;;  %v5826_v57 = vunpack.i.l.bf16 %v5825_v29  ;;  %v5822_v56 = vunpack.i.h.bf16 %v5820_v28 }
 0x46c   :  { %v5271_v2 = vadd.f32 %v2742_v62, %v1978_v25  ;;  %v2744_v46 = vpop.f32.mrb[89].mxu1  ;;  %4996 = vmatpush1.bf16.msra.mxu0 %v4995_v36  ;;  %v5827_v62 = vunpack.i.h.bf16 %v5825_v29 }
 0x46d   :  { %v5272_v21 = vadd.f32 %v2744_v46, %v1978_v25  ;;  %v5830_v46 = vpop.permute.xlu1 %5829 }
 0x46e   :  { %v2825_v3 = vmax.f32 %v5271_v2, 0.0 }
 0x46f   :  { %v2826_v34 = vmax.f32 %v5272_v21, 0.0  ;;  %v2748_v38 = vpop.f32.mrb[90].mxu1 }
 0x470   :  { %v7422_v48 = vpack.i.bf16 %v2825_v3, %v2823_v45  ;;  %v4999_v55 = vpack.c.bf16 %v2825_v3, %v2823_v45  ;;  %v2750_v4 = vpop.f32.mrb[91].mxu1  ;;  %v5273_v60 = vadd.f32 %v2748_v38, %v1983_v53  ;;  %v5835_v3 = vpop.permute.xlu0 %5834 }
 0x471   :  { %v7424_v17 = vpack.i.bf16 %v2826_v34, %v2824_v9  ;;  %v4997_v5 = vpack.c.bf16 %v2826_v34, %v2824_v9  ;;  %v5274_v20 = vadd.f32 %v2750_v4, %v1983_v53  ;;  %v5832_v4 = vunpack.i.h.bf16 %v5830_v46  ;;  %v5840_v28 = vpop.permute.xlu1 %5839 }
 0x472   :  { %5949 = vrot.lane.b32.xlu1 %v7422_v48, %s6288_s29  ;;  %v2827_v25 = vmax.f32 %v5273_v60, 0.0 }
 0x473   :  { %v2754_v0 = vpop.f32.mrb[92].mxu1  ;;  %5954 = vrot.lane.b32.xlu0 %v7424_v17, %s6288_s29  ;;  %4998 = vmatprep.subr.bf16.mxu0 %v4997_v5  ;;  %v2828_v14 = vmax.f32 %v5274_v20, 0.0  ;;  %v3060_v20 = vsel %vm421_vm4, %v5827_v62, %v5822_v56 }
 0x474   :  { %v5275_v24 = vadd.f32 %v2754_v0, %v1988_v51  ;;  %v2756_v6 = vpop.f32.mrb[93].mxu1  ;;  %5000 = vmatpush1.bf16.msra.mxu0 %v4999_v55  ;;  %v3059_v55 = vsel %vm421_vm4, %v5826_v57, %v5821_v50  ;;  %v5837_v0 = vunpack.i.h.bf16 %v5835_v3  ;;  %v5845_v29 = vpop.permute.xlu0 %5844 }
 0x475   :  { %v5276_v41 = vadd.f32 %v2756_v6, %v1988_v51 }
 0x476   :  { %v2829_v43 = vmax.f32 %v5275_v24, 0.0 }
 0x477   :  { %v2830_v26 = vmax.f32 %v5276_v41, 0.0  ;;  %v2760_v47 = vpop.f32.mrb[94].mxu1  ;;  %v5836_v41 = vunpack.i.l.bf16 %v5835_v3 }
 0x478   :  { %v7430_v35 = vpack.i.bf16 %v2829_v43, %v2827_v25  ;;  %v5003_v36 = vpack.c.bf16 %v2829_v43, %v2827_v25  ;;  %v2762_v8 = vpop.f32.mrb[95].mxu1  ;;  %v5277_v2 = vadd.f32 %v2760_v47, %v1993_v27  ;;  %v3028_v47 = vsel %vm421_vm4, %v5822_v56, %v5827_v62  ;;  %v3418_v62 = vld [vmem:[%s8241_s10 + $0x38] sm:$0xff] }
 0x479   :  { %v7432_v53 = vpack.i.bf16 %v2830_v26, %v2828_v14  ;;  %v5001_v51 = vpack.c.bf16 %v2830_v26, %v2828_v14  ;;  %v5278_v21 = vadd.f32 %v2762_v8, %v1993_v27  ;;  %v5831_v27 = vunpack.i.l.bf16 %v5830_v46 }
 0x47a   :  { %5959 = vrot.lane.b32.xlu1 %v7430_v35, %s6288_s29  ;;  %v2831_v60 = vmax.f32 %v5277_v2, 0.0  ;;  %v3027_v26 = vsel %vm421_vm4, %v5821_v50, %v5826_v57  ;;  %v5842_v8 = vunpack.i.h.bf16 %v5840_v28  ;;  %v5841_v2 = vunpack.i.l.bf16 %v5840_v28  ;;  %v3411_v50 = vld [vmem:[%s8241_s10] sm:$0xff] }
 0x47b   :  { %v2766_v45 = vpop.f32.mrb[96].mxu1  ;;  %5964 = vrot.lane.b32.xlu0 %v7432_v53, %s6288_s29  ;;  %5002 = vmatprep.subr.bf16.mxu0 %v5001_v51  ;;  %v2832_v24 = vmax.f32 %v5278_v21, 0.0  ;;  %v5847_v51 = vunpack.i.h.bf16 %v5845_v29  ;;  %v5846_v46 = vunpack.i.l.bf16 %v5845_v29  ;;  %v5850_v21 = vpop.permute.xlu1 %5849  ;;  %v3061_v57 = vsel %vm421_vm4, %v5836_v41, %v5831_v27 }
 0x47c   :  { %v5279_v9 = vadd.f32 %v2766_v45, %v1998_v12  ;;  %v2768_v34 = vpop.f32.mrb[97].mxu1  ;;  %5004 = vmatpush1.bf16.msra.mxu0 %v5003_v36  ;;  %v5009_v36 = vpack.c.bf16 %v3060_v20, %v3059_v55  ;;  %v5855_v45 = vpop.permute.xlu0 %5854  ;;  %v3062_v56 = vsel %vm421_vm4, %v5837_v0, %v5832_v4  ;;  %v5011_v3 = vpack.c.bf16 %v3028_v47, %v3027_v26 }
 0x47d   :  { %v5280_v38 = vadd.f32 %v2768_v34, %v1998_v12  ;;  %v3030_v34 = vsel %vm421_vm4, %v5832_v4, %v5837_v0  ;;  %v3063_v55 = vsel %vm421_vm4, %v5846_v46, %v5841_v2  ;;  %v5851_v20 = vunpack.i.l.bf16 %v5850_v21 }
 0x47e   :  { %v2833_v5 = vmax.f32 %v5279_v9, 0.0  ;;  %v3029_v9 = vsel %vm421_vm4, %v5831_v27, %v5836_v41  ;;  %v5857_v27 = vunpack.i.h.bf16 %v5855_v45  ;;  %v3031_v41 = vsel %vm421_vm4, %v5841_v2, %v5846_v46 }
 0x47f   :  { %v2834_v6 = vmax.f32 %v5280_v38, 0.0  ;;  %v5013_v38 = vpack.c.bf16 %v3062_v56, %v3061_v57  ;;  %v5015_v0 = vpack.c.bf16 %v3030_v34, %v3029_v9  ;;  %v3032_v28 = vsel %vm421_vm4, %v5842_v8, %v5847_v51 }
 0x480   :  { %v7442_v25 = vpack.i.bf16 %v2833_v5, %v2831_v60  ;;  %v5007_v12 = vpack.c.bf16 %v2833_v5, %v2831_v60  ;;  %v3064_v60 = vsel %vm421_vm4, %v5847_v51, %v5842_v8  ;;  %v5852_v5 = vunpack.i.h.bf16 %v5850_v21  ;;  %v5865_v4 = vpop.permute.xlu0 %5864 }
 0x481   :  { %v7444_v43 = vpack.i.bf16 %v2834_v6, %v2832_v24  ;;  %v5005_v14 = vpack.c.bf16 %v2834_v6, %v2832_v24  ;;  %v5856_v24 = vunpack.i.l.bf16 %v5855_v45  ;;  %v5860_v6 = vpop.permute.xlu1 %5859  ;;  %v5017_v29 = vpack.c.bf16 %v3064_v60, %v3063_v55 }
 0x482   :  { %5969 = vrot.lane.b32.xlu1 %v7442_v25, %s6288_s29  ;;  %v5867_v26 = vunpack.i.h.bf16 %v5865_v4  ;;  %v5866_v47 = vunpack.i.l.bf16 %v5865_v4  ;;  %v3066_v8 = vsel %vm421_vm4, %v5857_v27, %v5852_v5  ;;  %v5019_v51 = vpack.c.bf16 %v3032_v28, %v3031_v41 }
 0x483   :  { %5979 = vrot.lane.b32.xlu0 %v7444_v43, %s6288_s29  ;;  %5006 = vmatprep.subr.bf16.mxu0 %v5005_v14  ;;  %v5861_v14 = vunpack.i.l.bf16 %v5860_v6  ;;  %v3065_v2 = vsel %vm421_vm4, %v5856_v24, %v5851_v20  ;;  %v3033_v46 = vsel %vm421_vm4, %v5851_v20, %v5856_v24  ;;  %v3034_v45 = vsel %vm421_vm4, %v5852_v5, %v5857_v27 }
 0x484   :  { %5008 = vmatpush1.bf16.msra.mxu0 %v5007_v12  ;;  %v5862_v12 = vunpack.i.h.bf16 %v5860_v6  ;;  %v5875_v21 = vpop.permute.xlu0 %5874  ;;  %v5023_v60 = vpack.c.bf16 %v3034_v45, %v3033_v46 }
 0x485   :  { %5010 = vmatprep.subr.bf16.mxu0 %v5009_v36  ;;  %v5870_v36 = vpop.permute.xlu1 %5869  ;;  %v3067_v57 = vsel %vm421_vm4, %v5866_v47, %v5861_v14  ;;  %v5877_v9 = vunpack.i.h.bf16 %v5875_v21  ;;  %v5876_v34 = vunpack.i.l.bf16 %v5875_v21  ;;  %v3035_v5 = vsel %vm421_vm4, %v5861_v14, %v5866_v47 }
 0x486   :  { %5974 = vrot.lane.b32.xlu1 %v7269_v39, %s6287_s8  ;;  %v3417_v39 = vld [vmem:[%s8241_s10 + $0x30] sm:$0xff]  ;;  %v3068_v56 = vsel %vm421_vm4, %v5867_v26, %v5862_v12  ;;  %v3036_v20 = vsel %vm421_vm4, %v5862_v12, %v5867_v26 }
 0x487   :  { %5984 = vrot.lane.b32.xlu0 %v7273_v16, %s6287_s8  ;;  %3860 = vmatmul.mubr.f32.vlgmr.msra.gmra.mrb[36].mxu0 %v3411_v50  ;;  %v3424_v16 = vld [vmem:[%s8241_s10 + $0x68] sm:$0xff]  ;;  %v5021_v50 = vpack.c.bf16 %v3066_v8, %v3065_v2  ;;  %v5025_v27 = vpack.c.bf16 %v3068_v56, %v3067_v57  ;;  %v3454_v56 = vld [vmem:[%s8241_s10 + $0x158] sm:$0xff] }
 0x488   :  { %5012 = vmatpush1.bf16.msra.mxu0 %v5011_v3  ;;  %3865 = vmatprep.mubr.f32.mxu0 %v3418_v62  ;;  %v5872_v62 = vunpack.i.h.bf16 %v5870_v36  ;;  %v5871_v3 = vunpack.i.l.bf16 %v5870_v36  ;;  %v5885_v55 = vpop.permute.xlu0 %5884 }
 0x489   :  { %5014 = vmatprep.subr.bf16.mxu0 %v5013_v38  ;;  %v5880_v38 = vpop.permute.xlu1 %5879  ;;  %v5887_v4 = vunpack.i.h.bf16 %v5885_v55 }
 0x48a   :  { %5989 = vrot.lane.b32.xlu1 %v7285_v13, %s6287_s8  ;;  %v3423_v13 = vld [vmem:[%s8241_s10 + $0x60] sm:$0xff]  ;;  %v5882_v24 = vunpack.i.h.bf16 %v5880_v38  ;;  %v5881_v6 = vunpack.i.l.bf16 %v5880_v38  ;;  %v3037_v12 = vsel %vm421_vm4, %v5871_v3, %v5876_v34  ;;  %v3038_v14 = vsel %vm421_vm4, %v5872_v62, %v5877_v9 }
 0x48b   :  { %5994 = vrot.lane.b32.xlu0 %v7290_v18, %s6287_s8  ;;  %3866 = vmatmul.mubr.f32.gmra.mrb[38].mxu0 %v3417_v39  ;;  %v3430_v18 = vld [vmem:[%s8241_s10 + $0x98] sm:$0xff]  ;;  %v5886_v39 = vunpack.i.l.bf16 %v5885_v55 }
 0x48c   :  { %5016 = vmatpush1.bf16.msra.mxu0 %v5015_v0  ;;  %3871 = vmatprep.mubr.f32.mxu0 %v3424_v16  ;;  %v3069_v16 = vsel %vm421_vm4, %v5876_v34, %v5871_v3  ;;  %v3070_v0 = vsel %vm421_vm4, %v5877_v9, %v5872_v62  ;;  %v5895_v28 = vpop.permute.xlu0 %5894  ;;  %v3072_v36 = vsel %vm421_vm4, %v5887_v4, %v5882_v24  ;;  %v3453_v34 = vld [vmem:[%s8241_s10 + $0x150] sm:$0xff]  ;;  %v3466_v55 = vld [vmem:[%s8241_s10 + $0x1b8] sm:$0xff] }
 0x48d   :  { %5018 = vmatprep.subr.bf16.mxu0 %v5017_v29  ;;  %v5890_v41 = vpop.permute.xlu1 %5889  ;;  %v5027_v29 = vpack.c.bf16 %v3036_v20, %v3035_v5  ;;  %v5029_v26 = vpack.c.bf16 %v3070_v0, %v3069_v16  ;;  %v3071_v47 = vsel %vm421_vm4, %v5886_v39, %v5881_v6  ;;  %v5897_v8 = vunpack.i.h.bf16 %v5895_v28  ;;  %v3502_v5 = vld [vmem:[%s8241_s10 + $0x2d8] sm:$0xff] }
 0x48e   :  { %5999 = vrot.lane.b32.xlu1 %v7305_v49, %s6287_s8  ;;  %v3429_v49 = vld [vmem:[%s8241_s10 + $0x90] sm:$0xff]  ;;  %v5892_v21 = vunpack.i.h.bf16 %v5890_v41  ;;  %v5891_v2 = vunpack.i.l.bf16 %v5890_v41  ;;  %v3040_v46 = vsel %vm421_vm4, %v5882_v24, %v5887_v4  ;;  %v5033_v45 = vpack.c.bf16 %v3072_v36, %v3071_v47  ;;  %v3414_v16 = vld [vmem:[%s8241_s10 + $0x18] sm:$0xff] }
 0x48f   :  { %6004 = vrot.lane.b32.xlu0 %v7310_v15, %s6287_s8  ;;  %3872 = vmatmul.mubr.f32.gmra.mrb[40].mxu0 %v3423_v13  ;;  %v3436_v15 = vld [vmem:[%s8241_s10 + $0xc8] sm:$0xff]  ;;  %v5896_v13 = vunpack.i.l.bf16 %v5895_v28 }
 0x490   :  { %5020 = vmatpush1.bf16.msra.mxu0 %v5019_v51  ;;  %3877 = vmatprep.mubr.f32.mxu0 %v3430_v18  ;;  %v5031_v18 = vpack.c.bf16 %v3038_v14, %v3037_v12  ;;  %v3039_v51 = vsel %vm421_vm4, %v5881_v6, %v5886_v39  ;;  %v3074_v57 = vsel %vm421_vm4, %v5897_v8, %v5892_v21 }
 0x491   :  { %5022 = vmatprep.subr.bf16.mxu0 %v5021_v50  ;;  %v3073_v50 = vsel %vm421_vm4, %v5896_v13, %v5891_v2  ;;  %v3041_v62 = vsel %vm421_vm4, %v5891_v2, %v5896_v13  ;;  %v3042_v3 = vsel %vm421_vm4, %v5892_v21, %v5897_v8  ;;  %v3703_v8 = vld [vmem:[%s8242_s11 + $0x20] sm:$0xff] }
 0x492   :  { %6009 = vrot.lane.b32.xlu1 %v7323_v63, %s6287_s8  ;;  %v3435_v63 = vld [vmem:[%s8241_s10 + $0xc0] sm:$0xff]  ;;  %v5037_v9 = vpack.c.bf16 %v3074_v57, %v3073_v50  ;;  %v5039_v38 = vpack.c.bf16 %v3042_v3, %v3041_v62  ;;  %v3705_v50 = vld [vmem:[%s8242_s11 + $0x30] sm:$0xff] }
 0x493   :  { %6014 = vrot.lane.b32.xlu0 %v7326_v19, %s6287_s8  ;;  %3878 = vmatmul.mubr.f32.gmra.mrb[42].mxu0 %v3429_v49  ;;  %v3442_v19 = vld [vmem:[%s8241_s10 + $0xf8] sm:$0xff] }
 0x494   :  { %5024 = vmatpush1.bf16.msra.mxu0 %v5023_v60  ;;  %3883 = vmatprep.mubr.f32.mxu0 %v3436_v15 }
 0x495   :  { %5026 = vmatprep.subr.bf16.mxu0 %v5025_v27 }
 0x496   :  { %6019 = vrot.lane.b32.xlu1 %v7335_v37, %s6287_s8  ;;  %v3441_v37 = vld [vmem:[%s8241_s10 + $0xf0] sm:$0xff] }
 0x497   :  { %6024 = vrot.lane.b32.xlu0 %v7338_v31, %s6287_s8  ;;  %3884 = vmatmul.mubr.f32.gmra.mrb[44].mxu0 %v3435_v63  ;;  %v3448_v31 = vld [vmem:[%s8241_s10 + $0x128] sm:$0xff] }
 0x498   :  { %5028 = vmatpush1.bf16.msra.mxu0 %v5027_v29  ;;  %3889 = vmatprep.mubr.f32.mxu0 %v3442_v19  ;;  %v3701_v29 = vld [vmem:[%s8242_s11 + $0x10] sm:$0xff] }
 0x499   :  { %5030 = vmatprep.subr.bf16.mxu0 %v5029_v26  ;;  %v3702_v26 = vld [vmem:[%s8242_s11 + $0x18] sm:$0xff] }
 0x49a   :  { %6029 = vrot.lane.b32.xlu1 %v7347_v61, %s6287_s8  ;;  %v3447_v61 = vld [vmem:[%s8241_s10 + $0x120] sm:$0xff] }
 0x49b   :  { %6034 = vrot.lane.b32.xlu0 %v7350_v11, %s6287_s8  ;;  %3890 = vmatmul.mubr.f32.gmra.mrb[46].mxu0 %v3441_v37  ;;  %v5035_v11 = vpack.c.bf16 %v3040_v46, %v3039_v51  ;;  %v3704_v37 = vld [vmem:[%s8242_s11 + $0x28] sm:$0xff] }
 0x49c   :  { %5032 = vmatpush1.bf16.msra.mxu0 %v5031_v18  ;;  %3895 = vmatprep.mubr.f32.mxu0 %v3448_v31 }
 0x49d   :  { %5034 = vmatprep.subr.bf16.mxu0 %v5033_v45 }
 0x49e   :  { %6039 = vrot.lane.b32.xlu1 %v7359_v30, %s6287_s8  ;;  %v3460_v30 = vld [vmem:[%s8241_s10 + $0x188] sm:$0xff] }
 0x49f   :  { %6044 = vrot.lane.b32.xlu0 %v7362_v22, %s6287_s8  ;;  %3896 = vmatmul.mubr.f32.gmra.mrb[48].mxu0 %v3447_v61  ;;  %v3459_v22 = vld [vmem:[%s8241_s10 + $0x180] sm:$0xff] }
 0x4a0   :  { %5036 = vmatpush1.bf16.msra.mxu0 %v5035_v11  ;;  %3901 = vmatprep.mubr.f32.mxu0 %v3454_v56  ;;  %v3706_v56 = vld [vmem:[%s8242_s11 + $0x38] sm:$0xff] }
 0x4a1   :  { %5038 = vmatprep.subr.bf16.mxu0 %v5037_v9 }
 0x4a2   :  { %6049 = vrot.lane.b32.xlu1 %v7371_v44, %s6287_s8  ;;  %v3465_v44 = vld [vmem:[%s8241_s10 + $0x1b0] sm:$0xff] }
 0x4a3   :  { %6054 = vrot.lane.b32.xlu0 %v7373_v52, %s6287_s8  ;;  %3902 = vmatmul.mubr.f32.gmra.mrb[50].mxu0 %v3453_v34  ;;  %v3472_v52 = vld [vmem:[%s8241_s10 + $0x1e8] sm:$0xff]  ;;  %v3707_v34 = vld [vmem:[%s8242_s11 + $0x40] sm:$0xff] }
 0x4a4   :  { %5040 = vmatpush1.bf16.msra.mxu0 %v5039_v38  ;;  %3907 = vmatprep.mubr.f32.mxu0 %v3460_v30  ;;  %v3708_v38 = vld [vmem:[%s8242_s11 + $0x48] sm:$0xff] }
 0x4a6   :  { %6059 = vrot.lane.b32.xlu1 %v7382_v1, %s6287_s8  ;;  %v3471_v1 = vld [vmem:[%s8241_s10 + $0x1e0] sm:$0xff] }
 0x4a7   :  { %6064 = vrot.lane.b32.xlu0 %v7384_v10, %s6287_s8  ;;  %3908 = vmatmul.mubr.f32.gmra.mrb[52].mxu0 %v3459_v22  ;;  %v3478_v10 = vld [vmem:[%s8241_s10 + $0x218] sm:$0xff] }
 0x4a8   :  { %3913 = vmatprep.mubr.f32.mxu0 %v3466_v55 }
 0x4aa   :  { %6069 = vrot.lane.b32.xlu1 %v7390_v7, %s6287_s8  ;;  %v3477_v7 = vld [vmem:[%s8241_s10 + $0x210] sm:$0xff] }
 0x4ab   :  { %6074 = vrot.lane.b32.xlu0 %v7392_v23, %s6287_s8  ;;  %3914 = vmatmul.mubr.f32.gmra.mrb[54].mxu0 %v3465_v44  ;;  %v3484_v23 = vld [vmem:[%s8241_s10 + $0x248] sm:$0xff] }
 0x4ac   :  { %3919 = vmatprep.mubr.f32.mxu0 %v3472_v52 }
 0x4ae   :  { %6079 = vrot.lane.b32.xlu1 %v7398_v54, %s6287_s8  ;;  %v3483_v54 = vld [vmem:[%s8241_s10 + $0x240] sm:$0xff] }
 0x4af   :  { %6084 = vrot.lane.b32.xlu0 %v7400_v59, %s6287_s8  ;;  %3920 = vmatmul.mubr.f32.gmra.mrb[56].mxu0 %v3471_v1  ;;  %v3490_v59 = vld [vmem:[%s8241_s10 + $0x278] sm:$0xff] }
 0x4b0   :  { %3925 = vmatprep.mubr.f32.mxu0 %v3478_v10  ;;  %v3709_v10 = vld [vmem:[%s8242_s11 + $0x50] sm:$0xff] }
 0x4b2   :  { %6089 = vrot.lane.b32.xlu1 %v7406_v58, %s6287_s8  ;;  %v3489_v58 = vld [vmem:[%s8241_s10 + $0x270] sm:$0xff] }
 0x4b3   :  { %6094 = vrot.lane.b32.xlu0 %v7408_v32, %s6287_s8  ;;  %3926 = vmatmul.mubr.f32.gmra.mrb[58].mxu0 %v3477_v7  ;;  %v3496_v32 = vld [vmem:[%s8241_s10 + $0x2a8] sm:$0xff] }
 0x4b4   :  { %3931 = vmatprep.mubr.f32.mxu0 %v3484_v23 }
 0x4b6   :  { %6099 = vrot.lane.b32.xlu1 %v7414_v33, %s6287_s8 }
 0x4b7   :  { %6104 = vrot.lane.b32.xlu0 %v7416_v40, %s6287_s8  ;;  %3932 = vmatmul.mubr.f32.gmra.mrb[60].mxu0 %v3483_v54  ;;  %v3495_v40 = vld [vmem:[%s8241_s10 + $0x2a0] sm:$0xff]  ;;  %v3710_v54 = vld [vmem:[%s8242_s11 + $0x58] sm:$0xff] }
 0x4b8   :  { %3937 = vmatprep.mubr.f32.mxu0 %v3490_v59 }
 0x4ba   :  { %6109 = vrot.lane.b32.xlu1 %v7422_v48, %s6287_s8 }
 0x4bb   :  { %6114 = vrot.lane.b32.xlu0 %v7424_v17, %s6287_s8  ;;  %3938 = vmatmul.mubr.f32.gmra.mrb[62].mxu0 %v3489_v58 }
 0x4bc   :  { %v5900_v33 = vpop.permute.xlu1 %5899  ;;  %3943 = vmatprep.mubr.f32.mxu0 %v3496_v32 }
 0x4bd   :  { %v5902_v49 = vunpack.i.h.bf16 %v5900_v33  ;;  %v5901_v15 = vunpack.i.l.bf16 %v5900_v33  ;;  %v5905_v60 = vpop.permute.xlu0 %5904 }
 0x4be   :  { %v5907_v20 = vunpack.i.h.bf16 %v5905_v60  ;;  %v5906_v27 = vunpack.i.l.bf16 %v5905_v60  ;;  %6119 = vrot.lane.b32.xlu1 %v7430_v35, %s6287_s8  ;;  %v3501_v35 = vld [vmem:[%s8241_s10 + $0x2d0] sm:$0xff] }
 0x4bf   :  { %6124 = vrot.lane.b32.xlu0 %v7432_v53, %s6287_s8  ;;  %3944 = vmatmul.mubr.f32.gmra.mrb[64].mxu0 %v3495_v40  ;;  %v3699_v53 = vld [vmem:[%s8242_s11] sm:$0xff] }
 0x4c0   :  { %v3043_v48 = vsel %vm421_vm4, %v5901_v15, %v5906_v27  ;;  %v3044_v17 = vsel %vm421_vm4, %v5902_v49, %v5907_v20  ;;  %v3075_v24 = vsel %vm421_vm4, %v5906_v27, %v5901_v15  ;;  %v3076_v6 = vsel %vm421_vm4, %v5907_v20, %v5902_v49  ;;  %3949 = vmatprep.mubr.f32.mxu0 %v3502_v5  ;;  %v3711_v40 = vld [vmem:[%s8242_s11 + $0x60] sm:$0xff]  ;;  %v3712_v15 = vld [vmem:[%s8242_s11 + $0x68] sm:$0xff] }
 0x4c1   :  { %v5043_v4 = vpack.c.bf16 %v3044_v17, %v3043_v48  ;;  %v5041_v39 = vpack.c.bf16 %v3076_v6, %v3075_v24  ;;  %v3713_v17 = vld [vmem:[%s8242_s11 + $0x70] sm:$0xff] }
 0x4c2   :  { %6129 = vrot.lane.b32.xlu1 %v7442_v25, %s6287_s8  ;;  %v3700_v25 = vld [vmem:[%s8242_s11 + $0x8] sm:$0xff] }
 0x4c3   :  { %6134 = vrot.lane.b32.xlu0 %v7444_v43, %s6287_s8  ;;  %5042 = vmatprep.subr.bf16.mxu0 %v5041_v39 }
 0x4c4   :  { %v5910_v0 = vpop.permute.xlu1 %5909  ;;  %5044 = vmatpush1.bf16.msra.mxu0 %v5043_v4  ;;  %v3714_v4 = vld [vmem:[%s8242_s11 + $0x78] sm:$0xff] }
 0x4c5   :  { %v5912_v63 = vunpack.i.h.bf16 %v5910_v0  ;;  %v5911_v41 = vunpack.i.l.bf16 %v5910_v0  ;;  %v5915_v28 = vpop.permute.xlu0 %5914  ;;  %3950 = vmatmul.mubr.f32.gmra.mrb[66].mxu0 %v3501_v35 }
 0x4c6   :  { %v5917_v43 = vunpack.i.h.bf16 %v5915_v28  ;;  %v5916_v19 = vunpack.i.l.bf16 %v5915_v28  ;;  %3717 = vperm.xlu1 %5497, %v3699_v53   ;;  %4020 = vmatprep.mubr.f32.mxu0 %v3414_v16 }
 0x4c7   :  { %3722 = vperm.xlu0 %5496, %v3700_v25  }
 0x4c8   :  { %v3045_v12 = vsel %vm421_vm4, %v5911_v41, %v5916_v19  ;;  %v3046_v14 = vsel %vm421_vm4, %v5912_v63, %v5917_v43  ;;  %v3077_v47 = vsel %vm421_vm4, %v5916_v19, %v5911_v41  ;;  %v3078_v36 = vsel %vm421_vm4, %v5917_v43, %v5912_v63 }
 0x4c9   :  { %v5047_v21 = vpack.c.bf16 %v3046_v14, %v3045_v12  ;;  %v5045_v2 = vpack.c.bf16 %v3078_v36, %v3077_v47 }
 0x4ca   :  { %3727 = vperm.xlu1 %5497, %v3701_v29  }
 0x4cb   :  { %3732 = vperm.xlu0 %5496, %v3702_v26   ;;  %5046 = vmatprep.subr.bf16.mxu0 %v5045_v2 }
 0x4cc   :  { %v5920_v13 = vpop.permute.xlu1 %5919  ;;  %5048 = vmatpush1.bf16.msra.mxu0 %v5047_v21 }
 0x4cd   :  { %v5922_v31 = vunpack.i.h.bf16 %v5920_v13  ;;  %v5921_v18 = vunpack.i.l.bf16 %v5920_v13  ;;  %v5925_v51 = vpop.permute.xlu0 %5924 }
 0x4ce   :  { %v5927_v46 = vunpack.i.h.bf16 %v5925_v51  ;;  %v5926_v45 = vunpack.i.l.bf16 %v5925_v51  ;;  %3737 = vperm.xlu1 %5497, %v3703_v8  }
 0x4cf   :  { %3742 = vperm.xlu0 %5496, %v3704_v37  }
 0x4d0   :  { %v3047_v57 = vsel %vm421_vm4, %v5921_v18, %v5926_v45  ;;  %v3048_v61 = vsel %vm421_vm4, %v5922_v31, %v5927_v46  ;;  %v3079_v11 = vsel %vm421_vm4, %v5926_v45, %v5921_v18  ;;  %v3080_v62 = vsel %vm421_vm4, %v5927_v46, %v5922_v31 }
 0x4d1   :  { %v5051_v3 = vpack.c.bf16 %v3048_v61, %v3047_v57  ;;  %v5049_v9 = vpack.c.bf16 %v3080_v62, %v3079_v11 }
 0x4d2   :  { %3747 = vperm.xlu1 %5497, %v3705_v50  }
 0x4d3   :  { %3752 = vperm.xlu0 %5496, %v3706_v56   ;;  %5050 = vmatprep.subr.bf16.mxu0 %v5049_v9 }
 0x4d4   :  { %v5930_v30 = vpop.permute.xlu1 %5929  ;;  %5052 = vmatpush1.bf16.msra.mxu0 %v5051_v3 }
 0x4d5   :  { %v5932_v22 = vunpack.i.h.bf16 %v5930_v30  ;;  %v5931_v55 = vunpack.i.l.bf16 %v5930_v30  ;;  %v5935_v44 = vpop.permute.xlu0 %5934 }
 0x4d6   :  { %v5937_v52 = vunpack.i.h.bf16 %v5935_v44  ;;  %v5936_v1 = vunpack.i.l.bf16 %v5935_v44  ;;  %3757 = vperm.xlu1 %5497, %v3707_v34  }
 0x4d7   :  { %3762 = vperm.xlu0 %5496, %v3708_v38  }
 0x4d8   :  { %v3049_v7 = vsel %vm421_vm4, %v5931_v55, %v5936_v1  ;;  %v3050_v23 = vsel %vm421_vm4, %v5932_v22, %v5937_v52  ;;  %v3081_v59 = vsel %vm421_vm4, %v5936_v1, %v5931_v55  ;;  %v3082_v58 = vsel %vm421_vm4, %v5937_v52, %v5932_v22 }
 0x4d9   :  { %v5055_v32 = vpack.c.bf16 %v3050_v23, %v3049_v7  ;;  %v5053_v33 = vpack.c.bf16 %v3082_v58, %v3081_v59 }
 0x4da   :  { %3767 = vperm.xlu1 %5497, %v3709_v10  }
 0x4db   :  { %3772 = vperm.xlu0 %5496, %v3710_v54   ;;  %5054 = vmatprep.subr.bf16.mxu0 %v5053_v33 }
 0x4dc   :  { %v5940_v49 = vpop.permute.xlu1 %5939  ;;  %5056 = vmatpush1.bf16.msra.mxu0 %v5055_v32  ;;  %v3413_v32 = vld [vmem:[%s8241_s10 + $0x10] sm:$0xff] }
 0x4dd   :  { %v5942_v60 = vunpack.i.h.bf16 %v5940_v49  ;;  %v5941_v5 = vunpack.i.l.bf16 %v5940_v49  ;;  %v5945_v20 = vpop.permute.xlu0 %5944 }
 0x4de   :  { %v5947_v27 = vunpack.i.h.bf16 %v5945_v20  ;;  %v5946_v48 = vunpack.i.l.bf16 %v5945_v20  ;;  %3777 = vperm.xlu1 %5497, %v3711_v40  }
 0x4df   :  { %3782 = vperm.xlu0 %5496, %v3712_v15  }
 0x4e0   :  { %v3051_v24 = vsel %vm421_vm4, %v5941_v5, %v5946_v48  ;;  %v3052_v6 = vsel %vm421_vm4, %v5942_v60, %v5947_v27  ;;  %v3083_v39 = vsel %vm421_vm4, %v5946_v48, %v5941_v5  ;;  %v3084_v35 = vsel %vm421_vm4, %v5947_v27, %v5942_v60  ;;  %v3420_v27 = vld [vmem:[%s8241_s10 + $0x48] sm:$0xff] }
 0x4e1   :  { %v5059_v53 = vpack.c.bf16 %v3052_v6, %v3051_v24  ;;  %v5057_v16 = vpack.c.bf16 %v3084_v35, %v3083_v39  ;;  %v3419_v39 = vld [vmem:[%s8241_s10 + $0x40] sm:$0xff] }
 0x4e2   :  { %3787 = vperm.xlu1 %5497, %v3713_v17  }
 0x4e3   :  { %3792 = vperm.xlu0 %5496, %v3714_v4   ;;  %5058 = vmatprep.subr.bf16.mxu0 %v5057_v16 }
 0x4e4   :  { %v5950_v0 = vpop.permute.xlu1 %5949  ;;  %5060 = vmatpush1.bf16.msra.mxu0 %v5059_v53 }
 0x4e5   :  { %v5952_v25 = vunpack.i.h.bf16 %v5950_v0  ;;  %v5951_v63 = vunpack.i.l.bf16 %v5950_v0  ;;  %v5955_v41 = vpop.permute.xlu0 %5954 }
 0x4e6   :  { %v5957_v28 = vunpack.i.h.bf16 %v5955_v41  ;;  %v5956_v43 = vunpack.i.l.bf16 %v5955_v41  ;;  %v3426_v41 = vld [vmem:[%s8241_s10 + $0x78] sm:$0xff] }
 0x4e8   :  { %v3053_v19 = vsel %vm421_vm4, %v5951_v63, %v5956_v43  ;;  %v3054_v29 = vsel %vm421_vm4, %v5952_v25, %v5957_v28  ;;  %v3085_v12 = vsel %vm421_vm4, %v5956_v43, %v5951_v63  ;;  %v3086_v14 = vsel %vm421_vm4, %v5957_v28, %v5952_v25 }
 0x4e9   :  { %v5063_v26 = vpack.c.bf16 %v3054_v29, %v3053_v19  ;;  %v5061_v47 = vpack.c.bf16 %v3086_v14, %v3085_v12 }
 0x4eb   :  { %5062 = vmatprep.subr.bf16.mxu0 %v5061_v47 }
 0x4ec   :  { %v5960_v36 = vpop.permute.xlu1 %5959  ;;  %5064 = vmatpush1.bf16.msra.mxu0 %v5063_v26  ;;  %v3425_v26 = vld [vmem:[%s8241_s10 + $0x70] sm:$0xff] }
 0x4ed   :  { %v5962_v21 = vunpack.i.h.bf16 %v5960_v36  ;;  %v5961_v2 = vunpack.i.l.bf16 %v5960_v36  ;;  %v5965_v8 = vpop.permute.xlu0 %5964 }
 0x4ee   :  { %v5967_v13 = vunpack.i.h.bf16 %v5965_v8  ;;  %v5966_v37 = vunpack.i.l.bf16 %v5965_v8 }
 0x4f0   :  { %v3055_v31 = vsel %vm421_vm4, %v5961_v2, %v5966_v37  ;;  %v3056_v18 = vsel %vm421_vm4, %v5962_v21, %v5967_v13  ;;  %v3087_v51 = vsel %vm421_vm4, %v5966_v37, %v5961_v2  ;;  %v3088_v46 = vsel %vm421_vm4, %v5967_v13, %v5962_v21  ;;  %v3432_v37 = vld [vmem:[%s8241_s10 + $0xa8] sm:$0xff] }
 0x4f1   :  { %v5067_v45 = vpack.c.bf16 %v3056_v18, %v3055_v31  ;;  %v5065_v50 = vpack.c.bf16 %v3088_v46, %v3087_v51 }
 0x4f3   :  { %5066 = vmatprep.subr.bf16.mxu0 %v5065_v50 }
 0x4f4   :  { %v5970_v57 = vpop.permute.xlu1 %5969  ;;  %5068 = vmatpush1.bf16.msra.mxu0 %v5067_v45 }
 0x4f5   :  { %v5972_v61 = vunpack.i.h.bf16 %v5970_v57  ;;  %v5971_v56 = vunpack.i.l.bf16 %v5970_v57  ;;  %v5980_v11 = vpop.permute.xlu0 %5979  ;;  %v3431_v57 = vld [vmem:[%s8241_s10 + $0xa0] sm:$0xff] }
 0x4f6   :  { %v5982_v62 = vunpack.i.h.bf16 %v5980_v11  ;;  %v5981_v3 = vunpack.i.l.bf16 %v5980_v11 }
 0x4f8   :  { %v3057_v9 = vsel %vm421_vm4, %v5971_v56, %v5981_v3  ;;  %v3058_v34 = vsel %vm421_vm4, %v5972_v61, %v5982_v62  ;;  %v5975_v30 = vpop.permute.xlu1 %5974  ;;  %v3089_v38 = vsel %vm421_vm4, %v5981_v3, %v5971_v56  ;;  %v3090_v22 = vsel %vm421_vm4, %v5982_v62, %v5972_v61 }
 0x4f9   :  { %v5071_v55 = vpack.c.bf16 %v3058_v34, %v3057_v9  ;;  %v5977_v44 = vunpack.i.h.bf16 %v5975_v30  ;;  %v5976_v52 = vunpack.i.l.bf16 %v5975_v30  ;;  %v5985_v1 = vpop.permute.xlu0 %5984  ;;  %v5069_v10 = vpack.c.bf16 %v3090_v22, %v3089_v38  ;;  %v3438_v34 = vld [vmem:[%s8241_s10 + $0xd8] sm:$0xff] }
 0x4fa   :  { %v5987_v7 = vunpack.i.h.bf16 %v5985_v1  ;;  %v5986_v23 = vunpack.i.l.bf16 %v5985_v1  ;;  %v3437_v1 = vld [vmem:[%s8241_s10 + $0xd0] sm:$0xff] }
 0x4fb   :  { %5070 = vmatprep.subr.bf16.mxu0 %v5069_v10 }
 0x4fc   :  { %v3283_v54 = vsel %vm449_vm3, %v5976_v52, %v5986_v23  ;;  %v3284_v59 = vsel %vm449_vm3, %v5977_v44, %v5987_v7  ;;  %v5990_v58 = vpop.permute.xlu1 %5989  ;;  %5072 = vmatpush1.bf16.msra.mxu0 %v5071_v55  ;;  %v3315_v33 = vsel %vm449_vm3, %v5986_v23, %v5976_v52  ;;  %v3316_v40 = vsel %vm449_vm3, %v5987_v7, %v5977_v44 }
 0x4fd   :  { %v5075_v49 = vpack.c.bf16 %v3284_v59, %v3283_v54  ;;  %v5992_v15 = vunpack.i.h.bf16 %v5990_v58  ;;  %v5991_v60 = vunpack.i.l.bf16 %v5990_v58  ;;  %v5995_v5 = vpop.permute.xlu0 %5994  ;;  %v5073_v20 = vpack.c.bf16 %v3316_v40, %v3315_v33 }
 0x4fe   :  { %v5997_v48 = vunpack.i.h.bf16 %v5995_v5  ;;  %v5996_v17 = vunpack.i.l.bf16 %v5995_v5 }
 0x4ff   :  { %4021 = vmatmul.mubr.f32.vlgmr.msra.gmra.mrb[36].mxu0 %v3413_v32  ;;  %5074 = vmatprep.subr.bf16.mxu0 %v5073_v20  ;;  %v3444_v32 = vld [vmem:[%s8241_s10 + $0x108] sm:$0xff]  ;;  %v3443_v20 = vld [vmem:[%s8241_s10 + $0x100] sm:$0xff] }
 0x500   :  { %v3285_v24 = vsel %vm449_vm3, %v5991_v60, %v5996_v17  ;;  %v3286_v6 = vsel %vm449_vm3, %v5992_v15, %v5997_v48  ;;  %v6000_v4 = vpop.permute.xlu1 %5999  ;;  %5076 = vmatpush1.bf16.msra.mxu0 %v5075_v49  ;;  %4026 = vmatprep.mubr.f32.mxu0 %v3420_v27  ;;  %v3317_v35 = vsel %vm449_vm3, %v5996_v17, %v5991_v60 }
 0x501   :  { %v5079_v53 = vpack.c.bf16 %v3286_v6, %v3285_v24  ;;  %v6002_v16 = vunpack.i.h.bf16 %v6000_v4  ;;  %v6001_v0 = vunpack.i.l.bf16 %v6000_v4  ;;  %v6005_v25 = vpop.permute.xlu0 %6004  ;;  %v3318_v63 = vsel %vm449_vm3, %v5997_v48, %v5992_v15 }
 0x502   :  { %v6007_v28 = vunpack.i.h.bf16 %v6005_v25  ;;  %v6006_v43 = vunpack.i.l.bf16 %v6005_v25  ;;  %v5077_v19 = vpack.c.bf16 %v3318_v63, %v3317_v35 }
 0x503   :  { %4027 = vmatmul.mubr.f32.gmra.mrb[38].mxu0 %v3419_v39  ;;  %v3450_v39 = vld [vmem:[%s8241_s10 + $0x138] sm:$0xff] }
 0x504   :  { %v3287_v29 = vsel %vm449_vm3, %v6001_v0, %v6006_v43  ;;  %v3288_v12 = vsel %vm449_vm3, %v6002_v16, %v6007_v28  ;;  %5078 = vmatprep.subr.bf16.mxu0 %v5077_v19  ;;  %v6010_v14 = vpop.permute.xlu1 %6009  ;;  %4032 = vmatprep.mubr.f32.mxu0 %v3426_v41  ;;  %v3319_v47 = vsel %vm449_vm3, %v6006_v43, %v6001_v0  ;;  %v3449_v41 = vld [vmem:[%s8241_s10 + $0x130] sm:$0xff] }
 0x505   :  { %v5083_v36 = vpack.c.bf16 %v3288_v12, %v3287_v29  ;;  %v6012_v21 = vunpack.i.h.bf16 %v6010_v14  ;;  %v6011_v2 = vunpack.i.l.bf16 %v6010_v14  ;;  %5080 = vmatpush1.bf16.msra.mxu0 %v5079_v53  ;;  %v6015_v8 = vpop.permute.xlu0 %6014  ;;  %v3320_v13 = vsel %vm449_vm3, %v6007_v28, %v6002_v16 }
 0x506   :  { %v6017_v31 = vunpack.i.h.bf16 %v6015_v8  ;;  %v6016_v18 = vunpack.i.l.bf16 %v6015_v8  ;;  %v5081_v51 = vpack.c.bf16 %v3320_v13, %v3319_v47 }
 0x507   :  { %4033 = vmatmul.mubr.f32.gmra.mrb[40].mxu0 %v3425_v26  ;;  %v3456_v26 = vld [vmem:[%s8241_s10 + $0x168] sm:$0xff] }
 0x508   :  { %v3289_v46 = vsel %vm449_vm3, %v6011_v2, %v6016_v18  ;;  %v3290_v45 = vsel %vm449_vm3, %v6012_v21, %v6017_v31  ;;  %5082 = vmatprep.subr.bf16.mxu0 %v5081_v51  ;;  %v6020_v50 = vpop.permute.xlu1 %6019  ;;  %4038 = vmatprep.mubr.f32.mxu0 %v3432_v37  ;;  %v3321_v61 = vsel %vm449_vm3, %v6016_v18, %v6011_v2  ;;  %v3455_v37 = vld [vmem:[%s8241_s10 + $0x160] sm:$0xff] }
 0x509   :  { %v5087_v56 = vpack.c.bf16 %v3290_v45, %v3289_v46  ;;  %v6022_v11 = vunpack.i.h.bf16 %v6020_v50  ;;  %v6021_v62 = vunpack.i.l.bf16 %v6020_v50  ;;  %5084 = vmatpush1.bf16.msra.mxu0 %v5083_v36  ;;  %v6025_v3 = vpop.permute.xlu0 %6024  ;;  %v3322_v9 = vsel %vm449_vm3, %v6017_v31, %v6012_v21 }
 0x50a   :  { %v6027_v30 = vunpack.i.h.bf16 %v6025_v3  ;;  %v6026_v38 = vunpack.i.l.bf16 %v6025_v3  ;;  %v5085_v22 = vpack.c.bf16 %v3322_v9, %v3321_v61 }
 0x50b   :  { %4039 = vmatmul.mubr.f32.gmra.mrb[42].mxu0 %v3431_v57  ;;  %v3462_v57 = vld [vmem:[%s8241_s10 + $0x198] sm:$0xff] }
 0x50c   :  { %v3291_v55 = vsel %vm449_vm3, %v6021_v62, %v6026_v38  ;;  %v3292_v44 = vsel %vm449_vm3, %v6022_v11, %v6027_v30  ;;  %5086 = vmatprep.subr.bf16.mxu0 %v5085_v22  ;;  %v6030_v52 = vpop.permute.xlu1 %6029  ;;  %4044 = vmatprep.mubr.f32.mxu0 %v3438_v34  ;;  %v3323_v10 = vsel %vm449_vm3, %v6026_v38, %v6021_v62  ;;  %v3461_v34 = vld [vmem:[%s8241_s10 + $0x190] sm:$0xff] }
 0x50d   :  { %v5091_v7 = vpack.c.bf16 %v3292_v44, %v3291_v55  ;;  %v6032_v23 = vunpack.i.h.bf16 %v6030_v52  ;;  %v6031_v54 = vunpack.i.l.bf16 %v6030_v52  ;;  %5088 = vmatpush1.bf16.msra.mxu0 %v5087_v56  ;;  %v6035_v59 = vpop.permute.xlu0 %6034  ;;  %v3324_v58 = vsel %vm449_vm3, %v6027_v30, %v6022_v11 }
 0x50e   :  { %v6037_v33 = vunpack.i.h.bf16 %v6035_v59  ;;  %v6036_v40 = vunpack.i.l.bf16 %v6035_v59  ;;  %v5089_v49 = vpack.c.bf16 %v3324_v58, %v3323_v10 }
 0x50f   :  { %4045 = vmatmul.mubr.f32.gmra.mrb[44].mxu0 %v3437_v1  ;;  %v3468_v1 = vld [vmem:[%s8241_s10 + $0x1c8] sm:$0xff] }
 0x510   :  { %v3293_v15 = vsel %vm449_vm3, %v6031_v54, %v6036_v40  ;;  %v3294_v60 = vsel %vm449_vm3, %v6032_v23, %v6037_v33  ;;  %5090 = vmatprep.subr.bf16.mxu0 %v5089_v49  ;;  %v6040_v5 = vpop.permute.xlu1 %6039  ;;  %4050 = vmatprep.mubr.f32.mxu0 %v3444_v32  ;;  %v3325_v27 = vsel %vm449_vm3, %v6036_v40, %v6031_v54  ;;  %v3467_v32 = vld [vmem:[%s8241_s10 + $0x1c0] sm:$0xff] }
 0x511   :  { %v5095_v48 = vpack.c.bf16 %v3294_v60, %v3293_v15  ;;  %v6042_v17 = vunpack.i.h.bf16 %v6040_v5  ;;  %v6041_v24 = vunpack.i.l.bf16 %v6040_v5  ;;  %5092 = vmatpush1.bf16.msra.mxu0 %v5091_v7  ;;  %v6045_v6 = vpop.permute.xlu0 %6044  ;;  %v3326_v4 = vsel %vm449_vm3, %v6037_v33, %v6032_v23 }
 0x512   :  { %v6047_v35 = vunpack.i.h.bf16 %v6045_v6  ;;  %v6046_v53 = vunpack.i.l.bf16 %v6045_v6  ;;  %v5093_v16 = vpack.c.bf16 %v3326_v4, %v3325_v27 }
 0x513   :  { %4051 = vmatmul.mubr.f32.gmra.mrb[46].mxu0 %v3443_v20  ;;  %v3474_v20 = vld [vmem:[%s8241_s10 + $0x1f8] sm:$0xff] }
 0x514   :  { %v3295_v0 = vsel %vm449_vm3, %v6041_v24, %v6046_v53  ;;  %v3296_v25 = vsel %vm449_vm3, %v6042_v17, %v6047_v35  ;;  %5094 = vmatprep.subr.bf16.mxu0 %v5093_v16  ;;  %v6050_v63 = vpop.permute.xlu1 %6049  ;;  %4056 = vmatprep.mubr.f32.mxu0 %v3450_v39  ;;  %v3327_v28 = vsel %vm449_vm3, %v6046_v53, %v6041_v24  ;;  %v3473_v39 = vld [vmem:[%s8241_s10 + $0x1f0] sm:$0xff] }
 0x515   :  { %v5099_v43 = vpack.c.bf16 %v3296_v25, %v3295_v0  ;;  %v6052_v19 = vunpack.i.h.bf16 %v6050_v63  ;;  %v6051_v29 = vunpack.i.l.bf16 %v6050_v63  ;;  %5096 = vmatpush1.bf16.msra.mxu0 %v5095_v48  ;;  %v6055_v12 = vpop.permute.xlu0 %6054  ;;  %v3328_v14 = vsel %vm449_vm3, %v6047_v35, %v6042_v17 }
 0x516   :  { %v6057_v47 = vunpack.i.h.bf16 %v6055_v12  ;;  %v6056_v36 = vunpack.i.l.bf16 %v6055_v12  ;;  %v5097_v21 = vpack.c.bf16 %v3328_v14, %v3327_v28 }
 0x517   :  { %4057 = vmatmul.mubr.f32.gmra.mrb[48].mxu0 %v3449_v41  ;;  %v3480_v41 = vld [vmem:[%s8241_s10 + $0x228] sm:$0xff] }
 0x518   :  { %v3297_v2 = vsel %vm449_vm3, %v6051_v29, %v6056_v36  ;;  %v3298_v8 = vsel %vm449_vm3, %v6052_v19, %v6057_v47  ;;  %5098 = vmatprep.subr.bf16.mxu0 %v5097_v21  ;;  %v6060_v13 = vpop.permute.xlu1 %6059  ;;  %4062 = vmatprep.mubr.f32.mxu0 %v3456_v26  ;;  %v3329_v31 = vsel %vm449_vm3, %v6056_v36, %v6051_v29  ;;  %v3479_v26 = vld [vmem:[%s8241_s10 + $0x220] sm:$0xff] }
 0x519   :  { %v5103_v18 = vpack.c.bf16 %v3298_v8, %v3297_v2  ;;  %v6062_v51 = vunpack.i.h.bf16 %v6060_v13  ;;  %v6061_v46 = vunpack.i.l.bf16 %v6060_v13  ;;  %5100 = vmatpush1.bf16.msra.mxu0 %v5099_v43  ;;  %v6065_v45 = vpop.permute.xlu0 %6064  ;;  %v3330_v50 = vsel %vm449_vm3, %v6057_v47, %v6052_v19 }
 0x51a   :  { %v6067_v61 = vunpack.i.h.bf16 %v6065_v45  ;;  %v6066_v56 = vunpack.i.l.bf16 %v6065_v45  ;;  %v5101_v11 = vpack.c.bf16 %v3330_v50, %v3329_v31 }
 0x51b   :  { %4063 = vmatmul.mubr.f32.gmra.mrb[50].mxu0 %v3455_v37  ;;  %v3486_v37 = vld [vmem:[%s8241_s10 + $0x258] sm:$0xff] }
 0x51c   :  { %v3299_v62 = vsel %vm449_vm3, %v6061_v46, %v6066_v56  ;;  %v3300_v3 = vsel %vm449_vm3, %v6062_v51, %v6067_v61  ;;  %5102 = vmatprep.subr.bf16.mxu0 %v5101_v11  ;;  %v6070_v9 = vpop.permute.xlu1 %6069  ;;  %4068 = vmatprep.mubr.f32.mxu0 %v3462_v57  ;;  %v3331_v30 = vsel %vm449_vm3, %v6066_v56, %v6061_v46  ;;  %v3485_v57 = vld [vmem:[%s8241_s10 + $0x250] sm:$0xff] }
 0x51d   :  { %v5107_v38 = vpack.c.bf16 %v3300_v3, %v3299_v62  ;;  %v6072_v22 = vunpack.i.h.bf16 %v6070_v9  ;;  %v6071_v55 = vunpack.i.l.bf16 %v6070_v9  ;;  %5104 = vmatpush1.bf16.msra.mxu0 %v5103_v18  ;;  %v6075_v44 = vpop.permute.xlu0 %6074  ;;  %v3332_v52 = vsel %vm449_vm3, %v6067_v61, %v6062_v51 }
 0x51e   :  { %v6077_v10 = vunpack.i.h.bf16 %v6075_v44  ;;  %v6076_v7 = vunpack.i.l.bf16 %v6075_v44  ;;  %v5105_v23 = vpack.c.bf16 %v3332_v52, %v3331_v30 }
 0x51f   :  { %4069 = vmatmul.mubr.f32.gmra.mrb[52].mxu0 %v3461_v34  ;;  %v3492_v34 = vld [vmem:[%s8241_s10 + $0x288] sm:$0xff] }
 0x520   :  { %v3301_v54 = vsel %vm449_vm3, %v6071_v55, %v6076_v7  ;;  %v3302_v59 = vsel %vm449_vm3, %v6072_v22, %v6077_v10  ;;  %5106 = vmatprep.subr.bf16.mxu0 %v5105_v23  ;;  %v6080_v58 = vpop.permute.xlu1 %6079  ;;  %4074 = vmatprep.mubr.f32.mxu0 %v3468_v1  ;;  %v3333_v33 = vsel %vm449_vm3, %v6076_v7, %v6071_v55  ;;  %v3491_v1 = vld [vmem:[%s8241_s10 + $0x280] sm:$0xff] }
 0x521   :  { %v5111_v40 = vpack.c.bf16 %v3302_v59, %v3301_v54  ;;  %v6082_v49 = vunpack.i.h.bf16 %v6080_v58  ;;  %v6081_v15 = vunpack.i.l.bf16 %v6080_v58  ;;  %5108 = vmatpush1.bf16.msra.mxu0 %v5107_v38  ;;  %v6085_v60 = vpop.permute.xlu0 %6084  ;;  %v3334_v5 = vsel %vm449_vm3, %v6077_v10, %v6072_v22 }
 0x522   :  { %v6087_v27 = vunpack.i.h.bf16 %v6085_v60  ;;  %v6086_v48 = vunpack.i.l.bf16 %v6085_v60  ;;  %v5109_v17 = vpack.c.bf16 %v3334_v5, %v3333_v33 }
 0x523   :  { %4075 = vmatmul.mubr.f32.gmra.mrb[54].mxu0 %v3467_v32  ;;  %v3498_v32 = vld [vmem:[%s8241_s10 + $0x2b8] sm:$0xff] }
 0x524   :  { %v3303_v24 = vsel %vm449_vm3, %v6081_v15, %v6086_v48  ;;  %v3304_v6 = vsel %vm449_vm3, %v6082_v49, %v6087_v27  ;;  %5110 = vmatprep.subr.bf16.mxu0 %v5109_v17  ;;  %v6090_v4 = vpop.permute.xlu1 %6089  ;;  %4080 = vmatprep.mubr.f32.mxu0 %v3474_v20  ;;  %v3335_v35 = vsel %vm449_vm3, %v6086_v48, %v6081_v15  ;;  %v3497_v20 = vld [vmem:[%s8241_s10 + $0x2b0] sm:$0xff] }
 0x525   :  { %v5115_v53 = vpack.c.bf16 %v3304_v6, %v3303_v24  ;;  %v6092_v16 = vunpack.i.h.bf16 %v6090_v4  ;;  %v6091_v0 = vunpack.i.l.bf16 %v6090_v4  ;;  %5112 = vmatpush1.bf16.msra.mxu0 %v5111_v40  ;;  %v6095_v25 = vpop.permute.xlu0 %6094  ;;  %v3336_v63 = vsel %vm449_vm3, %v6087_v27, %v6082_v49 }
 0x526   :  { %v6097_v28 = vunpack.i.h.bf16 %v6095_v25  ;;  %v6096_v43 = vunpack.i.l.bf16 %v6095_v25  ;;  %v5113_v19 = vpack.c.bf16 %v3336_v63, %v3335_v35  ;;  %v4327_v25 = vld [vmem:[%s8243_s12 + $0x88] sm:$0xff] }
 0x527   :  { %4081 = vmatmul.mubr.f32.gmra.mrb[56].mxu0 %v3473_v39  ;;  %v3504_v39 = vld [vmem:[%s8241_s10 + $0x2e8] sm:$0xff] }
 0x528   :  { %v3305_v29 = vsel %vm449_vm3, %v6091_v0, %v6096_v43  ;;  %v3306_v12 = vsel %vm449_vm3, %v6092_v16, %v6097_v28  ;;  %5114 = vmatprep.subr.bf16.mxu0 %v5113_v19  ;;  %v6100_v14 = vpop.permute.xlu1 %6099  ;;  %4086 = vmatprep.mubr.f32.mxu0 %v3480_v41  ;;  %v3337_v47 = vsel %vm449_vm3, %v6096_v43, %v6091_v0  ;;  %v4326_v0 = vld [vmem:[%s8243_s12 + $0x80] sm:$0xff] }
 0x529   :  { %v5119_v36 = vpack.c.bf16 %v3306_v12, %v3305_v29  ;;  %v6102_v21 = vunpack.i.h.bf16 %v6100_v14  ;;  %v6101_v2 = vunpack.i.l.bf16 %v6100_v14  ;;  %5116 = vmatpush1.bf16.msra.mxu0 %v5115_v53  ;;  %v6105_v8 = vpop.permute.xlu0 %6104  ;;  %v3338_v13 = vsel %vm449_vm3, %v6097_v28, %v6092_v16  ;;  %v3503_v28 = vld [vmem:[%s8241_s10 + $0x2e0] sm:$0xff]  ;;  %v3416_v12 = vld [vmem:[%s8241_s10 + $0x28] sm:$0xff] }
 0x52a   :  { %v6107_v31 = vunpack.i.h.bf16 %v6105_v8  ;;  %v6106_v18 = vunpack.i.l.bf16 %v6105_v8  ;;  %v5117_v51 = vpack.c.bf16 %v3338_v13, %v3337_v47  ;;  %v4310_v47 = vld [vmem:[%s8243_s12] sm:$0xff]  ;;  %v3422_v13 = vld [vmem:[%s8241_s10 + $0x58] sm:$0xff] }
 0x52b   :  { %4087 = vmatmul.mubr.f32.gmra.mrb[58].mxu0 %v3479_v26  ;;  %v5137_v26 = vpack.c.bf16 %v4327_v25, %v4326_v0  ;;  %v3457_v0 = vld [vmem:[%s8241_s10 + $0x170] sm:$0xff]  ;;  %v3464_v25 = vld [vmem:[%s8241_s10 + $0x1a8] sm:$0xff] }
 0x52c   :  { %v3307_v46 = vsel %vm449_vm3, %v6101_v2, %v6106_v18  ;;  %v3308_v45 = vsel %vm449_vm3, %v6102_v21, %v6107_v31  ;;  %5118 = vmatprep.subr.bf16.mxu0 %v5117_v51  ;;  %v6110_v50 = vpop.permute.xlu1 %6109  ;;  %4092 = vmatprep.mubr.f32.mxu0 %v3486_v37  ;;  %v3339_v61 = vsel %vm449_vm3, %v6106_v18, %v6101_v2  ;;  %v3415_v2 = vld [vmem:[%s8241_s10 + $0x20] sm:$0xff]  ;;  %v4313_v18 = vld [vmem:[%s8243_s12 + $0x18] sm:$0xff] }
 0x52d   :  { %v5123_v56 = vpack.c.bf16 %v3308_v45, %v3307_v46  ;;  %v6112_v11 = vunpack.i.h.bf16 %v6110_v50  ;;  %v6111_v62 = vunpack.i.l.bf16 %v6110_v50  ;;  %5120 = vmatpush1.bf16.msra.mxu0 %v5119_v36  ;;  %v6115_v3 = vpop.permute.xlu0 %6114  ;;  %v3340_v9 = vsel %vm449_vm3, %v6107_v31, %v6102_v21  ;;  %v4311_v36 = vld [vmem:[%s8243_s12 + $0x8] sm:$0xff]  ;;  %v4329_v21 = vld [vmem:[%s8243_s12 + $0x98] sm:$0xff]  ;;  %v4312_v31 = vld [vmem:[%s8243_s12 + $0x10] sm:$0xff] }
 0x52e   :  { %v6117_v30 = vunpack.i.h.bf16 %v6115_v3  ;;  %v6116_v38 = vunpack.i.l.bf16 %v6115_v3  ;;  %v5121_v22 = vpack.c.bf16 %v3340_v9, %v3339_v61  ;;  %v5139_v8 = vpack.c.bf16 %v4311_v36, %v4310_v47  ;;  %v4330_v51 = vld [vmem:[%s8243_s12 + $0xa0] sm:$0xff]  ;;  %v4331_v46 = vld [vmem:[%s8243_s12 + $0xa8] sm:$0xff]  ;;  %v3421_v45 = vld [vmem:[%s8241_s10 + $0x50] sm:$0xff] }
 0x52f   :  { %4093 = vmatmul.mubr.f32.gmra.mrb[60].mxu0 %v3485_v57  ;;  %v5141_v37 = vpack.c.bf16 %v4329_v21, %v4328_v42  ;;  %v5143_v50 = vpack.c.bf16 %v4313_v18, %v4312_v31  ;;  %v3428_v57 = vld [vmem:[%s8241_s10 + $0x88] sm:$0xff]  ;;  %v5145_v61 = vpack.c.bf16 %v4331_v46, %v4330_v51  ;;  %v4333_v3 = vld [vmem:[%s8243_s12 + $0xb8] sm:$0xff]  ;;  %v3427_v9 = vld [vmem:[%s8241_s10 + $0x80] sm:$0xff] }
 0x530   :  { %v3309_v55 = vsel %vm449_vm3, %v6111_v62, %v6116_v38  ;;  %v3310_v44 = vsel %vm449_vm3, %v6112_v11, %v6117_v30  ;;  %5122 = vmatprep.subr.bf16.mxu0 %v5121_v22  ;;  %v6120_v52 = vpop.permute.xlu1 %6119  ;;  %4098 = vmatprep.mubr.f32.mxu0 %v3492_v34  ;;  %v3341_v10 = vsel %vm449_vm3, %v6116_v38, %v6111_v62  ;;  %v4332_v62 = vld [vmem:[%s8243_s12 + $0xb0] sm:$0xff]  ;;  %v3494_v47 = vld [vmem:[%s8241_s10 + $0x298] sm:$0xff]  ;;  %v3500_v42 = vld [vmem:[%s8241_s10 + $0x2c8] sm:$0xff] }
 0x531   :  { %v5127_v7 = vpack.c.bf16 %v3310_v44, %v3309_v55  ;;  %v6122_v23 = vunpack.i.h.bf16 %v6120_v52  ;;  %v6121_v54 = vunpack.i.l.bf16 %v6120_v52  ;;  %5124 = vmatpush1.bf16.msra.mxu0 %v5123_v56  ;;  %v6125_v59 = vpop.permute.xlu0 %6124  ;;  %v3342_v58 = vsel %vm449_vm3, %v6117_v30, %v6112_v11  ;;  %v4314_v56 = vld [vmem:[%s8243_s12 + $0x20] sm:$0xff]  ;;  %v4315_v11 = vld [vmem:[%s8243_s12 + $0x28] sm:$0xff]  ;;  %v3434_v30 = vld [vmem:[%s8241_s10 + $0xb8] sm:$0xff] }
 0x532   :  { %v6127_v33 = vunpack.i.h.bf16 %v6125_v59  ;;  %v6126_v40 = vunpack.i.l.bf16 %v6125_v59  ;;  %v5125_v49 = vpack.c.bf16 %v3342_v58, %v3341_v10  ;;  %v5147_v34 = vpack.c.bf16 %v4315_v11, %v4314_v56  ;;  %v4316_v22 = vld [vmem:[%s8243_s12 + $0x30] sm:$0xff]  ;;  %v4317_v55 = vld [vmem:[%s8243_s12 + $0x38] sm:$0xff]  ;;  %v4334_v44 = vld [vmem:[%s8243_s12 + $0xc0] sm:$0xff] }
 0x533   :  { %4099 = vmatmul.mubr.f32.gmra.mrb[62].mxu0 %v3491_v1  ;;  %v5149_v38 = vpack.c.bf16 %v4333_v3, %v4332_v62  ;;  %v4335_v52 = vld [vmem:[%s8243_s12 + $0xc8] sm:$0xff]  ;;  %v3433_v1 = vld [vmem:[%s8241_s10 + $0xb0] sm:$0xff]  ;;  %v5151_v10 = vpack.c.bf16 %v4317_v55, %v4316_v22  ;;  %v3499_v21 = vld [vmem:[%s8241_s10 + $0x2c0] sm:$0xff] }
 0x534   :  { %v3311_v15 = vsel %vm449_vm3, %v6121_v54, %v6126_v40  ;;  %v3312_v60 = vsel %vm449_vm3, %v6122_v23, %v6127_v33  ;;  %5126 = vmatprep.subr.bf16.mxu0 %v5125_v49  ;;  %v6130_v5 = vpop.permute.xlu1 %6129  ;;  %4104 = vmatprep.mubr.f32.mxu0 %v3498_v32  ;;  %v3343_v27 = vsel %vm449_vm3, %v6126_v40, %v6121_v54  ;;  %v4318_v54 = vld [vmem:[%s8243_s12 + $0x40] sm:$0xff]  ;;  %v4319_v59 = vld [vmem:[%s8243_s12 + $0x48] sm:$0xff]  ;;  %v4336_v58 = vld [vmem:[%s8243_s12 + $0xd0] sm:$0xff] }
 0x535   :  { %v5131_v48 = vpack.c.bf16 %v3312_v60, %v3311_v15  ;;  %v6132_v17 = vunpack.i.h.bf16 %v6130_v5  ;;  %v6131_v24 = vunpack.i.l.bf16 %v6130_v5  ;;  %5128 = vmatpush1.bf16.msra.mxu0 %v5127_v7  ;;  %v6135_v6 = vpop.permute.xlu0 %6134  ;;  %v3344_v4 = vsel %vm449_vm3, %v6127_v33, %v6122_v23  ;;  %v3440_v7 = vld [vmem:[%s8241_s10 + $0xe8] sm:$0xff]  ;;  %v4337_v32 = vld [vmem:[%s8243_s12 + $0xd8] sm:$0xff]  ;;  %v3439_v33 = vld [vmem:[%s8241_s10 + $0xe0] sm:$0xff] }
 0x536   :  { %v6137_v35 = vunpack.i.h.bf16 %v6135_v6  ;;  %v6136_v53 = vunpack.i.l.bf16 %v6135_v6  ;;  %v5129_v16 = vpack.c.bf16 %v3344_v4, %v3343_v27  ;;  %v5153_v23 = vpack.c.bf16 %v4335_v52, %v4334_v44  ;;  %v3446_v49 = vld [vmem:[%s8241_s10 + $0x118] sm:$0xff]  ;;  %v4320_v60 = vld [vmem:[%s8243_s12 + $0x50] sm:$0xff]  ;;  %v4339_v27 = vld [vmem:[%s8243_s12 + $0xe8] sm:$0xff] }
 0x537   :  { %4105 = vmatmul.mubr.f32.gmra.mrb[64].mxu0 %v3497_v20  ;;  %v5155_v40 = vpack.c.bf16 %v4319_v59, %v4318_v54  ;;  %v5157_v15 = vpack.c.bf16 %v4337_v32, %v4336_v58  ;;  %v4321_v5 = vld [vmem:[%s8243_s12 + $0x58] sm:$0xff]  ;;  %v4338_v20 = vld [vmem:[%s8243_s12 + $0xe0] sm:$0xff]  ;;  %v3493_v36 = vld [vmem:[%s8241_s10 + $0x290] sm:$0xff] }
 0x538   :  { %v3313_v63 = vsel %vm449_vm3, %v6131_v24, %v6136_v53  ;;  %v3314_v41 = vsel %vm449_vm3, %v6132_v17, %v6137_v35  ;;  %5130 = vmatprep.subr.bf16.mxu0 %v5129_v16  ;;  %4110 = vmatprep.mubr.f32.mxu0 %v3504_v39  ;;  %v3345_v43 = vsel %vm449_vm3, %v6136_v53, %v6131_v24  ;;  %v3452_v24 = vld [vmem:[%s8241_s10 + $0x148] sm:$0xff]  ;;  %v4322_v4 = vld [vmem:[%s8243_s12 + $0x60] sm:$0xff]  ;;  %v3458_v16 = vld [vmem:[%s8241_s10 + $0x178] sm:$0xff] }
 0x539   :  { %v5135_v19 = vpack.c.bf16 %v3314_v41, %v3313_v63  ;;  %5132 = vmatpush1.bf16.msra.mxu0 %v5131_v48  ;;  %v3346_v29 = vsel %vm449_vm3, %v6137_v35, %v6132_v17  ;;  %v3445_v48 = vld [vmem:[%s8241_s10 + $0x110] sm:$0xff]  ;;  %v5159_v17 = vpack.c.bf16 %v4321_v5, %v4320_v60  ;;  %v5161_v6 = vpack.c.bf16 %v4339_v27, %v4338_v20  ;;  %v4323_v39 = vld [vmem:[%s8243_s12 + $0x68] sm:$0xff]  ;;  %v3451_v35 = vld [vmem:[%s8241_s10 + $0x140] sm:$0xff] }
 0x53a   :  { %v5133_v14 = vpack.c.bf16 %v3346_v29, %v3345_v43  ;;  %v5163_v53 = vpack.c.bf16 %v4323_v39, %v4322_v4  ;;  %v3463_v63 = vld [vmem:[%s8241_s10 + $0x1a0] sm:$0xff]  ;;  %v3470_v41 = vld [vmem:[%s8241_s10 + $0x1d8] sm:$0xff]  ;;  %v3476_v43 = vld [vmem:[%s8241_s10 + $0x208] sm:$0xff] }
 0x53b   :  { %4111 = vmatmul.mubr.f32.gmra.mrb[66].mxu0 %v3503_v28  ;;  %v3469_v28 = vld [vmem:[%s8241_s10 + $0x1d0] sm:$0xff]  ;;  %v3482_v29 = vld [vmem:[%s8241_s10 + $0x238] sm:$0xff] }
 0x53c   :  { %5134 = vmatprep.subr.bf16.mxu0 %v5133_v14  ;;  %4181 = vmatprep.mubr.f32.mxu0 %v3416_v12  ;;  %v3481_v12 = vld [vmem:[%s8241_s10 + $0x230] sm:$0xff]  ;;  %v3488_v14 = vld [vmem:[%s8241_s10 + $0x268] sm:$0xff]  ;;  %v4325_v51 = vld [vmem:[%s8243_s12 + $0x78] sm:$0xff] }
 0x53d   :  { %5136 = vmatpush1.bf16.msra.mxu0 %v5135_v19  ;;  %v3475_v19 = vld [vmem:[%s8241_s10 + $0x200] sm:$0xff]  ;;  %v4324_v18 = vld [vmem:[%s8243_s12 + $0x70] sm:$0xff] }
 0x53e   :  { %5138 = vmatprep.subr.bf16.mxu0 %v5137_v26  ;;  %v3487_v26 = vld [vmem:[%s8241_s10 + $0x260] sm:$0xff]  ;;  %v5167_v46 = vpack.c.bf16 %v4325_v51, %v4324_v18 }
 0x540   :  { %4182 = vmatmul.mubr.f32.vlgmr.msra.gmra.mrb[36].mxu0 %v3415_v2  ;;  %v3506_v2 = vld [vmem:[%s8241_s10 + $0x2f8] sm:$0xff] }
 0x541   :  { %4187 = vmatprep.mubr.f32.mxu0 %v3422_v13  ;;  %5140 = vmatpush3.bf16.msra.mxu0 %v5139_v8  ;;  %v3505_v8 = vld [vmem:[%s8241_s10 + $0x2f0] sm:$0xff]  ;;  %s6298_s10 = smov [#allocation12]  }
 0x542   :  { %5142 = vmatprep.subr.bf16.mxu0 %v5141_v37  ;;  %v4340_v13 = vld [vmem:[%s8243_s12 + $0xf0] sm:$0xff]  ;;  %v4341_v37 = vld [vmem:[%s8243_s12 + $0xf8] sm:$0xff]  ;;  %s4536_s12 = sshll.u32 %s6298_s10, 4  ;;  %s4537_s12 = int_to_ptr.vmem [resolvable:$true] %s4536_s12 }
 0x543   :  { %v5165_v31 = vpack.c.bf16 %v4341_v37, %v4340_v13  ;;  %s6204_s0 = scalar_lea.vmem %s4537_s12, 64  ;;  %p6209_p11 = scmp.lt.s32.totalorder %s4537_s12, %s4537_s12 }
 0x544   :  { %4188 = vmatmul.mubr.f32.gmra.mrb[38].mxu0 %v3421_v45  ;;  %p6205_p10 = scmp.ne.s32.totalorder %s4537_s12, %s6204_s0  ;;  %p6210_p12 = scmp.lt.s32.totalorder %s6204_s0, %s6204_s0 }
 0x545   :  { %4193 = vmatprep.mubr.f32.mxu0 %v3428_v57  ;;  %5144 = vmatpush3.bf16.msra.mxu0 %v5143_v50  ;;  %v3718_v45 = vpop.permute.xlu1 %3717 }
 0x546   :  { %5146 = vmatprep.subr.bf16.mxu0 %v5145_v61  ;;  %v3723_v11 = vpop.permute.xlu0 %3722  ;;  %p6211_p13 = por %p6210_p12, %p6209_p11 }
 0x548   :  { %4194 = vmatmul.mubr.f32.gmra.mrb[40].mxu0 %v3427_v9  ;;  %p6212_p0 = pnand %p6211_p13, %p6205_p10 }
 0x549   :  { %4199 = vmatprep.mubr.f32.mxu0 %v3434_v30  ;;  %5148 = vmatpush3.bf16.msra.mxu0 %v5147_v34  ;;  %v3728_v22 = vpop.permute.xlu1 %3727 }
 0x54a   :  { %5150 = vmatprep.subr.bf16.mxu0 %v5149_v38 }
 0x54c   :  { %4200 = vmatmul.mubr.f32.gmra.mrb[42].mxu0 %v3433_v1 }
 0x54d   :  { %4205 = vmatprep.mubr.f32.mxu0 %v3440_v7  ;;  %5152 = vmatpush3.bf16.msra.mxu0 %v5151_v10 }
 0x54e   :  { %5154 = vmatprep.subr.bf16.mxu0 %v5153_v23  ;;  %v3733_v23 = vpop.permute.xlu0 %3732 }
 0x550   :  { %4206 = vmatmul.mubr.f32.gmra.mrb[44].mxu0 %v3439_v33 }
 0x551   :  { %4211 = vmatprep.mubr.f32.mxu0 %v3446_v49  ;;  %5156 = vmatpush3.bf16.msra.mxu0 %v5155_v40  ;;  %v3738_v49 = vpop.permute.xlu1 %3737 }
 0x552   :  { %5158 = vmatprep.subr.bf16.mxu0 %v5157_v15 }
 0x554   :  { %4212 = vmatmul.mubr.f32.gmra.mrb[46].mxu0 %v3445_v48 }
 0x555   :  { %4217 = vmatprep.mubr.f32.mxu0 %v3452_v24  ;;  %5160 = vmatpush3.bf16.msra.mxu0 %v5159_v17  ;;  %v3743_v17 = vpop.permute.xlu0 %3742 }
 0x556   :  { %5162 = vmatprep.subr.bf16.mxu0 %v5161_v6 }
 0x558   :  { %4218 = vmatmul.mubr.f32.gmra.mrb[48].mxu0 %v3451_v35 }
 0x559   :  { %4223 = vmatprep.mubr.f32.mxu0 %v3458_v16  ;;  %5164 = vmatpush3.bf16.msra.mxu0 %v5163_v53  ;;  %v3748_v16 = vpop.permute.xlu1 %3747 }
 0x55a   :  { %5166 = vmatprep.subr.bf16.mxu0 %v5165_v31 }
 0x55c   :  { %4224 = vmatmul.mubr.f32.gmra.mrb[50].mxu0 %v3457_v0 }
 0x55d   :  { %4229 = vmatprep.mubr.f32.mxu0 %v3464_v25  ;;  %5168 = vmatpush3.bf16.msra.mxu0 %v5167_v46 }
 0x560   :  { %4230 = vmatmul.mubr.f32.gmra.mrb[52].mxu0 %v3463_v63 }
 0x561   :  { %4235 = vmatprep.mubr.f32.mxu0 %v3470_v41 }
 0x564   :  { %4236 = vmatmul.mubr.f32.gmra.mrb[54].mxu0 %v3469_v28 }
 0x565   :  { %4241 = vmatprep.mubr.f32.mxu0 %v3476_v43 }
 0x568   :  { %4242 = vmatmul.mubr.f32.gmra.mrb[56].mxu0 %v3475_v19  ;;  %v3753_v19 = vpop.permute.xlu0 %3752 }
 0x569   :  { %4247 = vmatprep.mubr.f32.mxu0 %v3482_v29 }
 0x56c   :  { %4248 = vmatmul.mubr.f32.gmra.mrb[58].mxu0 %v3481_v12  ;;  %v3763_v18 = vpop.permute.xlu0 %3762 }
 0x56d   :  { %4253 = vmatprep.mubr.f32.mxu0 %v3488_v14 }
 0x570   :  { %4254 = vmatmul.mubr.f32.gmra.mrb[60].mxu0 %v3487_v26 }
 0x571   :  { %4259 = vmatprep.mubr.f32.mxu0 %v3494_v47 }
 0x574   :  { %4260 = vmatmul.mubr.f32.gmra.mrb[62].mxu0 %v3493_v36 }
 0x575   :  { %4265 = vmatprep.mubr.f32.mxu0 %v3500_v42  ;;  %v3758_v42 = vpop.permute.xlu1 %3757 }
 0x578   :  { %4266 = vmatmul.mubr.f32.gmra.mrb[64].mxu0 %v3499_v21 }
 0x579   :  { %4271 = vmatprep.mubr.f32.mxu0 %v3506_v2 }
 0x57c   :  { %4272 = vmatmul.mubr.f32.gmra.mrb[66].mxu0 %v3505_v8 }
 0x613   :  { %v4183_v50 = vpop.f32.mrb[36].mxu0 }
 0x614   :  { %v5281_v57 = vadd.f32 %v4183_v50, %v3718_v45  ;;  %v4185_v61 = vpop.f32.mrb[37].mxu0 }
 0x615   :  { %v5282_v56 = vadd.f32 %v4185_v61, %v3718_v45 }
 0x616   :  { %v4278_v9 = vmax.f32 %v5281_v57, 0.0 }
 0x617   :  { %v4279_v62 = vmax.f32 %v5282_v56, 0.0  ;;  %v4189_v3 = vpop.f32.mrb[38].mxu0  ;;  %v3768_v56 = vpop.permute.xlu1 %3767 }
 0x618   :  { %v5283_v34 = vadd.f32 %v4189_v3, %v3723_v11  ;;  %v4191_v30 = vpop.f32.mrb[39].mxu0 }
 0x619   :  { %v5284_v38 = vadd.f32 %v4191_v30, %v3723_v11  ;;  %4406 = vmatprep.mubr.f32.mxu0 %v4279_v62 }
 0x61a   :  { %4407 = vmatmul.mubr.f32.vlgmr.msra.gmra.mrb[68].mxu0 %v4278_v9  ;;  %v4280_v52 = vmax.f32 %v5283_v34, 0.0 }
 0x61b   :  { %v4281_v55 = vmax.f32 %v5284_v38, 0.0  ;;  %v4195_v44 = vpop.f32.mrb[40].mxu0  ;;  %v3773_v38 = vpop.permute.xlu0 %3772 }
 0x61c   :  { %v5285_v1 = vadd.f32 %v4195_v44, %v3728_v22  ;;  %v4197_v10 = vpop.f32.mrb[41].mxu0 }
 0x61d   :  { %v5286_v7 = vadd.f32 %v4197_v10, %v3728_v22  ;;  %4411 = vmatprep.mubr.f32.mxu0 %v4281_v55 }
 0x61e   :  { %4412 = vmatmul.mubr.f32.gmra.mrb[70].mxu0 %v4280_v52  ;;  %v4282_v58 = vmax.f32 %v5285_v1, 0.0 }
 0x61f   :  { %v4283_v54 = vmax.f32 %v5286_v7, 0.0  ;;  %v4201_v59 = vpop.f32.mrb[42].mxu0  ;;  %v3778_v7 = vpop.permute.xlu1 %3777 }
 0x620   :  { %v5287_v32 = vadd.f32 %v4201_v59, %v3733_v23  ;;  %v4203_v33 = vpop.f32.mrb[43].mxu0 }
 0x621   :  { %v5288_v40 = vadd.f32 %v4203_v33, %v3733_v23  ;;  %4416 = vmatprep.mubr.f32.mxu0 %v4283_v54 }
 0x622   :  { %4417 = vmatmul.mubr.f32.gmra.mrb[72].mxu0 %v4282_v58  ;;  %v4284_v5 = vmax.f32 %v5287_v32, 0.0 }
 0x623   :  { %v4285_v15 = vmax.f32 %v5288_v40, 0.0  ;;  %v4207_v60 = vpop.f32.mrb[44].mxu0  ;;  %v3783_v40 = vpop.permute.xlu0 %3782 }
 0x624   :  { %v5289_v20 = vadd.f32 %v4207_v60, %v3738_v49  ;;  %v4209_v27 = vpop.f32.mrb[45].mxu0 }
 0x625   :  { %v5290_v48 = vadd.f32 %v4209_v27, %v3738_v49  ;;  %4421 = vmatprep.mubr.f32.mxu0 %v4285_v15 }
 0x626   :  { %4422 = vmatmul.mubr.f32.gmra.mrb[74].mxu0 %v4284_v5  ;;  %v4286_v4 = vmax.f32 %v5289_v20, 0.0 }
 0x627   :  { %v4287_v24 = vmax.f32 %v5290_v48, 0.0  ;;  %v4213_v6 = vpop.f32.mrb[46].mxu0  ;;  %v3788_v48 = vpop.permute.xlu1 %3787 }
 0x628   :  { %v5291_v39 = vadd.f32 %v4213_v6, %v3743_v17  ;;  %v4215_v35 = vpop.f32.mrb[47].mxu0 }
 0x629   :  { %v5292_v53 = vadd.f32 %v4215_v35, %v3743_v17  ;;  %4426 = vmatprep.mubr.f32.mxu0 %v4287_v24 }
 0x62a   :  { %4427 = vmatmul.mubr.f32.gmra.mrb[76].mxu0 %v4286_v4  ;;  %v4288_v63 = vmax.f32 %v5291_v39, 0.0 }
 0x62b   :  { %v4289_v0 = vmax.f32 %v5292_v53, 0.0  ;;  %v4219_v25 = vpop.f32.mrb[48].mxu0  ;;  %v3793_v53 = vpop.permute.xlu0 %3792 }
 0x62c   :  { %v5293_v41 = vadd.f32 %v4219_v25, %v3748_v16  ;;  %v4221_v28 = vpop.f32.mrb[49].mxu0 }
 0x62d   :  { %v5294_v43 = vadd.f32 %v4221_v28, %v3748_v16  ;;  %4431 = vmatprep.mubr.f32.mxu0 %v4289_v0 }
 0x62e   :  { %4432 = vmatmul.mubr.f32.gmra.mrb[78].mxu0 %v4288_v63  ;;  %v4290_v14 = vmax.f32 %v5293_v41, 0.0 }
 0x62f   :  { %v4291_v29 = vmax.f32 %v5294_v43, 0.0  ;;  %v4225_v12 = vpop.f32.mrb[50].mxu0 }
 0x630   :  { %v5295_v26 = vadd.f32 %v4225_v12, %v3753_v19  ;;  %v4227_v47 = vpop.f32.mrb[51].mxu0 }
 0x631   :  { %v5296_v36 = vadd.f32 %v4227_v47, %v3753_v19  ;;  %4436 = vmatprep.mubr.f32.mxu0 %v4291_v29 }
 0x632   :  { %4437 = vmatmul.mubr.f32.gmra.mrb[80].mxu0 %v4290_v14  ;;  %v4292_v8 = vmax.f32 %v5295_v26, 0.0 }
 0x633   :  { %v4293_v21 = vmax.f32 %v5296_v36, 0.0  ;;  %v4231_v2 = vpop.f32.mrb[52].mxu0 }
 0x634   :  { %v5297_v13 = vadd.f32 %v4231_v2, %v3758_v42  ;;  %v4233_v37 = vpop.f32.mrb[53].mxu0 }
 0x635   :  { %v5298_v31 = vadd.f32 %v4233_v37, %v3758_v42  ;;  %4441 = vmatprep.mubr.f32.mxu0 %v4293_v21 }
 0x636   :  { %4442 = vmatmul.mubr.f32.gmra.mrb[82].mxu0 %v4292_v8  ;;  %v4294_v45 = vmax.f32 %v5297_v13, 0.0 }
 0x637   :  { %v4295_v51 = vmax.f32 %v5298_v31, 0.0  ;;  %v4237_v46 = vpop.f32.mrb[54].mxu0 }
 0x638   :  { %v5299_v50 = vadd.f32 %v4237_v46, %v3763_v18  ;;  %v4239_v57 = vpop.f32.mrb[55].mxu0 }
 0x639   :  { %v5300_v61 = vadd.f32 %v4239_v57, %v3763_v18  ;;  %4446 = vmatprep.mubr.f32.mxu0 %v4295_v51 }
 0x63a   :  { %4447 = vmatmul.mubr.f32.gmra.mrb[84].mxu0 %v4294_v45  ;;  %v4296_v3 = vmax.f32 %v5299_v50, 0.0 }
 0x63b   :  { %v4297_v11 = vmax.f32 %v5300_v61, 0.0  ;;  %v4243_v62 = vpop.f32.mrb[56].mxu0 }
 0x63c   :  { %v5301_v9 = vadd.f32 %v4243_v62, %v3768_v56  ;;  %v4245_v34 = vpop.f32.mrb[57].mxu0 }
 0x63d   :  { %v5302_v30 = vadd.f32 %v4245_v34, %v3768_v56  ;;  %4451 = vmatprep.mubr.f32.mxu0 %v4297_v11 }
 0x63e   :  { %4452 = vmatmul.mubr.f32.gmra.mrb[86].mxu0 %v4296_v3  ;;  %v4298_v44 = vmax.f32 %v5301_v9, 0.0 }
 0x63f   :  { %v4299_v22 = vmax.f32 %v5302_v30, 0.0  ;;  %v4249_v55 = vpop.f32.mrb[58].mxu0 }
 0x640   :  { %v5303_v52 = vadd.f32 %v4249_v55, %v3773_v38  ;;  %v4251_v1 = vpop.f32.mrb[59].mxu0 }
 0x641   :  { %v5304_v10 = vadd.f32 %v4251_v1, %v3773_v38  ;;  %4456 = vmatprep.mubr.f32.mxu0 %v4299_v22 }
 0x642   :  { %4457 = vmatmul.mubr.f32.gmra.mrb[88].mxu0 %v4298_v44  ;;  %v4300_v59 = vmax.f32 %v5303_v52, 0.0 }
 0x643   :  { %v4301_v23 = vmax.f32 %v5304_v10, 0.0  ;;  %v4255_v54 = vpop.f32.mrb[60].mxu0 }
 0x644   :  { %v5305_v58 = vadd.f32 %v4255_v54, %v3778_v7  ;;  %v4257_v32 = vpop.f32.mrb[61].mxu0 }
 0x645   :  { %v5306_v33 = vadd.f32 %v4257_v32, %v3778_v7  ;;  %4461 = vmatprep.mubr.f32.mxu0 %v4301_v23 }
 0x646   :  { %4462 = vmatmul.mubr.f32.gmra.mrb[90].mxu0 %v4300_v59  ;;  %v4302_v60 = vmax.f32 %v5305_v58, 0.0 }
 0x647   :  { %v4303_v49 = vmax.f32 %v5306_v33, 0.0  ;;  %v4261_v15 = vpop.f32.mrb[62].mxu0 }
 0x648   :  { %v5307_v5 = vadd.f32 %v4261_v15, %v3783_v40  ;;  %v4263_v20 = vpop.f32.mrb[63].mxu0 }
 0x649   :  { %v5308_v27 = vadd.f32 %v4263_v20, %v3783_v40  ;;  %4466 = vmatprep.mubr.f32.mxu0 %v4303_v49 }
 0x64a   :  { %4467 = vmatmul.mubr.f32.gmra.mrb[92].mxu0 %v4302_v60  ;;  %v4304_v6 = vmax.f32 %v5307_v5, 0.0 }
 0x64b   :  { %v4305_v17 = vmax.f32 %v5308_v27, 0.0  ;;  %v4267_v24 = vpop.f32.mrb[64].mxu0 }
 0x64c   :  { %v5309_v4 = vadd.f32 %v4267_v24, %v3788_v48  ;;  %v4269_v39 = vpop.f32.mrb[65].mxu0 }
 0x64d   :  { %v5310_v35 = vadd.f32 %v4269_v39, %v3788_v48  ;;  %4471 = vmatprep.mubr.f32.mxu0 %v4305_v17 }
 0x64e   :  { %4472 = vmatmul.mubr.f32.gmra.mrb[94].mxu0 %v4304_v6  ;;  %v4306_v25 = vmax.f32 %v5309_v4, 0.0 }
 0x64f   :  { %v4307_v16 = vmax.f32 %v5310_v35, 0.0  ;;  %v4273_v0 = vpop.f32.mrb[66].mxu0 }
 0x650   :  { %v5311_v63 = vadd.f32 %v4273_v0, %v3793_v53  ;;  %v4275_v41 = vpop.f32.mrb[67].mxu0 }
 0x651   :  { %v5312_v28 = vadd.f32 %v4275_v41, %v3793_v53  ;;  %4476 = vmatprep.mubr.f32.mxu0 %v4307_v16 }
 0x652   :  { %4477 = vmatmul.mubr.f32.gmra.mrb[96].mxu0 %v4306_v25  ;;  %v4308_v19 = vmax.f32 %v5311_v63, 0.0 }
 0x653   :  { %v4309_v43 = vmax.f32 %v5312_v28, 0.0 }
 0x655   :  { %4481 = vmatprep.mubr.f32.mxu0 %v4309_v43 }
 0x656   :  { %4482 = vmatmul.mubr.f32.gmra.mrb[98].mxu0 %v4308_v19 }
 0x6ed   :  { %v4658_v29 = vpop.f32.mrb[68].mxu0 }
 0x6ee   :  { %v4659_v12 = vpop.f32.mrb[69].mxu0 }
 0x6ef   :  { %v4660_v14 = vadd.f32 %v4659_v12, %v4658_v29 }
 0x6f1   :  { %v4661_v26 = vpop.f32.mrb[70].mxu0  ;;  %4487 = vxpose.xlu1.b32.start [1/16] (narrow) %v4660_v14, 8 }
 0x6f2   :  { %v4662_v47 = vpop.f32.mrb[71].mxu0 }
 0x6f3   :  { %v4663_v36 = vadd.f32 %v4662_v47, %v4661_v26 }
 0x6f4   :  { %6215 = shalt.err (!%p6212_p0)
}
 0x6f5   :  { %s6216_s18 = scalar_lea.hbm %s8245_s14, 64 }
 0x6f6   :  { %p6217_p1 = scmp.ne.s32.totalorder %s8245_s14, %s6216_s18  ;;  %p6220_p2 = scmp.lt.u32.totalorder %s6216_s18, %s8245_s14 }
 0x6f8   :  { %p6222_p3 = pnand %p6220_p2, %p6217_p1 }
 0x6fa   :  { %6225 = shalt.err (!%p6222_p3)
}
 0x6fb   :  { %4539 = dma.vmem_to_hbm [thread:$0]  %s4537_s12, 64, %s8245_s14, [#allocation13]   ;;  %v4664_v42 = vpop.f32.mrb[72].mxu0  ;;  %4488 = vxpose.xlu1.b32.cont [2/16] (narrow) %v4663_v36, 8 }
 0x6fc   :  { %s6226_s20 = scalar_lea.vmem %s4527_s25, 64  ;;  %p6231_p5 = scmp.lt.s32.totalorder %s4527_s25, %s4527_s25 }
 0x6fd   :  { %p6227_p4 = scmp.ne.s32.totalorder %s4527_s25, %s6226_s20  ;;  %p6232_p6 = scmp.lt.s32.totalorder %s6226_s20, %s6226_s20 }
 0x6ff   :  { %p6233_p7 = por %p6232_p6, %p6231_p5 }
 0x701   :  { %p6234_p8 = pnand %p6233_p7, %p6227_p4 }
 0x703   :  { %6237 = shalt.err (!%p6234_p8)
}
 0x704   :  { %s6238_s8 = scalar_lea.hbm %s8244_s13, 64 }
 0x705   :  { %p6239_p9 = scmp.ne.s32.totalorder %s8244_s13, %s6238_s8  ;;  %p6242_p10 = scmp.lt.u32.totalorder %s6238_s8, %s8244_s13 }
 0x707   :  { %p6244_p11 = pnand %p6242_p10, %p6239_p9 }
 0x709   :  { %6247 = shalt.err (!%p6244_p11)
}
 0x70a   :  { %4529 = dma.vmem_to_hbm [thread:$0]  %s4527_s25, 64, %s8244_s13, [#allocation7]   ;;  %v4665_v21 = vpop.f32.mrb[73].mxu0 }
 0x70b   :  { %v4666_v2 = vadd.f32 %v4665_v21, %v4664_v42  ;;  %v4667_v8 = vpop.f32.mrb[74].mxu0  ;;  %s6300_s13 = smov [#allocation14]  }
 0x70c   :  { %v4668_v13 = vpop.f32.mrb[75].mxu0  ;;  %s4546_s7 = sshll.u32 %s6300_s13, 4  ;;  %s4547_s7 = int_to_ptr.vmem [resolvable:$true] %s4546_s7 }
 0x70d   :  { %4489 = vxpose.xlu1.b32.cont [3/16] (narrow) %v4666_v2, 8  ;;  %v4669_v37 = vadd.f32 %v4668_v13, %v4667_v8  ;;  %v4670_v31 = vpop.f32.mrb[76].mxu0  ;;  %s6248_s22 = scalar_lea.vmem %s4547_s7, 64  ;;  %p6253_p13 = scmp.lt.s32.totalorder %s4547_s7, %s4547_s7 }
 0x70e   :  { %v4671_v18 = vpop.f32.mrb[77].mxu0  ;;  %p6249_p12 = scmp.ne.s32.totalorder %s4547_s7, %s6248_s22  ;;  %p6254_p0 = scmp.lt.s32.totalorder %s6248_s22, %s6248_s22 }
 0x70f   :  { %v4672_v51 = vadd.f32 %v4671_v18, %v4670_v31  ;;  %v4673_v46 = vpop.f32.mrb[78].mxu0 }
 0x710   :  { %v4674_v45 = vpop.f32.mrb[79].mxu0  ;;  %p6255_p1 = por %p6254_p0, %p6253_p13 }
 0x711   :  { %4490 = vxpose.xlu1.b32.cont [4/16] (narrow) %v4669_v37, 8  ;;  %v4675_v50 = vadd.f32 %v4674_v45, %v4673_v46  ;;  %v4676_v57 = vpop.f32.mrb[80].mxu0 }
 0x712   :  { %v4677_v61 = vpop.f32.mrb[81].mxu0  ;;  %p6256_p2 = pnand %p6255_p1, %p6249_p12 }
 0x713   :  { %v4678_v56 = vadd.f32 %v4677_v61, %v4676_v57  ;;  %v4679_v11 = vpop.f32.mrb[82].mxu0 }
 0x714   :  { %v4680_v62 = vpop.f32.mrb[83].mxu0 }
 0x715   :  { %4491 = vxpose.xlu1.b32.cont [5/16] (narrow) %v4672_v51, 8  ;;  %v4681_v3 = vadd.f32 %v4680_v62, %v4679_v11  ;;  %v4682_v9 = vpop.f32.mrb[84].mxu0 }
 0x716   :  { %v4683_v34 = vpop.f32.mrb[85].mxu0 }
 0x717   :  { %v4684_v30 = vadd.f32 %v4683_v34, %v4682_v9  ;;  %v4685_v38 = vpop.f32.mrb[86].mxu0 }
 0x718   :  { %v4686_v22 = vpop.f32.mrb[87].mxu0 }
 0x719   :  { %4492 = vxpose.xlu1.b32.cont [6/16] (narrow) %v4675_v50, 8  ;;  %v4687_v55 = vadd.f32 %v4686_v22, %v4685_v38  ;;  %v4688_v44 = vpop.f32.mrb[88].mxu0 }
 0x71a   :  { %v4689_v52 = vpop.f32.mrb[89].mxu0 }
 0x71b   :  { %v4690_v1 = vadd.f32 %v4689_v52, %v4688_v44  ;;  %v4691_v10 = vpop.f32.mrb[90].mxu0 }
 0x71c   :  { %v4692_v7 = vpop.f32.mrb[91].mxu0 }
 0x71d   :  { %4493 = vxpose.xlu1.b32.cont [7/16] (narrow) %v4678_v56, 8  ;;  %v4693_v23 = vadd.f32 %v4692_v7, %v4691_v10  ;;  %v4694_v54 = vpop.f32.mrb[92].mxu0 }
 0x71e   :  { %v4695_v59 = vpop.f32.mrb[93].mxu0 }
 0x71f   :  { %v4696_v58 = vadd.f32 %v4695_v59, %v4694_v54 }
 0x721   :  { %4494 = vxpose.xlu1.b32.cont [8/16] (narrow) %v4681_v3, 8  ;;  %v4697_v32 = vpop.f32.mrb[94].mxu0 }
 0x722   :  { %v4698_v33 = vpop.f32.mrb[95].mxu0 }
 0x723   :  { %v4699_v40 = vadd.f32 %v4698_v33, %v4697_v32 }
 0x725   :  { %4495 = vxpose.xlu1.b32.cont [9/16] (narrow) %v4684_v30, 8  ;;  %v4700_v49 = vpop.f32.mrb[96].mxu0 }
 0x726   :  { %v4701_v15 = vpop.f32.mrb[97].mxu0 }
 0x727   :  { %v4702_v60 = vadd.f32 %v4701_v15, %v4700_v49 }
 0x729   :  { %4496 = vxpose.xlu1.b32.cont [10/16] (narrow) %v4687_v55, 8  ;;  %v4703_v5 = vpop.f32.mrb[98].mxu0 }
 0x72a   :  { %v4704_v20 = vpop.f32.mrb[99].mxu0 }
 0x72b   :  { %v4705_v27 = vadd.f32 %v4704_v20, %v4703_v5 }
 0x72d   :  { %4497 = vxpose.xlu1.b32.cont [11/16] (narrow) %v4690_v1, 8 }
 0x731   :  { %4498 = vxpose.xlu1.b32.cont [12/16] (narrow) %v4693_v23, 8 }
 0x735   :  { %4499 = vxpose.xlu1.b32.cont [13/16] (narrow) %v4696_v58, 8 }
 0x739   :  { %4500 = vxpose.xlu1.b32.cont [14/16] (narrow) %v4699_v40, 8 }
 0x73d   :  { %4501 = vxpose.xlu1.b32.cont [15/16] (narrow) %v4702_v60, 8 }
 0x741   :  { %4502 = vxpose.xlu1.b32.end [16/16] (narrow) %v4705_v27, 8 }
 0x785   :  { %v4503_v48 = vpop.trf.xlu1 }
 0x786   :  { %4519 = vst [vmem:[#allocation14] sm:$0xf] %v4503_v48 }
 0x787   :  { %6259 = shalt.err (!%p6256_p2)
}
 0x788   :  { %s6260_s29 = scalar_lea.hbm %s8246_s15, 64 }
 0x789   :  { %p6261_p3 = scmp.ne.s32.totalorder %s8246_s15, %s6260_s29  ;;  %p6264_p4 = scmp.lt.u32.totalorder %s6260_s29, %s8246_s15 }
 0x78b   :  { %p6266_p5 = pnand %p6264_p4, %p6261_p3 }
 0x78d   :  { %6269 = shalt.err (!%p6266_p5)
}
 0x78e   :  { %4549 = dma.vmem_to_hbm [thread:$0]  %s4547_s7, 64, %s8246_s15, [#allocation13]  }
 0x78f   :  { %6274 = dma.done.wait [#allocation7], 64  }
 0x790   :  { %6275 = vsyncadd [#allocation7], 4294967232 }
 0x791   :  { %6276 = dma.done.wait [#allocation13], 128  }
 0x792   :  { %6277 = vsyncadd [#allocation13], 4294967168 }
 0x793   :  { %4559 = vsyncpa [#allocation6], 1 }
 0x794   :  { %4560 = vsyncpa [#allocation9], 1 }
 0x795   :  { %4561 = vsyncpa [#allocation7], 1 }
 0x796   :  { %4562 = vsyncpa [#allocation13], 1 }

</bundles_post_ra>
